<compile_context>
chip_gen: v7x
topology: tpu7x:2x2x1
jax: 0.10.0
libtpu: 0.0.40
codegen_flags: <defaults>
</compile_context>

<pallas_src>
import math
from functools import partial

import jax
import jax.numpy as jnp
import numpy as np
from jax.experimental import pallas as pl
from jax.experimental.pallas import tpu as pltpu


def _pe_kernel(gt_ref, coords_ref, o_ref, *, F):
    """Writes one lane-dense (3F, TN) tile of the positional-encoding slab."""
    gt = gt_ref[...]                       # (F, 3): gaussian matrix, transposed
    co = coords_ref[...]                   # (3, TN): normalized [-1, 1] coords
    cx = co[0:1, :]                        # (1, TN)
    cy = co[1:2, :]
    cz = co[2:3, :]

    # coords @ G done as a 3-term broadcast MAC (VPU), not an MXU matmul.
    proj = gt[:, 0:1] * cx + gt[:, 1:2] * cy + gt[:, 2:3] * cz   # (F, TN)
    proj = (2.0 * math.pi) * proj

    s = jnp.sin(proj)
    c = jnp.cos(proj)

    # [sin, cos, sin] as row-block stores -> full-width unmasked vst,
    # zero cross-lane relayout.
    o_ref[0:F, :] = s
    o_ref[F:2 * F, :] = c
    o_ref[2 * F:3 * F, :] = s


def _choose_lane_tile(n_total, rows, max_block_bytes=6 << 20):
    """Largest multiple-of-128 lane tile whose (rows, tile) f32 block stays
    under max_block_bytes; small volumes get a single full-axis block."""
    max_lanes = (max_block_bytes // (rows * 4)) // 128 * 128
    max_lanes = max(max_lanes, 128)
    if n_total <= max_lanes:
        return n_total
    return max_lanes


@partial(jax.jit, static_argnames=("size",))
def position_embedding_random_3d(gaussian_matrix, size):
    """Pallas equivalent of PositionEmbeddingRandom3D.forward(size).

    gaussian_matrix: (3, F) float32 buffer (scale * randn in the torch module).
    size:            (X, Y, Z) ints.
    returns:         (3*F, X, Y, Z) float32, matching the torch output layout.
    """
    X, Y, Z = size
    F = gaussian_matrix.shape[1]
    N = X * Y * Z
    C = 3 * F

    # Hoisted, grid-invariant index math: normalized coords for the flattened
    # (x, y, z) grid, mirroring the module's (quirky) axis/divisor pairing:
    #   x_embed = (d1 + 0.5)/X, y_embed = (d0 + 0.5)/Y, z_embed = (d2 + 0.5)/Z
    n = jnp.arange(N, dtype=jnp.int32)
    d0 = n // (Y * Z)
    d1 = (n // Z) % Y
    d2 = n % Z
    cx = 2.0 * ((d1.astype(jnp.float32) + 0.5) / X) - 1.0
    cy = 2.0 * ((d0.astype(jnp.float32) + 0.5) / Y) - 1.0
    cz = 2.0 * ((d2.astype(jnp.float32) + 0.5) / Z) - 1.0
    coords = jnp.stack([cx, cy, cz], axis=0)                  # (3, N)

    gt = gaussian_matrix.astype(jnp.float32).T                # (F, 3)

    tn = _choose_lane_tile(N, C)
    grid = (pl.cdiv(N, tn),)

    slab = pl.pallas_call(
        partial(_pe_kernel, F=F),
        out_shape=jax.ShapeDtypeStruct((C, N), jnp.float32),
        grid=grid,
        in_specs=[
            pl.BlockSpec((F, 3), lambda i: (0, 0)),
            pl.BlockSpec((3, tn), lambda i: (0, i)),
        ],
        out_specs=pl.BlockSpec((C, tn), lambda i: (0, i)),
        compiler_params=pltpu.CompilerParams(
            dimension_semantics=("parallel",),
            vmem_limit_bytes=32 * 1024 * 1024,
        ),
    )(gt, coords)

    # Row-major reshape is layout-free (no HBM transpose pass).
    return slab.reshape(C, X, Y, Z)


def _reference(gaussian_matrix, size):
    """Pure-JAX reference mirroring the PyTorch module (for verification)."""
    X, Y, Z = size
    grid = jnp.ones((X, Y, Z), jnp.float32)
    y_embed = (jnp.cumsum(grid, axis=0) - 0.5) / Y
    x_embed = (jnp.cumsum(grid, axis=1) - 0.5) / X
    z_embed = (jnp.cumsum(grid, axis=2) - 0.5) / Z
    coords = jnp.stack([x_embed, y_embed, z_embed], axis=-1)
    coords = 2.0 * coords - 1.0
    coords = coords @ gaussian_matrix
    coords = 2.0 * math.pi * coords
    pe = jnp.concatenate([jnp.sin(coords), jnp.cos(coords), jnp.sin(coords)], axis=-1)
    return jnp.transpose(pe, (3, 0, 1, 2))


if __name__ == "__main__":
    num_pos_feats = 64
    scale = 1.0

    key = jax.random.PRNGKey(0)
    # positional_encoding_gaussian_matrix = scale * randn((3, num_pos_feats))
    gaussian_matrix = scale * jax.random.normal(
        key, (3, num_pos_feats), dtype=jnp.float32)

    # Include non-equal X/Y/Z (and N not a multiple of 128) to catch any
    # axis/divisor swap, per the correctness review.
    for size in [(8, 8, 8), (4, 6, 10)]:
        pe = jax.block_until_ready(position_embedding_random_3d(gaussian_matrix, size))
        ref = jax.block_until_ready(_reference(gaussian_matrix, size))
        assert pe.shape == (3 * num_pos_feats,) + size, pe.shape
        np.testing.assert_allclose(np.asarray(pe), np.asarray(ref),
                                   rtol=1e-5, atol=1e-5)

    print("KERNEL_OK")
</pallas_src>

<mosaic_0001>
module attributes {stable_mosaic.version = 11 : i64} {
  func.func @_pe_kernel(%arg0: i32, %arg1: memref<64x3xf32, #tpu.memory_space<vmem>>, %arg2: memref<3x512xf32, #tpu.memory_space<vmem>>, %arg3: memref<192x512xf32, #tpu.memory_space<vmem>>) attributes {dimension_semantics = [#tpu.dimension_semantics<parallel>], iteration_bounds = array<i64: 1>, scalar_prefetch = 0 : i64, scratch_operands = 0 : i64, tpu.core_type = #tpu.core_type<tc>, window_params = [{pipeline_mode = #tpu.pipeline_mode<synchronous>, transform_indices = @transform_0, window_bounds = array<i64: 64, 3>}, {transform_indices = @transform_1, window_bounds = array<i64: 3, 512>}, {transform_indices = @transform_2, window_bounds = array<i64: 192, 512>}]} {
    %c0 = arith.constant 0 : index
    %c0_0 = arith.constant 0 : index
    %0 = vector.load %arg1[%c0, %c0_0] : memref<64x3xf32, #tpu.memory_space<vmem>>, vector<64x3xf32>
    %c0_1 = arith.constant 0 : index
    %c0_2 = arith.constant 0 : index
    %1 = vector.load %arg2[%c0_1, %c0_2] : memref<3x512xf32, #tpu.memory_space<vmem>>, vector<3x512xf32>
    %2 = vector.extract_strided_slice %1 {offsets = [0, 0], sizes = [1, 512], strides = [1, 1]} : vector<3x512xf32> to vector<1x512xf32>
    %3 = vector.extract_strided_slice %1 {offsets = [1, 0], sizes = [1, 512], strides = [1, 1]} : vector<3x512xf32> to vector<1x512xf32>
    %4 = vector.extract_strided_slice %1 {offsets = [2, 0], sizes = [1, 512], strides = [1, 1]} : vector<3x512xf32> to vector<1x512xf32>
    %5 = vector.extract_strided_slice %0 {offsets = [0, 0], sizes = [64, 1], strides = [1, 1]} : vector<64x3xf32> to vector<64x1xf32>
    %6 = vector.broadcast %5 : vector<64x1xf32> to vector<64x512xf32>
    %7 = vector.broadcast %2 : vector<1x512xf32> to vector<64x512xf32>
    %8 = arith.mulf %6, %7 : vector<64x512xf32>
    %9 = vector.extract_strided_slice %0 {offsets = [0, 1], sizes = [64, 1], strides = [1, 1]} : vector<64x3xf32> to vector<64x1xf32>
    %10 = vector.broadcast %9 : vector<64x1xf32> to vector<64x512xf32>
    %11 = vector.broadcast %3 : vector<1x512xf32> to vector<64x512xf32>
    %12 = arith.mulf %10, %11 : vector<64x512xf32>
    %13 = arith.addf %8, %12 : vector<64x512xf32>
    %14 = vector.extract_strided_slice %0 {offsets = [0, 2], sizes = [64, 1], strides = [1, 1]} : vector<64x3xf32> to vector<64x1xf32>
    %15 = vector.broadcast %14 : vector<64x1xf32> to vector<64x512xf32>
    %16 = vector.broadcast %4 : vector<1x512xf32> to vector<64x512xf32>
    %17 = arith.mulf %15, %16 : vector<64x512xf32>
    %18 = arith.addf %13, %17 : vector<64x512xf32>
    %cst = arith.constant 6.28318548 : f32
    %19 = vector.broadcast %cst : f32 to vector<64x512xf32>
    %20 = arith.mulf %19, %18 : vector<64x512xf32>
    %21 = math.sin %20 : vector<64x512xf32>
    %22 = math.cos %20 : vector<64x512xf32>
    %c0_3 = arith.constant 0 : index
    %c0_4 = arith.constant 0 : index
    %23 = vector.load %arg3[%c0_3, %c0_4] : memref<192x512xf32, #tpu.memory_space<vmem>>, vector<64x512xf32>
    tpu.vector_store %arg3[%c0_3, %c0_4], %21 {strides = array<i32>} : memref<192x512xf32, #tpu.memory_space<vmem>>, vector<64x512xf32>,
    %c64 = arith.constant 64 : index
    %c0_5 = arith.constant 0 : index
    %24 = vector.load %arg3[%c64, %c0_5] : memref<192x512xf32, #tpu.memory_space<vmem>>, vector<64x512xf32>
    tpu.vector_store %arg3[%c64, %c0_5], %22 {strides = array<i32>} : memref<192x512xf32, #tpu.memory_space<vmem>>, vector<64x512xf32>,
    %c128 = arith.constant 128 : index
    %c0_6 = arith.constant 0 : index
    %25 = vector.load %arg3[%c128, %c0_6] : memref<192x512xf32, #tpu.memory_space<vmem>>, vector<64x512xf32>
    tpu.vector_store %arg3[%c128, %c0_6], %21 {strides = array<i32>} : memref<192x512xf32, #tpu.memory_space<vmem>>, vector<64x512xf32>,
    return
  }
  func.func @transform_0(%arg0: i32) -> (i32, i32) {
    %c0_i32 = arith.constant 0 : i32
    %c0_i32_0 = arith.constant 0 : i32
    %c0_i32_1 = arith.constant 0 : i32
    return %c0_i32, %c0_i32_0 : i32, i32
  }
  func.func @transform_1(%arg0: i32) -> (i32, i32) {
    %c0_i32 = arith.constant 0 : i32
    %c0_i32_0 = arith.constant 0 : i32
    return %c0_i32, %arg0 : i32, i32
  }
  func.func @transform_2(%arg0: i32) -> (i32, i32) {
    %c0_i32 = arith.constant 0 : i32
    %c0_i32_0 = arith.constant 0 : i32
    return %c0_i32, %arg0 : i32, i32
  }
}

</mosaic_0001>

<bundles_post_ra>
// kernel: position_embedding_random_3d.1
= control target key start
LH: loop header
LB: loop body
LE: loop exit
PB: predicated region body
PF: predicated region fallthrough
CT: control target
= control target key end

     0   :  { %v7678_v0 = vmov 0   ;;  %v7679_v9 = vmov 1   ;;  %v7680_v10 = vmov 2   ;;  %v63_v11 = vlaneseq  ;;  %s11707_s0 = inlined_call_operand.vmem [shape: f32[64,3], index: 0, kind: input, shape index: {}]   ;;  %s11708_s1 = inlined_call_operand.vmem [shape: f32[3,512], index: 1, kind: input, shape index: {}]   ;;  %s11709_s2 = inlined_call_operand.vmem [shape: f32[192,512], index: 2, kind: output, shape index: {}]  }
   0x1   :  { %7545 = vset.pattern.permute.xlu1 %v7678_v0  ;;  %7544 = vset.pattern.permute.xlu0 %v7678_v0  ;;  %v13_v1 = vld [vmem:[%s11707_s0 + $0x10] sm:$0xff]  ;;  %v11_v2 = vld [vmem:[%s11707_s0] sm:$0xff]  ;;  %v14_v3 = vld [vmem:[%s11707_s0 + $0x18] sm:$0xff] }
   0x2   :  { %33 = vperm.xlu1 %7545, %v13_v1   ;;  %23 = vperm.xlu0 %7544, %v11_v2   ;;  %v12_v4 = vld [vmem:[%s11707_s0 + $0x8] sm:$0xff]  ;;  %v15_v6 = vld [vmem:[%s11707_s0 + $0x20] sm:$0xff]  ;;  %v18_v7 = vld [vmem:[%s11707_s0 + $0x38] sm:$0xff]  ;;  %v7726_v12 = vshrl.u32 %v63_v11, 7 }
   0x3   :  { %v16_v5 = vld [vmem:[%s11707_s0 + $0x28] sm:$0xff]  ;;  %v17_v8 = vld [vmem:[%s11707_s0 + $0x30] sm:$0xff]  ;;  %v7733_v15 = vld [vmem:[%s11708_s1] sm:$0x77] }
   0x4   :  { %v65_v13 = vsub.s32 0, %v7726_v12  ;;  %v69_v14 = vsub.s32 4, %v7726_v12  ;;  %v7738_v16 = vld [vmem:[%s11708_s1 + $0x8] sm:$0x77]  ;;  %v165_v41 = vsub.s32 1, %v7726_v12  ;;  %v169_v42 = vsub.s32 5, %v7726_v12 }
   0x5   :  { %v297_v59 = vsub.s32 2, %v7726_v12  ;;  %v301_v60 = vsub.s32 6, %v7726_v12 }
   0x6   :  { %38 = vperm.xlu1 %7545, %v14_v3   ;;  %28 = vperm.xlu0 %7544, %v12_v4   ;;  %v66_v17 = vrot.slane %v7733_v15, %v65_v13  ;;  %v70_v18 = vrot.slane %v7733_v15, %v69_v14  ;;  %v74_v19 = vrot.slane %v7738_v16, %v65_v13 }
   0x7   :  { %v78_v20 = vrot.slane %v7738_v16, %v69_v14  ;;  %v166_v53 = vrot.slane %v7733_v15, %v165_v41  ;;  %v170_v54 = vrot.slane %v7733_v15, %v169_v42  ;;  %v174_v55 = vrot.slane %v7738_v16, %v165_v41 }
   0x8   :  { %v7744_v21 = vrot.slane %v66_v17, %v65_v13  ;;  %v7746_v22 = vrot.slane %v70_v18, %v65_v13  ;;  %v7748_v23 = vrot.slane %v74_v19, %v65_v13  ;;  %v178_v56 = vrot.slane %v7738_v16, %v169_v42 }
   0x9   :  { %v7750_v24 = vrot.slane %v78_v20, %v65_v13  ;;  %v306_v11 = vrot.slane %v7738_v16, %v297_v59  ;;  %v310_v12 = vrot.slane %v7738_v16, %v301_v60 }
   0xa   :  { %48 = vperm.xlu1 %7545, %v16_v5   ;;  %43 = vperm.xlu0 %7544, %v15_v6  }
   0xe   :  { %58 = vperm.xlu1 %7545, %v18_v7   ;;  %53 = vperm.xlu0 %7544, %v17_v8  }
  0x12   :  { %7547 = vset.pattern.permute.xlu1 %v7679_v9  ;;  %7546 = vset.pattern.permute.xlu0 %v7679_v9  ;;  %v298_v9 = vrot.slane %v7733_v15, %v297_v59 }
  0x13   :  { %136 = vperm.xlu1 %7547, %v12_v4   ;;  %132 = vperm.xlu0 %7546, %v11_v2  }
  0x17   :  { %140 = vperm.xlu1 %7547, %v13_v1   ;;  %144 = vperm.xlu0 %7546, %v14_v3  }
  0x1b   :  { %148 = vperm.xlu1 %7547, %v15_v6   ;;  %152 = vperm.xlu0 %7546, %v16_v5  }
  0x1f   :  { %156 = vperm.xlu1 %7547, %v17_v8   ;;  %160 = vperm.xlu0 %7546, %v18_v7  }
  0x23   :  { %7548 = vset.pattern.permute.xlu1 %v7680_v10  ;;  %7549 = vset.pattern.permute.xlu0 %v7680_v10  ;;  %v302_v10 = vrot.slane %v7733_v15, %v301_v60  ;;  %v7860_v15 = vrot.slane %v306_v11, %v297_v59 }
  0x24   :  { %264 = vperm.xlu1 %7548, %v11_v2   ;;  %268 = vperm.xlu0 %7549, %v12_v4  }
  0x28   :  { %272 = vperm.xlu1 %7548, %v13_v1   ;;  %280 = vperm.xlu0 %7549, %v15_v6   ;;  %v7840_v6 = vrot.slane %v170_v54, %v165_v41 }
  0x2c   :  { %276 = vperm.xlu1 %7548, %v14_v3   ;;  %288 = vperm.xlu0 %7549, %v17_v8   ;;  %v7844_v8 = vrot.slane %v178_v56, %v165_v41 }
  0x30   :  { %284 = vperm.xlu1 %7548, %v16_v5   ;;  %v7838_v5 = vrot.slane %v166_v53, %v165_v41 }
  0x34   :  { %292 = vperm.xlu1 %7548, %v18_v7   ;;  %v7842_v7 = vrot.slane %v174_v55, %v165_v41 }
  0x81   :  { %v34_v25 = vpop.permute.xlu1 %33  ;;  %v7752_v26 = vpop.permute.xlu0 %23 }
  0x82   :  { %v7755_v27 = vmul.f32 %v7744_v21, %v34_v25  ;;  %v7758_v28 = vmul.f32 %v7746_v22, %v34_v25  ;;  %v7761_v29 = vmul.f32 %v7748_v23, %v34_v25  ;;  %v7764_v30 = vmul.f32 %v7750_v24, %v34_v25 }
  0x83   :  { %v7856_v25 = vrot.slane %v298_v9, %v297_v59 }
  0x85   :  { %v39_v31 = vpop.permute.xlu1 %38  ;;  %v29_v32 = vpop.permute.xlu0 %28 }
  0x86   :  { %v103_v33 = vmul.f32 %v7744_v21, %v29_v32  ;;  %v104_v34 = vmul.f32 %v7746_v22, %v29_v32  ;;  %v105_v35 = vmul.f32 %v7748_v23, %v29_v32  ;;  %v106_v36 = vmul.f32 %v7750_v24, %v29_v32 }
  0x87   :  { %v7771_v37 = vmul.f32 %v7744_v21, %v39_v31  ;;  %v7774_v38 = vmul.f32 %v7746_v22, %v39_v31  ;;  %v7777_v39 = vmul.f32 %v7748_v23, %v39_v31  ;;  %v7780_v40 = vmul.f32 %v7750_v24, %v39_v31 }
  0x88   :  { %v7858_v31 = vrot.slane %v302_v10, %v297_v59  ;;  %v7862_v32 = vrot.slane %v310_v12, %v297_v59 }
  0x89   :  { %v49_v43 = vpop.permute.xlu1 %48  ;;  %v44_v44 = vpop.permute.xlu0 %43 }
  0x8a   :  { %v7785_v45 = vmul.f32 %v7744_v21, %v44_v44  ;;  %v7788_v46 = vmul.f32 %v7746_v22, %v44_v44  ;;  %v7791_v47 = vmul.f32 %v7748_v23, %v44_v44  ;;  %v7794_v48 = vmul.f32 %v7750_v24, %v44_v44 }
  0x8b   :  { %v7797_v49 = vmul.f32 %v7744_v21, %v49_v43  ;;  %v7800_v50 = vmul.f32 %v7746_v22, %v49_v43  ;;  %v7803_v51 = vmul.f32 %v7748_v23, %v49_v43  ;;  %v7806_v52 = vmul.f32 %v7750_v24, %v49_v43 }
  0x8d   :  { %v59_v57 = vpop.permute.xlu1 %58  ;;  %v54_v58 = vpop.permute.xlu0 %53 }
  0x8e   :  { %v7815_v61 = vmul.f32 %v7744_v21, %v54_v58  ;;  %v7818_v62 = vmul.f32 %v7746_v22, %v54_v58  ;;  %v7821_v63 = vmul.f32 %v7748_v23, %v54_v58  ;;  %v7824_v0 = vmul.f32 %v7750_v24, %v54_v58 }
  0x8f   :  { %v7827_v1 = vmul.f32 %v7744_v21, %v59_v57  ;;  %v7830_v2 = vmul.f32 %v7746_v22, %v59_v57  ;;  %v7833_v3 = vmul.f32 %v7748_v23, %v59_v57  ;;  %v7836_v4 = vmul.f32 %v7750_v24, %v59_v57 }
  0x92   :  { %v137_v13 = vpop.permute.xlu1 %136  ;;  %v7850_v14 = vpop.permute.xlu0 %132 }
  0x93   :  { %v203_v17 = vmul.f32 %v7838_v5, %v137_v13  ;;  %v204_v18 = vmul.f32 %v7840_v6, %v137_v13  ;;  %v205_v19 = vmul.f32 %v7842_v7, %v137_v13  ;;  %v206_v20 = vmul.f32 %v7844_v8, %v137_v13 }
  0x95   :  { %v7864_v42 = vadd.f32 %v203_v17, %v103_v33  ;;  %v7866_v43 = vadd.f32 %v204_v18, %v104_v34  ;;  %v7868_v44 = vadd.f32 %v205_v19, %v105_v35  ;;  %v7870_v53 = vadd.f32 %v206_v20, %v106_v36 }
  0x96   :  { %v141_v16 = vpop.permute.xlu1 %140  ;;  %v145_v41 = vpop.permute.xlu0 %144 }
  0x97   :  { %v207_v54 = vmul.f32 %v7838_v5, %v141_v16  ;;  %v208_v55 = vmul.f32 %v7840_v6, %v141_v16  ;;  %v209_v56 = vmul.f32 %v7842_v7, %v141_v16  ;;  %v210_v57 = vmul.f32 %v7844_v8, %v141_v16 }
  0x98   :  { %v211_v58 = vmul.f32 %v7838_v5, %v145_v41  ;;  %v212_v59 = vmul.f32 %v7840_v6, %v145_v41  ;;  %v213_v33 = vmul.f32 %v7842_v7, %v145_v41  ;;  %v214_v34 = vmul.f32 %v7844_v8, %v145_v41 }
  0x99   :  { %v7881_v35 = vadd.f32 %v207_v54, %v7755_v27  ;;  %v7884_v36 = vadd.f32 %v208_v55, %v7758_v28  ;;  %v7887_v60 = vadd.f32 %v209_v56, %v7761_v29  ;;  %v7890_v9 = vadd.f32 %v210_v57, %v7764_v30 }
  0x9a   :  { %v149_v10 = vpop.permute.xlu1 %148  ;;  %v153_v11 = vpop.permute.xlu0 %152  ;;  %v7893_v12 = vadd.f32 %v211_v58, %v7771_v37  ;;  %v7896_v13 = vadd.f32 %v212_v59, %v7774_v38  ;;  %v7899_v27 = vadd.f32 %v213_v33, %v7777_v39  ;;  %v7902_v28 = vadd.f32 %v214_v34, %v7780_v40 }
  0x9b   :  { %v215_v29 = vmul.f32 %v7838_v5, %v149_v10  ;;  %v216_v17 = vmul.f32 %v7840_v6, %v149_v10  ;;  %v217_v30 = vmul.f32 %v7842_v7, %v149_v10  ;;  %v218_v18 = vmul.f32 %v7844_v8, %v149_v10 }
  0x9c   :  { %v219_v37 = vmul.f32 %v7838_v5, %v153_v11  ;;  %v220_v19 = vmul.f32 %v7840_v6, %v153_v11  ;;  %v221_v38 = vmul.f32 %v7842_v7, %v153_v11  ;;  %v222_v39 = vmul.f32 %v7844_v8, %v153_v11 }
  0x9d   :  { %v247_v20 = vadd.f32 %v215_v29, %v7785_v45  ;;  %v248_v40 = vadd.f32 %v216_v17, %v7788_v46  ;;  %v249_v16 = vadd.f32 %v217_v30, %v7791_v47  ;;  %v250_v41 = vadd.f32 %v218_v18, %v7794_v48 }
  0x9e   :  { %v157_v54 = vpop.permute.xlu1 %156  ;;  %v161_v55 = vpop.permute.xlu0 %160  ;;  %v7917_v56 = vadd.f32 %v219_v37, %v7797_v49  ;;  %v7920_v57 = vadd.f32 %v220_v19, %v7800_v50  ;;  %v7923_v58 = vadd.f32 %v221_v38, %v7803_v51  ;;  %v7926_v59 = vadd.f32 %v222_v39, %v7806_v52 }
  0x9f   :  { %v223_v45 = vmul.f32 %v7838_v5, %v157_v54  ;;  %v224_v46 = vmul.f32 %v7840_v6, %v157_v54  ;;  %v225_v47 = vmul.f32 %v7842_v7, %v157_v54  ;;  %v226_v48 = vmul.f32 %v7844_v8, %v157_v54 }
  0xa0   :  { %v227_v49 = vmul.f32 %v7838_v5, %v161_v55  ;;  %v228_v33 = vmul.f32 %v7840_v6, %v161_v55  ;;  %v229_v50 = vmul.f32 %v7842_v7, %v161_v55  ;;  %v230_v51 = vmul.f32 %v7844_v8, %v161_v55 }
  0xa1   :  { %v255_v34 = vadd.f32 %v223_v45, %v7815_v61  ;;  %v256_v52 = vadd.f32 %v224_v46, %v7818_v62  ;;  %v257_v10 = vadd.f32 %v225_v47, %v7821_v63  ;;  %v258_v11 = vadd.f32 %v226_v48, %v7824_v0 }
  0xa2   :  { %v7941_v29 = vadd.f32 %v227_v49, %v7827_v1  ;;  %v7944_v17 = vadd.f32 %v228_v33, %v7830_v2  ;;  %v7947_v30 = vadd.f32 %v229_v50, %v7833_v3  ;;  %v7950_v18 = vadd.f32 %v230_v51, %v7836_v4 }
  0xa3   :  { %v7952_v37 = vpop.permute.xlu1 %264  ;;  %v269_v61 = vpop.permute.xlu0 %268  ;;  %v199_v2 = vmul.f32 %v7838_v5, %v7850_v14 }
  0xa4   :  { %v335_v62 = vmul.f32 %v7856_v25, %v269_v61  ;;  %v336_v63 = vmul.f32 %v7858_v31, %v269_v61  ;;  %v337_v0 = vmul.f32 %v7860_v15, %v269_v61  ;;  %v338_v1 = vmul.f32 %v7862_v32, %v269_v61 }
  0xa6   :  { %v7961_v38 = vadd.f32 %v335_v62, %v7864_v42  ;;  %v7964_v4 = vadd.f32 %v336_v63, %v7866_v43  ;;  %v7967_v39 = vadd.f32 %v337_v0, %v7868_v44  ;;  %v7970_v54 = vadd.f32 %v338_v1, %v7870_v53 }
  0xa7   :  { %v273_v19 = vpop.permute.xlu1 %272  ;;  %v281_v3 = vpop.permute.xlu0 %280 }
  0xa8   :  { %v339_v55 = vmul.f32 %v7856_v25, %v273_v19  ;;  %v340_v45 = vmul.f32 %v7858_v31, %v273_v19  ;;  %v341_v5 = vmul.f32 %v7860_v15, %v273_v19  ;;  %v342_v46 = vmul.f32 %v7862_v32, %v273_v19 }
  0xa9   :  { %v347_v42 = vmul.f32 %v7856_v25, %v281_v3  ;;  %v348_v47 = vmul.f32 %v7858_v31, %v281_v3  ;;  %v349_v43 = vmul.f32 %v7860_v15, %v281_v3  ;;  %v350_v44 = vmul.f32 %v7862_v32, %v281_v3 }
  0xaa   :  { %v7981_v48 = vadd.f32 %v339_v55, %v7881_v35  ;;  %v7984_v53 = vadd.f32 %v340_v45, %v7884_v36  ;;  %v7987_v49 = vadd.f32 %v341_v5, %v7887_v60  ;;  %v7990_v33 = vadd.f32 %v342_v46, %v7890_v9 }
  0xab   :  { %v277_v50 = vpop.permute.xlu1 %276  ;;  %v289_v51 = vpop.permute.xlu0 %288  ;;  %v7992_v61 = vadd.f32 %v347_v42, %v247_v20  ;;  %v7994_v62 = vadd.f32 %v348_v47, %v248_v40  ;;  %v7996_v63 = vadd.f32 %v349_v43, %v249_v16  ;;  %v7998_v0 = vadd.f32 %v350_v44, %v250_v41 }
  0xac   :  { %v343_v35 = vmul.f32 %v7856_v25, %v277_v50  ;;  %v344_v36 = vmul.f32 %v7858_v31, %v277_v50  ;;  %v345_v60 = vmul.f32 %v7860_v15, %v277_v50  ;;  %v346_v1 = vmul.f32 %v7862_v32, %v277_v50 }
  0xad   :  { %v355_v9 = vmul.f32 %v7856_v25, %v289_v51  ;;  %v356_v19 = vmul.f32 %v7858_v31, %v289_v51  ;;  %v357_v20 = vmul.f32 %v7860_v15, %v289_v51  ;;  %v358_v40 = vmul.f32 %v7862_v32, %v289_v51 }
  0xae   :  { %v8009_v16 = vadd.f32 %v343_v35, %v7893_v12  ;;  %v8012_v41 = vadd.f32 %v344_v36, %v7896_v13  ;;  %v8015_v3 = vadd.f32 %v345_v60, %v7899_v27  ;;  %v8018_v55 = vadd.f32 %v346_v1, %v7902_v28 }
  0xaf   :  { %v285_v45 = vpop.permute.xlu1 %284  ;;  %v8020_v5 = vadd.f32 %v355_v9, %v255_v34  ;;  %v8022_v46 = vadd.f32 %v356_v19, %v256_v52  ;;  %v8024_v42 = vadd.f32 %v357_v20, %v257_v10  ;;  %v8026_v47 = vadd.f32 %v358_v40, %v258_v11 }
  0xb0   :  { %v351_v12 = vmul.f32 %v7856_v25, %v285_v45  ;;  %v352_v13 = vmul.f32 %v7858_v31, %v285_v45  ;;  %v353_v43 = vmul.f32 %v7860_v15, %v285_v45  ;;  %v354_v27 = vmul.f32 %v7862_v32, %v285_v45 }
  0xb1   :  { %11972 = vst [vmem:[#allocation2_spill] sm:$0xff] %v8020_v5  ;;  %11973 = vst [vmem:[#allocation3_spill] sm:$0xff] %v8022_v46  ;;  %v99_v28 = vmul.f32 %v7744_v21, %v7752_v26  ;;  %v200_v34 = vmul.f32 %v7840_v6, %v7850_v14  ;;  %v331_v52 = vmul.f32 %v7856_v25, %v7952_v37 }
  0xb2   :  { %11974 = vst [vmem:[#allocation4_spill] sm:$0xff] %v8024_v42  ;;  %11975 = vst [vmem:[#allocation5_spill] sm:$0xff] %v8026_v47  ;;  %v8039_v10 = vadd.f32 %v351_v12, %v7917_v56  ;;  %v8042_v11 = vadd.f32 %v352_v13, %v7920_v57  ;;  %v8045_v44 = vadd.f32 %v353_v43, %v7923_v58 }
  0xb3   :  { %v8048_v50 = vadd.f32 %v354_v27, %v7926_v59  ;;  %v293_v51 = vpop.permute.xlu1 %292  ;;  %v100_v21 = vmul.f32 %v7746_v22, %v7752_v26  ;;  %v201_v6 = vmul.f32 %v7842_v7, %v7850_v14  ;;  %v231_v35 = vadd.f32 %v199_v2, %v99_v28 }
  0xb4   :  { %v332_v56 = vmul.f32 %v7858_v31, %v7952_v37  ;;  %v359_v57 = vmul.f32 %v7856_v25, %v293_v51  ;;  %v360_v36 = vmul.f32 %v7858_v31, %v293_v51  ;;  %v361_v58 = vmul.f32 %v7860_v15, %v293_v51 }
  0xb5   :  { %11976 = vst [vmem:[#allocation6_spill] sm:$0xff] %v8048_v50  ;;  %v362_v59 = vmul.f32 %v7862_v32, %v293_v51  ;;  %v101_v60 = vmul.f32 %v7748_v23, %v7752_v26  ;;  %v232_v1 = vadd.f32 %v200_v34, %v100_v21  ;;  %v333_v22 = vmul.f32 %v7860_v15, %v7952_v37 }
  0xb6   :  { %v363_v7 = vadd.f32 %v331_v52, %v231_v35  ;;  %v8065_v2 = vadd.f32 %v359_v57, %v7941_v29  ;;  %v8068_v9 = vadd.f32 %v360_v36, %v7944_v17  ;;  %v8071_v25 = vadd.f32 %v361_v58, %v7947_v30 }
  0xb7   :  { %v8074_v31 = vadd.f32 %v362_v59, %v7950_v18  ;;  %v233_v19 = vadd.f32 %v201_v6, %v101_v60  ;;  %v364_v20 = vadd.f32 %v332_v56, %v232_v1  ;;  %v202_v17 = vmul.f32 %v7844_v8, %v7850_v14 }
  0xb8   :  { %11977 = vst [vmem:[#allocation7_spill] sm:$0xff] %v8065_v2  ;;  %11978 = vst [vmem:[#allocation8_spill] sm:$0xff] %v8068_v9  ;;  %v8076_v40 = vmul.f32 6.2831855, %v363_v7  ;;  %v102_v18 = vmul.f32 %v7750_v24, %v7752_v26  ;;  %v334_v43 = vmul.f32 %v7862_v32, %v7952_v37 }
  0xb9   :  { %11979 = vst [vmem:[#allocation9_spill] sm:$0xff] %v8071_v25  ;;  %11980 = vst [vmem:[#allocation10_spill] sm:$0xff] %v8074_v31  ;;  %v365_v23 = vadd.f32 %v333_v22, %v233_v19  ;;  %v8078_v45 = vmul.f32 6.2831855, %v364_v20 }
  0xba   :  { %11981 = vst [vmem:[#allocation11_spill] sm:$0xff] %v8076_v40  ;;  %v11712_v29 = vand.u32 2147483647, %v8076_v40  ;;  %v430_v30 = vand.u32 2139095040, %v8076_v40  ;;  %v234_v51 = vadd.f32 %v202_v17, %v102_v18  ;;  %vm429_vm13 = vcmp.lt.s32.totalorder %v8076_v40, 0 }
  0xbb   :  { %11982 = vst [vmem:[#allocation12_spill] sm:$0xff] %v8078_v45  ;;  %v8080_v15 = vmul.f32 6.2831855, %v365_v23  ;;  %v11711_v12 = vand.u32 2147483647, %v8078_v45  ;;  %v534_v13 = vand.u32 2139095040, %v8078_v45 }
  0xbc   :  { %v431_v27 = vshrl.u32 %v430_v30, 23  ;;  %v434_v28 = vand.u32 8388607, %v11712_v29  ;;  %v366_v6 = vadd.f32 %v334_v43, %v234_v51  ;;  %v11721_v30 = vmov 683565275  }
  0xbd   :  { %11983 = vst [vmem:[#allocation13_spill] sm:$0xff] %v8080_v15  ;;  %v638_v34 = vand.u32 2139095040, %v8080_v15  ;;  %v535_v52 = vshrl.u32 %v534_v13, 23  ;;  %v538_v8 = vand.u32 8388607, %v11711_v12  ;;  %vm533_vm15 = vcmp.lt.s32.totalorder %v8078_v45, 0 }
  0xbe   :  { %v11710_v14 = vand.u32 2147483647, %v8080_v15  ;;  %v7151_v21 = vadd.s32 4294967169, %v431_v27  ;;  %v435_v32 = vor.u32 8388608, %v434_v28  ;;  %v8104_v7 = vmul.f32 6.2831855, %v366_v6 }
  0xbf   :  { %v639_v24 = vshrl.u32 %v638_v34, 23  ;;  %v7155_v26 = vadd.s32 4294967169, %v535_v52  ;;  %v539_v37 = vor.u32 8388608, %v538_v8  ;;  %v11717_v27 = vmov 2475754826  }
  0xc0   :  { %v437_v35 = vadd.s32 1, %v7151_v21  ;;  %v8100_v36 = vand.u32 8388607, %v11710_v14  ;;  %11984 = vst [vmem:[#allocation14_spill] sm:$0xff] %v8104_v7  ;;  %v8106_v19 = vshll.u32 %v435_v32, 8 }
  0xc1   :  { %v7159_v56 = vadd.s32 4294967169, %v639_v24  ;;  %v541_v57 = vadd.s32 1, %v7155_v26  ;;  %v8108_v20 = vshll.u32 %v539_v37, 8  ;;  %v11715_v34 = vmov 2131351028  }
  0xc2   :  { %vm438_vm0 = vcmp.gt.s32.totalorder %v437_v35, 0  ;;  %v11713_v8 = vmov 2102212464   ;;  %v11719_v21 = vmov 920167782  }
  0xc3   :  { %v439_v58 = vsel %vm438_vm0, %v437_v35, 0  ;;  %vm542_vm1 = vcmp.gt.s32.totalorder %v541_v57, 0  ;;  %v8102_v59 = vadd.s32 1, %v7159_v56  ;;  %v11723_v37 = vmov 1326507024  }
  0xc4   :  { %v440_v60 = vshrl.u32 %v439_v58, 5  ;;  %v441_v1 = vand.u32 31, %v439_v58  ;;  %v543_v22 = vsel %vm542_vm1, %v541_v57, 0  ;;  %v11994_v5 = vand.u32 2147483647, %v8076_v40 }
  0xc5   :  { %v8112_v13 = vshrl.u32 %v543_v22, 5  ;;  %v545_v43 = vand.u32 31, %v543_v22  ;;  %vm646_vm2 = vcmp.gt.s32.totalorder %v8102_v59, 0 }
  0xc6   :  { %v442_v17 = vsub.s32 32, %v441_v1  ;;  %v444_v18 = vshll.u32 %v11721_v30, %v441_v1  ;;  %v447_v28 = vshll.u32 %v11717_v27, %v441_v1  ;;  %v450_v52 = vshll.u32 %v11715_v34, %v441_v1 }
  0xc7   :  { %v453_v51 = vshll.u32 %v11713_v8, %v441_v1  ;;  %v456_v24 = vshll.u32 %v11719_v21, %v441_v1  ;;  %vm459_vm3 = vcmp.lt.s32.totalorder %v440_v60, 1  ;;  %vm460_vm4 = vcmp.lt.s32.totalorder %v440_v60, 2 }
  0xc8   :  { %v445_v26 = vshrl.u32 %v11717_v27, %v442_v17  ;;  %v448_v6 = vshrl.u32 %v11715_v34, %v442_v17  ;;  %v451_v35 = vshrl.u32 %v11713_v8, %v442_v17  ;;  %v443_v56 = vshrl.u32 %v11721_v30, %v442_v17 }
  0xc9   :  { %v454_v32 = vshrl.u32 %v11719_v21, %v442_v17  ;;  %v457_v57 = vshrl.u32 %v11723_v37, %v442_v17  ;;  %v546_v14 = vsub.s32 32, %v545_v43  ;;  %vm461_vm5 = vcmp.lt.s32.totalorder %v440_v60, 3 }
  0xca   :  { %v446_v58 = vor.u32 %v445_v26, %v444_v18  ;;  %v449_v22 = vor.u32 %v448_v6, %v447_v28  ;;  %v452_v1 = vor.u32 %v451_v35, %v450_v52  ;;  %vm462_vm6 = vcmp.lt.s32.totalorder %v440_v60, 4 }
  0xcb   :  { %v455_v12 = vor.u32 %v454_v32, %v453_v51  ;;  %v458_v29 = vor.u32 %v457_v57, %v456_v24  ;;  %v11985_v17 = vmov 683565275   ;;  %v11986_v52 = vmov 2475754826  }
  0xcc   :  { %v463_v23 = vsel %vm459_vm3, %v443_v56, %v446_v58  ;;  %v464_v8 = vsel %vm462_vm6, %v452_v1, 2102212464  ;;  %v467_v34 = vsel %vm459_vm3, %v446_v58, %v449_v22  ;;  %v471_v27 = vsel %vm459_vm3, %v449_v22, %v452_v1 }
  0xcd   :  { %v465_v21 = vsel %vm461_vm5, %v449_v22, %v464_v8  ;;  %v468_v30 = vsel %vm462_vm6, %v455_v12, 920167782  ;;  %v472_v31 = vsel %vm462_vm6, %v458_v29, 1326507024  ;;  %v548_v37 = vshll.u32 %v11985_v17, %v545_v43 }
  0xce   :  { %v469_v18 = vsel %vm461_vm5, %v452_v1, %v468_v30  ;;  %v473_v28 = vsel %vm461_vm5, %v455_v12, %v472_v31  ;;  %v549_v26 = vshrl.u32 %v11986_v52, %v546_v14  ;;  %v551_v51 = vshll.u32 %v11986_v52, %v545_v43 }
  0xcf   :  { %v466_v24 = vsel %vm460_vm4, %v463_v23, %v465_v21  ;;  %v470_v6 = vsel %vm460_vm4, %v467_v34, %v469_v18  ;;  %v474_v35 = vsel %vm460_vm4, %v471_v27, %v473_v28  ;;  %v11987_v56 = vmov 2131351028  }
  0xd0   :  { %v552_v32 = vshrl.u32 %v11987_v56, %v546_v14  ;;  %v8136_v8 = vmul.u32.u64.low %v8106_v19, %v474_v35  ;;  %v8137_v57 = vmul.u32.u64.high %v8106_v19, %v474_v35, %v8136_v8  ;;  %v550_v31 = vor.u32 %v549_v26, %v548_v37 }
  0xd1   :  { %v8140_v29 = vmul.u32.u64.low %v8106_v19, %v470_v6  ;;  %v8141_v30 = vmul.u32.u64.high %v8106_v19, %v470_v6, %v8140_v29  ;;  %v554_v58 = vshll.u32 %v11987_v56, %v545_v43  ;;  %v11988_v23 = vmov 2102212464  }
  0xd2   :  { %v553_v12 = vor.u32 %v552_v32, %v551_v51  ;;  %v555_v21 = vshrl.u32 %v11988_v23, %v546_v14  ;;  %v557_v60 = vshll.u32 %v11988_v23, %v545_v43  ;;  %v11989_v27 = vmov 920167782  }
  0xd3   :  { %v558_v34 = vshrl.u32 %v11989_v27, %v546_v14  ;;  %v11990_v22 = vmov 1326507024   ;;  %v647_v18 = vsel %vm646_vm2, %v8102_v59, 0  ;;  %v482_v28 = vmul.u32 %v8106_v19, %v466_v24 }
  0xd4   :  { %v561_v1 = vshrl.u32 %v11990_v22, %v546_v14  ;;  %v547_v6 = vshrl.u32 %v11985_v17, %v546_v14  ;;  %v556_v37 = vor.u32 %v555_v21, %v554_v58  ;;  %v560_v26 = vshll.u32 %v11989_v27, %v545_v43 }
  0xd5   :  { %vm484_vm7 = vc.u32 %v8137_v57, %v8140_v29  ;;  %v485_v51 = vadd.s32 1, %v8141_v30  ;;  %v559_v35 = vor.u32 %v558_v34, %v557_v60  ;;  %vm563_vm8 = vcmp.lt.s32.totalorder %v8112_v13, 1 }
  0xd6   :  { %v562_v32 = vor.u32 %v561_v1, %v560_v26  ;;  %vm565_vm9 = vcmp.lt.s32.totalorder %v8112_v13, 3  ;;  %vm566_vm10 = vcmp.lt.s32.totalorder %v8112_v13, 4  ;;  %v571_v59 = vsel %vm563_vm8, %v550_v31, %v553_v12 }
  0xd7   :  { %v486_v19 = vsel %vm484_vm7, %v485_v51, %v8141_v30  ;;  %v568_v14 = vsel %vm566_vm10, %v556_v37, 2102212464  ;;  %v572_v24 = vsel %vm566_vm10, %v559_v35, 920167782  ;;  %v575_v8 = vsel %vm563_vm8, %v553_v12, %v556_v37 }
  0xd8   :  { %v487_v43 = vadd.s32 %v486_v19, %v482_v28  ;;  %vm564_vm11 = vcmp.lt.s32.totalorder %v8112_v13, 2  ;;  %v573_v58 = vsel %vm565_vm9, %v556_v37, %v572_v24  ;;  %v576_v21 = vsel %vm566_vm10, %v562_v32, 1326507024 }
  0xd9   :  { %v567_v25 = vsel %vm563_vm8, %v547_v6, %v550_v31  ;;  %v569_v60 = vsel %vm565_vm9, %v553_v12, %v568_v14  ;;  %v574_v34 = vsel %vm564_vm11, %v571_v59, %v573_v58  ;;  %v577_v9 = vsel %vm565_vm9, %v559_v35, %v576_v21 }
  0xda   :  { %v488_v1 = vadd.s32 536870912, %v487_v43  ;;  %v578_v26 = vsel %vm564_vm11, %v575_v8, %v577_v9  ;;  %v8164_v2 = vmul.u32.u64.low %v8108_v20, %v574_v34  ;;  %v8165_v47 = vmul.u32.u64.high %v8108_v20, %v574_v34, %v8164_v2 }
  0xdb   :  { %v8169_v30 = vmul.u32.u64.low %v8108_v20, %v578_v26  ;;  %v8170_v51 = vmul.u32.u64.high %v8108_v20, %v578_v26, %v8169_v30  ;;  %v649_v28 = vand.u32 31, %v647_v18  ;;  %v742_v13 = vand.u32 2139095040, %v8104_v7 }
  0xdc   :  { %v489_v37 = vshrl.u32 %v488_v1, 30  ;;  %v570_v32 = vsel %vm564_vm11, %v567_v25, %v569_v60  ;;  %v8174_v31 = vmul.f32 6.2831855, %v7961_v38  ;;  %v8177_v12 = vmul.f32 6.2831855, %v7964_v4 }
  0xdd   :  { %v650_v9 = vsub.s32 32, %v649_v28  ;;  %v589_v35 = vadd.s32 1, %v8165_v47  ;;  %v11993_v59 = vor.u32 8388608, %v8100_v36  ;;  %v586_v24 = vmul.u32 %v8108_v20, %v570_v32 }
  0xde   :  { %11991 = vst [vmem:[#allocation15_spill] sm:$0xff] %v8174_v31  ;;  %11992 = vst [vmem:[#allocation16_spill] sm:$0xff] %v8177_v12  ;;  %v490_v6 = vshll.u32 %v489_v37, 30  ;;  %vm588_vm12 = vc.u32 %v8170_v51, %v8164_v2  ;;  %v743_v25 = vshrl.u32 %v742_v13, 23  ;;  %v8192_v58 = vshrl.u32 %v647_v18, 5 }
  0xdf   :  { %v8182_v19 = vshll.u32 %v11993_v59, 8  ;;  %v653_v38 = vshrl.u32 %v11986_v52, %v650_v9  ;;  %v590_v8 = vsel %vm588_vm12, %v589_v35, %v8165_v47  ;;  %v656_v36 = vshrl.u32 %v11987_v56, %v650_v9 }
  0xe0   :  { %v8189_v4 = vsub.s32 %v487_v43, %v490_v6  ;;  %v591_v21 = vadd.s32 %v590_v8, %v586_v24  ;;  %v652_v60 = vshll.u32 %v11985_v17, %v649_v28  ;;  %v655_v20 = vshll.u32 %v11986_v52, %v649_v28 }
  0xe1   :  { %v659_v34 = vshrl.u32 %v11988_v23, %v650_v9  ;;  %v658_v43 = vshll.u32 %v11987_v56, %v649_v28  ;;  %v661_v26 = vshll.u32 %v11988_v23, %v649_v28  ;;  %v662_v47 = vshrl.u32 %v11989_v27, %v650_v9 }
  0xe2   :  { %v493_v1 = vsub.s32 0, %v8189_v4  ;;  %v592_v18 = vadd.s32 536870912, %v591_v21  ;;  %v654_v30 = vor.u32 %v653_v38, %v652_v60  ;;  %v664_v13 = vshll.u32 %v11989_v27, %v649_v28 }
  0xe3   :  { %v665_v32 = vshrl.u32 %v11990_v22, %v650_v9  ;;  %v657_v35 = vor.u32 %v656_v36, %v655_v20  ;;  %v660_v59 = vor.u32 %v659_v34, %v658_v43  ;;  %v663_v24 = vor.u32 %v662_v47, %v661_v26 }
  0xe4   :  { %v7152_v6 = vmin.u32 %v493_v1, %v8189_v4  ;;  %v483_v8 = vadd.s32 %v8140_v29, %v8137_v57  ;;  %v593_v14 = vshrl.u32 %v592_v18, 30  ;;  %v7163_v46 = vadd.s32 4294967169, %v743_v25 }
  0xe5   :  { %v666_v42 = vor.u32 %v665_v32, %v664_v13  ;;  %vm8210_vm14 = vcmp.le.f32.partialorder %v11994_v5, 0.7853982  ;;  %v513_v38 = vsub.s32 4, %v489_v37  ;;  %vm667_vm0 = vcmp.lt.s32.totalorder %v8192_v58, 1 }
  0xe6   :  { %v495_v28 = vclz %v7152_v6  ;;  %vm668_vm1 = vcmp.lt.s32.totalorder %v8192_v58, 2  ;;  %v594_v36 = vshll.u32 %v593_v14, 30  ;;  %v651_v57 = vshrl.u32 %v11985_v17, %v650_v9 }
  0xe7   :  { %vm669_vm2 = vcmp.lt.s32.totalorder %v8192_v58, 3  ;;  %vm670_vm3 = vcmp.lt.s32.totalorder %v8192_v58, 4  ;;  %v675_v5 = vsel %vm667_vm0, %v654_v30, %v657_v35  ;;  %v679_v60 = vsel %vm667_vm0, %v657_v35, %v660_v59 }
  0xe8   :  { %v7153_v29 = vadd.s32 4294967294, %v495_v28  ;;  %v676_v25 = vsel %vm670_vm3, %v663_v24, 920167782  ;;  %v8224_v20 = vsub.s32 %v591_v21, %v594_v36  ;;  %v672_v34 = vsel %vm670_vm3, %v660_v59, 2102212464 }
  0xe9   :  { %v677_v1 = vsel %vm669_vm2, %v660_v59, %v676_v25  ;;  %v680_v43 = vsel %vm670_vm3, %v666_v42, 1326507024  ;;  %v514_v9 = vsel %vm429_vm13, %v513_v38, %v489_v37  ;;  %v617_v26 = vsub.s32 4, %v593_v14 }
  0xea   :  { %vm7154_vm4 = vcmp.lt.s32.totalorder %v7153_v29, 0  ;;  %v681_v47 = vsel %vm669_vm2, %v663_v24, %v680_v43  ;;  %v597_v13 = vsub.s32 0, %v8224_v20  ;;  %v678_v21 = vsel %vm668_vm1, %v675_v5, %v677_v1 }
  0xeb   :  { %v498_v18 = vsel %vm7154_vm4, 0, %v7153_v29  ;;  %v682_v32 = vsel %vm668_vm1, %v679_v60, %v681_v47  ;;  %v671_v42 = vsel %vm667_vm0, %v651_v57, %v654_v30  ;;  %v673_v37 = vsel %vm669_vm2, %v657_v35, %v672_v34 }
  0xec   :  { %v499_v6 = vsub.s32 32, %v498_v18  ;;  %v503_v59 = vsub.s32 4294967266, %v498_v18  ;;  %v500_v28 = vshll.u32 %v8189_v4, %v498_v18  ;;  %v7156_v24 = vmin.u32 %v597_v13, %v8224_v20 }
  0xed   :  { %v8244_v38 = vmul.u32.u64.low %v8182_v19, %v682_v32  ;;  %v8245_v36 = vmul.u32.u64.high %v8182_v19, %v682_v32, %v8244_v38  ;;  %v8248_v25 = vmul.u32.u64.low %v8182_v19, %v678_v21  ;;  %v8249_v60 = vmul.u32.u64.high %v8182_v19, %v678_v21, %v8248_v25 }
  0xee   :  { %v501_v29 = vshrl.u32 %v483_v8, %v499_v6  ;;  %v504_v5 = vadd.s32 127, %v503_v59  ;;  %v8253_v30 = vsel %vm8210_vm14, 0, %v514_v9  ;;  %v11997_v35 = vand.u32 2147483647, %v8078_v45 }
  0xef   :  { %v599_v57 = vclz %v7156_v24  ;;  %v618_v34 = vsel %vm533_vm15, %v617_v26, %v593_v14  ;;  %v674_v43 = vsel %vm668_vm1, %v671_v42, %v673_v37  ;;  %v749_v47 = vadd.s32 1, %v7163_v46 }
  0xf0   :  { %vm8257_vm5 = vcmp.le.f32.partialorder %v11997_v35, 0.7853982  ;;  %v502_v8 = vor.u32 %v501_v29, %v500_v28  ;;  %v505_v1 = vshll.u32 %v504_v5, 23  ;;  %v587_v9 = vadd.s32 %v8164_v2, %v8170_v51 }
  0xf1   :  { %v7157_v18 = vadd.s32 4294967294, %v599_v57  ;;  %vm692_vm6 = vc.u32 %v8245_v36, %v8248_v25  ;;  %v12000_v13 = vand.u32 2147483647, %v8104_v7  ;;  %v8272_v6 = vsel %vm8257_vm5, 0, %v618_v34 }
  0xf2   :  { %v506_v32 = vor.u32 4788187, %v505_v1  ;;  %v693_v14 = vadd.s32 1, %v8249_v60  ;;  %vm750_vm7 = vcmp.gt.s32.totalorder %v749_v47, 0  ;;  %v520_v58 = vadd.s32 3, %v8253_v30 }
  0xf3   :  { %v746_v21 = vand.u32 8388607, %v12000_v13  ;;  %vm7158_vm8 = vcmp.lt.s32.totalorder %v7157_v18, 0  ;;  %v690_v46 = vmul.u32 %v8182_v19, %v674_v43  ;;  %v751_v2 = vsel %vm750_vm7, %v749_v47, 0 }
  0xf4   :  { %v507_v51 = vand.u32 2147483647, %v506_v32  ;;  %v509_v26 = vcvt.s32.f32 %v502_v8  ;;  %v602_v59 = vsel %vm7158_vm8, 0, %v7157_v18  ;;  %v694_v42 = vsel %vm692_vm6, %v693_v14, %v8249_v60 }
  0xf5   :  { %v603_v37 = vsub.s32 32, %v602_v59  ;;  %v607_v28 = vsub.s32 4294967266, %v602_v59  ;;  %v624_v24 = vadd.s32 3, %v8272_v6  ;;  %v695_v38 = vadd.s32 %v694_v42, %v690_v46 }
  0xf6   :  { %v8280_v29 = vmul.f32 6.2831855, %v7967_v39  ;;  %v510_v5 = vmul.f32 %v509_v26, %v507_v51  ;;  %v747_v35 = vor.u32 8388608, %v746_v21  ;;  %v753_v57 = vand.u32 31, %v751_v2 }
  0xf7   :  { %v604_v34 = vshll.u32 %v8224_v20, %v602_v59  ;;  %v605_v19 = vshrl.u32 %v587_v9, %v603_v37  ;;  %v608_v1 = vadd.s32 127, %v607_v28  ;;  %v696_v43 = vadd.s32 536870912, %v695_v38 }
  0xf8   :  { %12001 = vst [vmem:[#allocation17_spill] sm:$0xff] %v8280_v29  ;;  %v511_v8 = vxor.u32 2147483648, %v510_v5  ;;  %v8283_v47 = vand.u32 3, %v520_v58  ;;  %v754_v60 = vsub.s32 32, %v753_v57  ;;  %v11729_v18 = vand.u32 2147483647, %v8174_v31 }
  0xf9   :  { %v606_v13 = vor.u32 %v605_v19, %v604_v34  ;;  %v609_v32 = vshll.u32 %v608_v1, 23  ;;  %v8286_v14 = vand.u32 3, %v624_v24  ;;  %v697_v39 = vshrl.u32 %v696_v43, 30 }
  0xfa   :  { %v512_v21 = vsel %vm429_vm13, %v511_v8, %v510_v5  ;;  %v8291_v46 = vadd.s32 %v8248_v25, %v8245_v36  ;;  %v8293_v20 = vshll.u32 %v747_v35, 8  ;;  %v846_v9 = vand.u32 2139095040, %v8174_v31 }
  0xfb   :  { %v515_v58 = vsel %vm8210_vm14, %v8076_v40, %v512_v21  ;;  %v610_v51 = vor.u32 4788187, %v609_v32  ;;  %vm637_vm9 = vcmp.lt.s32.totalorder %v8080_v15, 0  ;;  %v698_v26 = vshll.u32 %v697_v39, 30 }
  0xfc   :  { %v8300_v59 = vshrl.u32 %v751_v2, 5  ;;  %7550 = vcosq.f32 %v515_v58  ;;  %v613_v42 = vcvt.s32.f32 %v606_v13  ;;  %v757_v37 = vshrl.u32 %v11986_v52, %v754_v60 }
  0xfd   :  { %v760_v36 = vshrl.u32 %v11987_v56, %v754_v60  ;;  %7552 = vsinq.f32 %v515_v58  ;;  %v611_v25 = vand.u32 2147483647, %v610_v51  ;;  %v8304_v28 = vsub.s32 %v695_v38, %v698_v26 }
  0xfe   :  { %v763_v24 = vshrl.u32 %v11988_v23, %v754_v60  ;;  %v756_v50 = vshll.u32 %v11985_v17, %v753_v57  ;;  %v759_v5 = vshll.u32 %v11986_v52, %v753_v57  ;;  %v765_v35 = vshll.u32 %v11988_v23, %v753_v57 }
  0xff   :  { %v766_v2 = vshrl.u32 %v11989_v27, %v754_v60  ;;  %v614_v34 = vmul.f32 %v613_v42, %v611_v25  ;;  %v701_v19 = vsub.s32 0, %v8304_v28  ;;  %v721_v1 = vsub.s32 4, %v697_v39 }
 0x100   :  { %v762_v43 = vshll.u32 %v11987_v56, %v753_v57  ;;  %vm526_vm10 = vcmp.eq.s32.totalorder %v8283_v47, 2  ;;  %v758_v38 = vor.u32 %v757_v37, %v756_v50  ;;  %v768_v13 = vshll.u32 %v11989_v27, %v753_v57 }
 0x101   :  { %v767_v8 = vor.u32 %v766_v2, %v765_v35  ;;  %v769_v32 = vshrl.u32 %v11990_v22, %v754_v60  ;;  %vm523_vm11 = vcmp.eq.s32.totalorder %v8283_v47, 0  ;;  %v615_v21 = vxor.u32 2147483648, %v614_v34 }
 0x102   :  { %v7160_v58 = vmin.u32 %v701_v19, %v8304_v28  ;;  %v761_v51 = vor.u32 %v760_v36, %v759_v5  ;;  %v764_v26 = vor.u32 %v763_v24, %v762_v43  ;;  %vm522_vm12 = vcmp.lt.s32.totalorder %v8283_v47, 2 }
 0x103   :  { %v755_v42 = vshrl.u32 %v11985_v17, %v754_v60  ;;  %v770_v25 = vor.u32 %v769_v32, %v768_v13  ;;  %vm771_vm13 = vcmp.lt.s32.totalorder %v8300_v59, 1  ;;  %vm774_vm14 = vcmp.lt.s32.totalorder %v8300_v59, 4 }
 0x104   :  { %vm519_vm0 = vweird.f32 %v8076_v40  ;;  %v616_v57 = vsel %vm533_vm15, %v615_v21, %v614_v34  ;;  %v703_v37 = vclz %v7160_v58  ;;  %vm772_vm1 = vcmp.lt.s32.totalorder %v8300_v59, 2 }
 0x105   :  { %v780_v36 = vsel %vm774_vm14, %v767_v8, 920167782  ;;  %v619_v60 = vsel %vm8257_vm5, %v8078_v45, %v616_v57  ;;  %v722_v24 = vsel %vm637_vm9, %v721_v1, %v697_v39  ;;  %vm773_vm2 = vcmp.lt.s32.totalorder %v8300_v59, 3 }
 0x106   :  { %v775_v50 = vsel %vm771_vm13, %v755_v42, %v758_v38  ;;  %7554 = vcosq.f32 %v619_v60  ;;  %v7161_v5 = vadd.s32 4294967294, %v703_v37  ;;  %v776_v35 = vsel %vm774_vm14, %v764_v26, 2102212464  ;;  %v8340_v34 = vpop.eup %7550 }
 0x107   :  { %v783_v2 = vsel %vm771_vm13, %v761_v51, %v764_v26  ;;  %7556 = vsinq.f32 %v619_v60  ;;  %v779_v4 = vsel %vm771_vm13, %v758_v38, %v761_v51  ;;  %v781_v39 = vsel %vm773_vm2, %v764_v26, %v780_v36  ;;  %v8348_v1 = vpop.eup %7552 }
 0x108   :  { %v784_v19 = vsel %vm774_vm14, %v770_v25, 1326507024  ;;  %v11726_v43 = vxor.u32 2147483648, %v8340_v34  ;;  %vm7162_vm15 = vcmp.lt.s32.totalorder %v7161_v5, 0  ;;  %v847_v32 = vshrl.u32 %v846_v9, 23 }
 0x109   :  { %v785_v13 = vsel %vm773_vm2, %v767_v8, %v784_v19  ;;  %v11727_v21 = vxor.u32 2147483648, %v8348_v1  ;;  %v706_v58 = vsel %vm7162_vm15, 0, %v7161_v5  ;;  %v777_v38 = vsel %vm773_vm2, %v761_v51, %v776_v35 }
 0x10a   :  { %v786_v26 = vsel %vm772_vm1, %v783_v2, %v785_v13  ;;  %v528_v42 = vsel %vm526_vm10, %v11726_v43, %v8348_v1  ;;  %v707_v25 = vsub.s32 32, %v706_v58  ;;  %v711_v57 = vsub.s32 4294967266, %v706_v58 }
 0x10b   :  { %v782_v9 = vsel %vm772_vm1, %v779_v4, %v781_v39  ;;  %v525_v8 = vsel %vm523_vm11, %v8340_v34, %v11727_v21  ;;  %v8371_v51 = vmul.u32.u64.low %v8293_v20, %v786_v26  ;;  %v8372_v37 = vmul.u32.u64.high %v8293_v20, %v786_v26, %v8371_v51 }
 0x10c   :  { %v7167_v36 = vadd.s32 4294967169, %v847_v32  ;;  %v529_v60 = vsel %vm522_vm12, %v525_v8, %v528_v42  ;;  %v708_v5 = vshll.u32 %v8304_v28, %v706_v58  ;;  %v709_v35 = vshrl.u32 %v8291_v46, %v707_v25 }
 0x10d   :  { %v712_v2 = vadd.s32 127, %v711_v57  ;;  %v530_v4 = vsel %vm519_vm0, nan, %v529_v60  ;;  %vm623_vm3 = vweird.f32 %v8078_v45  ;;  %vm626_vm4 = vcmp.lt.s32.totalorder %v8286_v14, 2 }
 0x10e   :  { %v8382_v39 = vmul.u32.u64.low %v8293_v20, %v782_v9  ;;  %v8383_v19 = vmul.u32.u64.high %v8293_v20, %v782_v9, %v8382_v39  ;;  %v853_v13 = vadd.s32 1, %v7167_v36  ;;  %v12002_v47 = vand.u32 2147483647, %v8080_v15  ;;  %7051 = vst [vmem:[%s11709_s2] sm:$0xff] %v530_v4  ;;  %7115 = vst [vmem:[%s11709_s2 + $0x200] sm:$0xff] %v530_v4 }
 0x10f   :  { %v710_v46 = vor.u32 %v709_v35, %v708_v5  ;;  %v713_v32 = vshll.u32 %v712_v2, 23  ;;  %vm627_vm6 = vcmp.eq.s32.totalorder %v8286_v14, 0  ;;  %v778_v26 = vsel %vm772_vm1, %v775_v50, %v777_v38 }
 0x110   :  { %vm8389_vm5 = vcmp.le.f32.partialorder %v12002_v47, 0.7853982  ;;  %vm854_vm7 = vcmp.gt.s32.totalorder %v853_v13, 0  ;;  %v8406_v42 = vpop.eup %7554  ;;  %vm796_vm8 = vc.u32 %v8372_v37, %v8382_v39  ;;  %v850_v57 = vand.u32 8388607, %v11729_v18 }
 0x111   :  { %v8402_v58 = vsel %vm8389_vm5, 0, %v722_v24  ;;  %12005 = vst [vmem:[#allocation18_spill] sm:$0xff] %v8406_v42  ;;  %v714_v25 = vor.u32 4788187, %v713_v32  ;;  %v855_v9 = vsel %vm854_vm7, %v853_v13, 0  ;;  %v8412_v8 = vpop.eup %7556  ;;  %vm630_vm10 = vcmp.eq.s32.totalorder %v8286_v14, 2 }
 0x112   :  { %12006 = vst [vmem:[#allocation19_spill] sm:$0xff] %v8412_v8  ;;  %v11725_v24 = vxor.u32 2147483648, %v8406_v42  ;;  %v797_v59 = vadd.s32 1, %v8383_v19  ;;  %v857_v50 = vand.u32 31, %v855_v9  ;;  %v11728_v38 = vxor.u32 2147483648, %v8412_v8 }
 0x113   :  { %v715_v51 = vand.u32 2147483647, %v714_v25  ;;  %v717_v36 = vcvt.s32.f32 %v710_v46  ;;  %v794_v60 = vmul.u32 %v8293_v20, %v778_v26  ;;  %v728_v35 = vadd.s32 3, %v8402_v58 }
 0x114   :  { %v632_v5 = vsel %vm630_vm10, %v11725_v24, %v8412_v8  ;;  %v798_v2 = vsel %vm796_vm8, %v797_v59, %v8383_v19  ;;  %v858_v4 = vsub.s32 32, %v857_v50  ;;  %v629_v13 = vsel %vm627_vm6, %v8406_v42, %v11728_v38 }
 0x115   :  { %v718_v47 = vmul.f32 %v717_v36, %v715_v51  ;;  %v799_v32 = vadd.s32 %v798_v2, %v794_v60  ;;  %v851_v46 = vor.u32 8388608, %v850_v57  ;;  %v633_v20 = vsel %vm626_vm4, %v629_v13, %v632_v5 }
 0x116   :  { %v860_v26 = vshll.u32 %v11985_v17, %v857_v50  ;;  %v861_v25 = vshrl.u32 %v11986_v52, %v858_v4  ;;  %v864_v24 = vshrl.u32 %v11987_v56, %v858_v4  ;;  %v634_v19 = vsel %vm623_vm3, nan, %v633_v20 }
 0x117   :  { %v719_v59 = vxor.u32 2147483648, %v718_v47  ;;  %v800_v43 = vadd.s32 536870912, %v799_v32  ;;  %v8436_v21 = vshrl.u32 %v855_v9, 5  ;;  %vm741_vm11 = vcmp.lt.s32.totalorder %v8104_v7, 0  ;;  %7052 = vst [vmem:[%s11709_s2 + $0x8] sm:$0xff] %v634_v19  ;;  %7116 = vst [vmem:[%s11709_s2 + $0x208] sm:$0xff] %v634_v19 }
 0x118   :  { %v862_v51 = vor.u32 %v861_v25, %v860_v26  ;;  %v863_v57 = vshll.u32 %v11986_v52, %v857_v50  ;;  %v866_v14 = vshll.u32 %v11987_v56, %v857_v50  ;;  %v867_v36 = vshrl.u32 %v11988_v23, %v858_v4 }
 0x119   :  { %v720_v9 = vsel %vm637_vm9, %v719_v59, %v718_v47  ;;  %v801_v60 = vshrl.u32 %v800_v43, 30  ;;  %v869_v5 = vshll.u32 %v11988_v23, %v857_v50  ;;  %v870_v2 = vshrl.u32 %v11989_v27, %v858_v4 }
 0x11a   :  { %v723_v13 = vsel %vm8389_vm5, %v8080_v15, %v720_v9  ;;  %v865_v20 = vor.u32 %v864_v24, %v863_v57  ;;  %v872_v26 = vshll.u32 %v11989_v27, %v857_v50  ;;  %v873_v25 = vshrl.u32 %v11990_v22, %v858_v4 }
 0x11b   :  { %7558 = vcosq.f32 %v723_v13  ;;  %v802_v38 = vshll.u32 %v801_v60, 30  ;;  %v868_v19 = vor.u32 %v867_v36, %v866_v14  ;;  %v871_v18 = vor.u32 %v870_v2, %v869_v5 }
 0x11c   :  { %7560 = vsinq.f32 %v723_v13  ;;  %v729_v47 = vand.u32 3, %v728_v35  ;;  %v12007_v43 = vand.u32 2147483647, %v8104_v7  ;;  %v874_v45 = vor.u32 %v873_v25, %v872_v26 }
 0x11d   :  { %v8463_v28 = vsub.s32 %v799_v32, %v802_v38  ;;  %v825_v24 = vsub.s32 4, %v801_v60  ;;  %vm875_vm12 = vcmp.lt.s32.totalorder %v8436_v21, 1  ;;  %vm878_vm13 = vcmp.lt.s32.totalorder %v8436_v21, 4 }
 0x11e   :  { %vm8459_vm9 = vcmp.le.f32.partialorder %v12007_v43, 0.7853982  ;;  %vm877_vm14 = vcmp.lt.s32.totalorder %v8436_v21, 3  ;;  %v883_v50 = vsel %vm875_vm12, %v862_v51, %v865_v20  ;;  %v884_v35 = vsel %vm878_vm13, %v871_v18, 920167782 }
 0x11f   :  { %v950_v57 = vand.u32 2139095040, %v8177_v12  ;;  %v805_v14 = vsub.s32 0, %v8463_v28  ;;  %vm876_vm1 = vcmp.lt.s32.totalorder %v8436_v21, 2  ;;  %v885_v38 = vsel %vm877_vm14, %v868_v19, %v884_v35 }
 0x120   :  { %v891_v32 = vshll.u32 %v851_v46, 8  ;;  %vm731_vm2 = vcmp.eq.s32.totalorder %v729_v47, 0  ;;  %v880_v36 = vsel %vm878_vm13, %v868_v19, 2102212464  ;;  %v886_v9 = vsel %vm876_vm1, %v883_v50, %v885_v38 }
 0x121   :  { %v887_v5 = vsel %vm875_vm12, %v865_v20, %v868_v19  ;;  %v888_v2 = vsel %vm878_vm13, %v874_v45, 1326507024  ;;  %vm730_vm15 = vcmp.lt.s32.totalorder %v729_v47, 2  ;;  %v7164_v13 = vmin.u32 %v805_v14, %v8463_v28 }
 0x122   :  { %v826_v26 = vsel %vm741_vm11, %v825_v24, %v801_v60  ;;  %v859_v25 = vshrl.u32 %v11985_v17, %v858_v4  ;;  %v889_v46 = vsel %vm877_vm14, %v871_v18, %v888_v2  ;;  %vm727_vm4 = vweird.f32 %v8080_v15 }
 0x123   :  { %v890_v43 = vsel %vm876_vm1, %v887_v5, %v889_v46  ;;  %v8488_v50 = vmul.u32.u64.low %v891_v32, %v886_v9  ;;  %v8489_v35 = vmul.u32.u64.high %v891_v32, %v886_v9, %v8488_v50  ;;  %v951_v45 = vshrl.u32 %v950_v57, 23 }
 0x124   :  { %v807_v19 = vclz %v7164_v13  ;;  %v879_v14 = vsel %vm875_vm12, %v859_v25, %v862_v51  ;;  %v881_v60 = vsel %vm877_vm14, %v865_v20, %v880_v36  ;;  %v11731_v4 = vand.u32 2147483647, %v8177_v12 }
 0x125   :  { %v8498_v18 = vsel %vm8459_vm9, 0, %v826_v26  ;;  %v8500_v24 = vmul.u32.u64.low %v891_v32, %v890_v43  ;;  %v8501_v38 = vmul.u32.u64.high %v891_v32, %v890_v43, %v8500_v24  ;;  %v7171_v5 = vadd.s32 4294967169, %v951_v45  ;;  %v8503_v9 = vpop.eup %7558 }
 0x126   :  { %12010 = vst [vmem:[#allocation20_spill] sm:$0xff] %v8498_v18  ;;  %12011 = vst [vmem:[#allocation21_spill] sm:$0xff] %v8503_v9  ;;  %vm734_vm5 = vcmp.eq.s32.totalorder %v729_v47, 2  ;;  %v795_v57 = vadd.s32 %v8382_v39, %v8372_v37  ;;  %v7165_v51 = vadd.s32 4294967294, %v807_v19  ;;  %v1054_v2 = vand.u32 2139095040, %v8280_v29  ;;  %v8508_v20 = vpop.eup %7560 }
 0x127   :  { %12012 = vst [vmem:[#allocation22_spill] sm:$0xff] %v8508_v20  ;;  %v11734_v36 = vxor.u32 2147483648, %v8503_v9  ;;  %v882_v13 = vsel %vm876_vm1, %v879_v14, %v881_v60  ;;  %v901_v26 = vadd.s32 1, %v8489_v35  ;;  %v957_v25 = vadd.s32 1, %v7171_v5 }
 0x128   :  { %v11741_v46 = vxor.u32 2147483648, %v8508_v20  ;;  %vm7166_vm6 = vcmp.lt.s32.totalorder %v7165_v51, 0  ;;  %v832_v43 = vadd.s32 3, %v8498_v18  ;;  %v954_v37 = vand.u32 8388607, %v11731_v4 }
 0x129   :  { %v736_v39 = vsel %vm734_vm5, %v11734_v36, %v8508_v20  ;;  %v810_v45 = vsel %vm7166_vm6, 0, %v7165_v51  ;;  %vm900_vm7 = vc.u32 %v8501_v38, %v8488_v50  ;;  %v1055_v21 = vshrl.u32 %v1054_v2, 23 }
 0x12a   :  { %v733_v19 = vsel %vm731_vm2, %v8503_v9, %v11741_v46  ;;  %v811_v14 = vsub.s32 32, %v810_v45  ;;  %v815_v60 = vsub.s32 4294967266, %v810_v45  ;;  %v898_v24 = vmul.u32 %v891_v32, %v882_v13 }
 0x12b   :  { %v737_v5 = vsel %vm730_vm15, %v733_v19, %v736_v39  ;;  %v812_v4 = vshll.u32 %v8463_v28, %v810_v45  ;;  %v902_v42 = vsel %vm900_vm7, %v901_v26, %v8489_v35  ;;  %vm958_vm8 = vcmp.gt.s32.totalorder %v957_v25, 0 }
 0x12c   :  { %v738_v51 = vsel %vm727_vm4, nan, %v737_v5  ;;  %v813_v36 = vshrl.u32 %v795_v57, %v811_v14  ;;  %v816_v2 = vadd.s32 127, %v815_v60  ;;  %v903_v8 = vadd.s32 %v902_v42, %v898_v24 }
 0x12d   :  { %v955_v20 = vor.u32 8388608, %v954_v37  ;;  %v959_v40 = vsel %vm958_vm8, %v957_v25, 0  ;;  %v7175_v18 = vadd.s32 4294967169, %v1055_v21  ;;  %7053 = vst [vmem:[%s11709_s2 + $0x10] sm:$0xff] %v738_v51  ;;  %7117 = vst [vmem:[%s11709_s2 + $0x210] sm:$0xff] %v738_v51  ;;  %v8541_v26 = vand.u32 3, %v832_v43 }
 0x12e   :  { %v814_v47 = vor.u32 %v813_v36, %v812_v4  ;;  %v817_v28 = vshll.u32 %v816_v2, 23  ;;  %v904_v32 = vadd.s32 536870912, %v903_v8  ;;  %v11742_v35 = vand.u32 2147483647, %v8280_v29 }
 0x12f   :  { %v961_v13 = vand.u32 31, %v959_v40  ;;  %v8539_v57 = vmul.f32 6.2831855, %v7970_v54  ;;  %v8544_v37 = vadd.s32 %v8488_v50, %v8501_v38  ;;  %v8546_v45 = vshll.u32 %v955_v20, 8 }
 0x130   :  { %v818_v42 = vor.u32 4788187, %v817_v28  ;;  %v905_v25 = vshrl.u32 %v904_v32, 30  ;;  %v1061_v21 = vadd.s32 1, %v7175_v18  ;;  %v821_v36 = vcvt.s32.f32 %v814_v47 }
 0x131   :  { %12013 = vst [vmem:[#allocation23_spill] sm:$0xff] %v8539_v57  ;;  %v962_v39 = vsub.s32 32, %v961_v13  ;;  %v8550_v14 = vand.u32 8388607, %v11742_v35  ;;  %vm845_vm10 = vcmp.lt.s32.totalorder %v8174_v31, 0  ;;  %v970_v50 = vshll.u32 %v11987_v56, %v961_v13 }
 0x132   :  { %v819_v4 = vand.u32 2147483647, %v818_v42  ;;  %v906_v19 = vshll.u32 %v905_v25, 30  ;;  %v960_v18 = vshrl.u32 %v959_v40, 5  ;;  %v964_v5 = vshll.u32 %v11985_v17, %v961_v13 }
 0x133   :  { %v965_v54 = vshrl.u32 %v11986_v52, %v962_v39  ;;  %v968_v43 = vshrl.u32 %v11987_v56, %v962_v39  ;;  %v971_v38 = vshrl.u32 %v11988_v23, %v962_v39  ;;  %v974_v24 = vshrl.u32 %v11989_v27, %v962_v39 }
 0x134   :  { %v822_v20 = vmul.f32 %v821_v36, %v819_v4  ;;  %v8557_v60 = vsub.s32 %v903_v8, %v906_v19  ;;  %v967_v51 = vshll.u32 %v11986_v52, %v961_v13  ;;  %vm1062_vm12 = vcmp.gt.s32.totalorder %v1061_v21, 0 }
 0x135   :  { %v972_v2 = vor.u32 %v971_v38, %v970_v50  ;;  %v929_v32 = vsub.s32 4, %v905_v25  ;;  %v973_v42 = vshll.u32 %v11988_v23, %v961_v13  ;;  %v966_v46 = vor.u32 %v965_v54, %v964_v5 }
 0x136   :  { %v823_v47 = vxor.u32 2147483648, %v822_v20  ;;  %v909_v28 = vsub.s32 0, %v8557_v60  ;;  %v969_v35 = vor.u32 %v968_v43, %v967_v51  ;;  %v976_v8 = vshll.u32 %v11989_v27, %v961_v13 }
 0x137   :  { %v977_v40 = vshrl.u32 %v11990_v22, %v962_v39  ;;  %v12014_v36 = vand.u32 2147483647, %v8174_v31  ;;  %v975_v38 = vor.u32 %v974_v24, %v973_v42  ;;  %vm982_vm14 = vcmp.lt.s32.totalorder %v960_v18, 4 }
 0x138   :  { %v824_v4 = vsel %vm741_vm11, %v823_v47, %v822_v20  ;;  %v7168_v50 = vmin.u32 %v909_v28, %v8557_v60  ;;  %v963_v13 = vshrl.u32 %v11985_v17, %v962_v39  ;;  %v984_v5 = vsel %vm982_vm14, %v972_v2, 2102212464 }
 0x139   :  { %vm8570_vm13 = vcmp.le.f32.partialorder %v12014_v36, 0.7853982  ;;  %v827_v54 = vsel %vm8459_vm9, %v8104_v7, %v824_v4  ;;  %v978_v43 = vor.u32 %v977_v40, %v976_v8  ;;  %vm979_vm11 = vcmp.lt.s32.totalorder %v960_v18, 1 }
 0x13a   :  { %7562 = vcosq.f32 %v827_v54  ;;  %v911_v20 = vclz %v7168_v50  ;;  %vm981_vm1 = vcmp.lt.s32.totalorder %v960_v18, 3  ;;  %v983_v51 = vsel %vm979_vm11, %v963_v13, %v966_v46 }
 0x13b   :  { %7564 = vsinq.f32 %v827_v54  ;;  %v985_v47 = vsel %vm981_vm1, %v969_v35, %v984_v5  ;;  %v987_v28 = vsel %vm979_vm11, %v966_v46, %v969_v35  ;;  %v930_v42 = vsel %vm845_vm10, %v929_v32, %v905_v25 }
 0x13c   :  { %v7169_v24 = vadd.s32 4294967294, %v911_v20  ;;  %v988_v59 = vsel %vm982_vm14, %v975_v38, 920167782  ;;  %v991_v4 = vsel %vm979_vm11, %v969_v35, %v972_v2  ;;  %vm980_vm9 = vcmp.lt.s32.totalorder %v960_v18, 2 }
 0x13d   :  { %v989_v39 = vsel %vm981_vm1, %v972_v2, %v988_v59  ;;  %v992_v8 = vsel %vm982_vm14, %v978_v43, 1326507024  ;;  %v1063_v40 = vsel %vm1062_vm12, %v1061_v21, 0  ;;  %vm838_vm2 = vcmp.eq.s32.totalorder %v8541_v26, 2 }
 0x13e   :  { %vm7170_vm15 = vcmp.lt.s32.totalorder %v7169_v24, 0  ;;  %v986_v36 = vsel %vm980_vm9, %v983_v51, %v985_v47  ;;  %v990_v50 = vsel %vm980_vm9, %v987_v28, %v989_v39  ;;  %v993_v46 = vsel %vm981_vm1, %v975_v38, %v992_v8 }
 0x13f   :  { %vm835_vm5 = vcmp.eq.s32.totalorder %v8541_v26, 0  ;;  %v914_v25 = vsel %vm7170_vm15, 0, %v7169_v24  ;;  %v994_v32 = vsel %vm980_vm9, %v991_v4, %v993_v46  ;;  %vm834_vm6 = vcmp.lt.s32.totalorder %v8541_v26, 2 }
 0x140   :  { %v8591_v35 = vmul.u32.u64.low %v8546_v45, %v990_v50  ;;  %v8592_v54 = vmul.u32.u64.high %v8546_v45, %v990_v50, %v8591_v35  ;;  %v915_v2 = vsub.s32 32, %v914_v25  ;;  %v919_v21 = vsub.s32 4294967266, %v914_v25 }
 0x141   :  { %v1065_v43 = vand.u32 31, %v1063_v40  ;;  %vm831_vm7 = vweird.f32 %v8104_v7  ;;  %v8600_v18 = vsel %vm8570_vm13, 0, %v930_v42  ;;  %v1002_v20 = vmul.u32 %v8546_v45, %v986_v36 }
 0x142   :  { %v8603_v38 = vmul.u32.u64.low %v8546_v45, %v994_v32  ;;  %v8604_v5 = vmul.u32.u64.high %v8546_v45, %v994_v32, %v8603_v38  ;;  %v916_v51 = vshll.u32 %v8557_v60, %v914_v25  ;;  %v917_v47 = vshrl.u32 %v8544_v37, %v915_v2 }
 0x143   :  { %v920_v28 = vadd.s32 127, %v919_v21  ;;  %v1066_v24 = vsub.s32 32, %v1065_v43  ;;  %v1005_v59 = vadd.s32 1, %v8592_v54  ;;  %v8610_v4 = vshrl.u32 %v1063_v40, 5 }
 0x144   :  { %v1068_v39 = vshll.u32 %v11985_v17, %v1065_v43  ;;  %v1071_v42 = vshll.u32 %v11986_v52, %v1065_v43  ;;  %v8614_v8 = vpop.eup %7562  ;;  %v918_v50 = vor.u32 %v917_v47, %v916_v51  ;;  %v1074_v60 = vshll.u32 %v11987_v56, %v1065_v43 }
 0x145   :  { %v921_v46 = vshll.u32 %v920_v28, 23  ;;  %v1069_v45 = vshrl.u32 %v11986_v52, %v1066_v24  ;;  %v8618_v36 = vpop.eup %7564  ;;  %v11746_v37 = vxor.u32 2147483648, %v8614_v8  ;;  %vm1004_vm8 = vc.u32 %v8604_v5, %v8591_v35 }
 0x146   :  { %v1072_v40 = vshrl.u32 %v11987_v56, %v1066_v24  ;;  %v1077_v25 = vshll.u32 %v11988_v23, %v1065_v43  ;;  %v11747_v32 = vxor.u32 2147483648, %v8618_v36  ;;  %v925_v21 = vcvt.s32.f32 %v918_v50 }
 0x147   :  { %v922_v2 = vor.u32 4788187, %v921_v46  ;;  %v1006_v38 = vsel %vm1004_vm8, %v1005_v59, %v8592_v54  ;;  %v840_v51 = vsel %vm838_vm2, %v11746_v37, %v8618_v36  ;;  %v1070_v28 = vor.u32 %v1069_v45, %v1068_v39 }
 0x148   :  { %v1007_v47 = vadd.s32 %v1006_v38, %v1002_v20  ;;  %v1073_v13 = vor.u32 %v1072_v40, %v1071_v42  ;;  %v837_v15 = vsel %vm835_vm5, %v8614_v8, %v11747_v32  ;;  %v1075_v50 = vshrl.u32 %v11988_v23, %v1066_v24 }
 0x149   :  { %v923_v9 = vand.u32 2147483647, %v922_v2  ;;  %v1078_v54 = vshrl.u32 %v11989_v27, %v1066_v24  ;;  %v841_v59 = vsel %vm834_vm6, %v837_v15, %v840_v51  ;;  %v1080_v37 = vshll.u32 %v11989_v27, %v1065_v43 }
 0x14a   :  { %v1008_v46 = vadd.s32 536870912, %v1007_v47  ;;  %v1081_v20 = vshrl.u32 %v11990_v22, %v1066_v24  ;;  %v842_v39 = vsel %vm831_vm7, nan, %v841_v59  ;;  %v1076_v45 = vor.u32 %v1075_v50, %v1074_v60 }
 0x14b   :  { %v926_v42 = vmul.f32 %v925_v21, %v923_v9  ;;  %v1079_v40 = vor.u32 %v1078_v54, %v1077_v25  ;;  %v936_v2 = vadd.s32 3, %v8600_v18  ;;  %v1067_v32 = vshrl.u32 %v11985_v17, %v1066_v24  ;;  %7054 = vst [vmem:[%s11709_s2 + $0x18] sm:$0xff] %v842_v39  ;;  %7118 = vst [vmem:[%s11709_s2 + $0x218] sm:$0xff] %v842_v39 }
 0x14c   :  { %v1009_v38 = vshrl.u32 %v1008_v46, 30  ;;  %vm1083_vm12 = vcmp.lt.s32.totalorder %v8610_v4, 1  ;;  %v1082_v26 = vor.u32 %v1081_v20, %v1080_v37  ;;  %vm1086_vm14 = vcmp.lt.s32.totalorder %v8610_v4, 4 }
 0x14d   :  { %v927_v15 = vxor.u32 2147483648, %v926_v42  ;;  %v1091_v9 = vsel %vm1083_vm12, %v1070_v28, %v1073_v13  ;;  %vm1084_vm11 = vcmp.lt.s32.totalorder %v8610_v4, 2  ;;  %vm1085_vm1 = vcmp.lt.s32.totalorder %v8610_v4, 3 }
 0x14e   :  { %v1010_v43 = vshll.u32 %v1009_v38, 30  ;;  %v1092_v24 = vsel %vm1086_vm14, %v1079_v40, 920167782  ;;  %v1087_v25 = vsel %vm1083_vm12, %v1067_v32, %v1070_v28  ;;  %v1088_v37 = vsel %vm1086_vm14, %v1076_v45, 2102212464 }
 0x14f   :  { %v928_v60 = vsel %vm845_vm10, %v927_v15, %v926_v42  ;;  %v1093_v21 = vsel %vm1085_vm1, %v1076_v45, %v1092_v24  ;;  %v1095_v59 = vsel %vm1083_vm12, %v1073_v13, %v1076_v45  ;;  %v1033_v32 = vsub.s32 4, %v1009_v38 }
 0x150   :  { %v931_v51 = vsel %vm8570_vm13, %v8174_v31, %v928_v60  ;;  %v8672_v50 = vsub.s32 %v1007_v47, %v1010_v43  ;;  %v1094_v54 = vsel %vm1084_vm11, %v1091_v9, %v1093_v21  ;;  %v1096_v28 = vsel %vm1086_vm14, %v1082_v26, 1326507024 }
 0x151   :  { %7566 = vcosq.f32 %v931_v51  ;;  %v12017_v46 = vor.u32 8388608, %v8550_v14  ;;  %v1089_v47 = vsel %vm1085_vm1, %v1073_v13, %v1088_v37  ;;  %v1097_v39 = vsel %vm1085_vm1, %v1079_v40, %v1096_v28 }
 0x152   :  { %7568 = vsinq.f32 %v931_v51  ;;  %v1013_v19 = vsub.s32 0, %v8672_v50  ;;  %v1098_v42 = vsel %vm1084_vm11, %v1095_v59, %v1097_v39  ;;  %vm949_vm10 = vcmp.lt.s32.totalorder %v8177_v12, 0 }
 0x153   :  { %v1099_v20 = vshll.u32 %v12017_v46, 8  ;;  %v1034_v43 = vsel %vm949_vm10, %v1033_v32, %v1009_v38  ;;  %v1090_v13 = vsel %vm1084_vm11, %v1087_v25, %v1089_v47  ;;  %v1158_v40 = vand.u32 2139095040, %v8539_v57 }
 0x154   :  { %v7172_v14 = vmin.u32 %v1013_v19, %v8672_v50  ;;  %v937_v24 = vand.u32 3, %v936_v2  ;;  %v12018_v37 = vand.u32 2147483647, %v8177_v12  ;;  %v8716_v2 = vmul.f32 6.2831855, %v7981_v48 }
 0x155   :  { %v8689_v45 = vmul.u32.u64.low %v1099_v20, %v1094_v54  ;;  %v8690_v15 = vmul.u32.u64.high %v1099_v20, %v1094_v54, %v8689_v45  ;;  %v8694_v26 = vmul.u32.u64.low %v1099_v20, %v1098_v42  ;;  %v8695_v9 = vmul.u32.u64.high %v1099_v20, %v1098_v42, %v8694_v26 }
 0x156   :  { %v1015_v60 = vclz %v7172_v14  ;;  %vm8704_vm13 = vcmp.le.f32.partialorder %v12018_v37, 0.7853982  ;;  %v11750_v54 = vand.u32 2147483647, %v8539_v57  ;;  %v1159_v59 = vshrl.u32 %v1158_v40, 23  ;;  %12021 = vst [vmem:[#allocation24_spill] sm:$0xff] %v8716_v2 }
 0x157   :  { %v1109_v51 = vadd.s32 1, %v8690_v15  ;;  %v8712_v4 = vsel %vm8704_vm13, 0, %v1034_v43  ;;  %v1106_v38 = vmul.u32 %v1099_v20, %v1090_v13  ;;  %vm1108_vm9 = vc.u32 %v8695_v9, %v8689_v45 }
 0x158   :  { %v7173_v28 = vadd.s32 4294967294, %v1015_v60  ;;  %vm935_vm2 = vweird.f32 %v8174_v31  ;;  %v7179_v32 = vadd.s32 4294967169, %v1159_v59  ;;  %vm939_vm15 = vcmp.eq.s32.totalorder %v937_v24, 0 }
 0x159   :  { %v1110_v25 = vsel %vm1108_vm9, %v1109_v51, %v8690_v15  ;;  %vm942_vm5 = vcmp.eq.s32.totalorder %v937_v24, 2  ;;  %v1003_v47 = vadd.s32 %v8591_v35, %v8604_v5  ;;  %v1040_v39 = vadd.s32 3, %v8712_v4 }
 0x15a   :  { %vm7174_vm6 = vcmp.lt.s32.totalorder %v7173_v28, 0  ;;  %v1111_v46 = vadd.s32 %v1110_v25, %v1106_v38  ;;  %v1165_v42 = vadd.s32 1, %v7179_v32  ;;  %v1162_v43 = vand.u32 8388607, %v11750_v54 }
 0x15b   :  { %v8720_v19 = vpop.eup %7566  ;;  %v1018_v20 = vsel %vm7174_vm6, 0, %v7173_v28  ;;  %vm938_vm12 = vcmp.lt.s32.totalorder %v937_v24, 2  ;;  %v8749_v24 = vand.u32 3, %v1040_v39  ;;  %vm1053_vm14 = vcmp.lt.s32.totalorder %v8280_v29, 0 }
 0x15c   :  { %12022 = vst [vmem:[#allocation25_spill] sm:$0xff] %v8720_v19  ;;  %v8725_v48 = vpop.eup %7568  ;;  %v11748_v14 = vxor.u32 2147483648, %v8720_v19  ;;  %v1019_v26 = vsub.s32 32, %v1018_v20  ;;  %v1023_v15 = vsub.s32 4294967266, %v1018_v20  ;;  %v1020_v40 = vshll.u32 %v8672_v50, %v1018_v20 }
 0x15d   :  { %12023 = vst [vmem:[#allocation26_spill] sm:$0xff] %v8725_v48  ;;  %v11749_v13 = vxor.u32 2147483648, %v8725_v48  ;;  %v1112_v60 = vadd.s32 536870912, %v1111_v46  ;;  %vm1166_vm8 = vcmp.gt.s32.totalorder %v1165_v42, 0  ;;  %v1262_v20 = vand.u32 2139095040, %v8716_v2 }
 0x15e   :  { %v944_v35 = vsel %vm942_vm5, %v11748_v14, %v8725_v48  ;;  %v1021_v5 = vshrl.u32 %v1003_v47, %v1019_v26  ;;  %v1024_v37 = vadd.s32 127, %v1023_v15  ;;  %v1167_v51 = vsel %vm1166_vm8, %v1165_v42, 0 }
 0x15f   :  { %v941_v59 = vsel %vm939_vm15, %v8720_v19, %v11749_v13  ;;  %v8740_v28 = vshrl.u32 %v1112_v60, 30  ;;  %v1169_v38 = vand.u32 31, %v1167_v51  ;;  %v8747_v26 = vmul.f32 6.2831855, %v7984_v53 }
 0x160   :  { %v945_v50 = vsel %vm938_vm12, %v941_v59, %v944_v35  ;;  %v1022_v25 = vor.u32 %v1021_v5, %v1020_v40  ;;  %v1025_v32 = vshll.u32 %v1024_v37, 23  ;;  %v1163_v60 = vor.u32 8388608, %v1162_v43 }
 0x161   :  { %v946_v14 = vsel %vm935_vm2, nan, %v945_v50  ;;  %v1114_v47 = vshll.u32 %v8740_v28, 30  ;;  %v1170_v42 = vsub.s32 32, %v1169_v38  ;;  %12024 = vst [vmem:[#allocation27_spill] sm:$0xff] %v8747_v26  ;;  %v1107_v40 = vadd.s32 %v8689_v45, %v8695_v9 }
 0x162   :  { %v1026_v15 = vor.u32 4788187, %v1025_v32  ;;  %7055 = vst [vmem:[%s11709_s2 + $0x20] sm:$0xff] %v946_v14  ;;  %7119 = vst [vmem:[%s11709_s2 + $0x220] sm:$0xff] %v946_v14  ;;  %v1029_v39 = vcvt.s32.f32 %v1022_v25  ;;  %v1263_v59 = vshrl.u32 %v1262_v20, 23  ;;  %v1172_v32 = vshll.u32 %v11985_v17, %v1169_v38 }
 0x163   :  { %v8758_v35 = vsub.s32 %v1111_v46, %v1114_v47  ;;  %v1173_v5 = vshrl.u32 %v11986_v52, %v1170_v42  ;;  %v1176_v43 = vshrl.u32 %v11987_v56, %v1170_v42  ;;  %v1175_v13 = vshll.u32 %v11986_v52, %v1169_v38 }
 0x164   :  { %v1027_v37 = vand.u32 2147483647, %v1026_v15  ;;  %v1179_v14 = vshrl.u32 %v11988_v23, %v1170_v42  ;;  %v1168_v9 = vshrl.u32 %v1167_v51, 5  ;;  %v1181_v46 = vshll.u32 %v11988_v23, %v1169_v38 }
 0x165   :  { %v1117_v50 = vsub.s32 0, %v8758_v35  ;;  %v1182_v47 = vshrl.u32 %v11989_v27, %v1170_v42  ;;  %v1174_v25 = vor.u32 %v1173_v5, %v1172_v32  ;;  %v1177_v54 = vor.u32 %v1176_v43, %v1175_v13 }
 0x166   :  { %v1030_v45 = vmul.f32 %v1029_v39, %v1027_v37  ;;  %v1178_v20 = vshll.u32 %v11987_v56, %v1169_v38  ;;  %v1184_v19 = vshll.u32 %v11989_v27, %v1169_v38  ;;  %v1185_v48 = vshrl.u32 %v11990_v22, %v1170_v42 }
 0x167   :  { %v7176_v15 = vmin.u32 %v1117_v50, %v8758_v35  ;;  %v1183_v31 = vor.u32 %v1182_v47, %v1181_v46  ;;  %v8774_v39 = vshll.u32 %v1163_v60, 8  ;;  %v7183_v7 = vadd.s32 4294967169, %v1263_v59 }
 0x168   :  { %v1031_v53 = vxor.u32 2147483648, %v1030_v45  ;;  %v1180_v51 = vor.u32 %v1179_v14, %v1178_v20  ;;  %v1171_v13 = vshrl.u32 %v11985_v17, %v1170_v42  ;;  %v1186_v5 = vor.u32 %v1185_v48, %v1184_v19 }
 0x169   :  { %v1119_v37 = vclz %v7176_v15  ;;  %vm1187_vm11 = vcmp.lt.s32.totalorder %v1168_v9, 1  ;;  %vm1188_vm1 = vcmp.lt.s32.totalorder %v1168_v9, 2  ;;  %vm1190_vm9 = vcmp.lt.s32.totalorder %v1168_v9, 4 }
 0x16a   :  { %v1032_v50 = vsel %vm949_vm10, %v1031_v53, %v1030_v45  ;;  %vm1189_vm15 = vcmp.lt.s32.totalorder %v1168_v9, 3  ;;  %v1195_v60 = vsel %vm1187_vm11, %v1174_v25, %v1177_v54  ;;  %v1196_v59 = vsel %vm1190_vm9, %v1183_v31, 920167782 }
 0x16b   :  { %v1035_v38 = vsel %vm8704_vm13, %v8177_v12, %v1032_v50  ;;  %v7177_v43 = vadd.s32 4294967294, %v1119_v37  ;;  %v1192_v53 = vsel %vm1190_vm9, %v1180_v51, 2102212464  ;;  %v1197_v19 = vsel %vm1189_vm15, %v1180_v51, %v1196_v59 }
 0x16c   :  { %7570 = vcosq.f32 %v1035_v38  ;;  %v1137_v42 = vsub.s32 4, %v8740_v28  ;;  %v1198_v21 = vsel %vm1188_vm1, %v1195_v60, %v1197_v19  ;;  %v1199_v32 = vsel %vm1187_vm11, %v1177_v54, %v1180_v51 }
 0x16d   :  { %7572 = vsinq.f32 %v1035_v38  ;;  %vm7178_vm5 = vcmp.lt.s32.totalorder %v7177_v43, 0  ;;  %v1191_v46 = vsel %vm1187_vm11, %v1171_v13, %v1174_v25  ;;  %v1200_v47 = vsel %vm1190_vm9, %v1186_v5, 1326507024 }
 0x16e   :  { %v1122_v48 = vsel %vm7178_vm5, 0, %v7177_v43  ;;  %v1193_v15 = vsel %vm1189_vm15, %v1177_v54, %v1192_v53  ;;  %v1201_v20 = vsel %vm1189_vm15, %v1183_v31, %v1200_v47  ;;  %v1138_v25 = vsel %vm1053_vm14, %v1137_v42, %v8740_v28 }
 0x16f   :  { %v1123_v14 = vsub.s32 32, %v1122_v48  ;;  %v1127_v45 = vsub.s32 4294967266, %v1122_v48  ;;  %v8794_v37 = vmul.u32.u64.low %v8774_v39, %v1198_v21  ;;  %v8795_v50 = vmul.u32.u64.high %v8774_v39, %v1198_v21, %v8794_v37 }
 0x170   :  { %v1124_v38 = vshll.u32 %v8758_v35, %v1122_v48  ;;  %v1202_v51 = vsel %vm1188_vm1, %v1199_v32, %v1201_v20  ;;  %v1269_v31 = vadd.s32 1, %v7183_v7  ;;  %vm1039_vm10 = vweird.f32 %v8177_v12 }
 0x171   :  { %v1125_v43 = vshrl.u32 %v1107_v40, %v1123_v14  ;;  %v1128_v60 = vadd.s32 127, %v1127_v45  ;;  %v8804_v13 = vmul.u32.u64.low %v8774_v39, %v1202_v51  ;;  %v8805_v54 = vmul.u32.u64.high %v8774_v39, %v1202_v51, %v8804_v13 }
 0x172   :  { %v12025_v5 = vand.u32 2147483647, %v8280_v29  ;;  %v1194_v53 = vsel %vm1188_vm1, %v1191_v46, %v1193_v15  ;;  %vm1042_vm6 = vcmp.lt.s32.totalorder %v8749_v24, 2  ;;  %vm1043_vm8 = vcmp.eq.s32.totalorder %v8749_v24, 0 }
 0x173   :  { %v1126_v40 = vor.u32 %v1125_v43, %v1124_v38  ;;  %v1129_v35 = vshll.u32 %v1128_v60, 23  ;;  %v1213_v28 = vadd.s32 1, %v8795_v50  ;;  %vm1270_vm12 = vcmp.gt.s32.totalorder %v1269_v31, 0 }
 0x174   :  { %vm8810_vm13 = vcmp.le.f32.partialorder %v12025_v5, 0.7853982  ;;  %v12029_v48 = vand.u32 2147483647, %v8716_v2  ;;  %v1271_v21 = vsel %vm1270_vm12, %v1269_v31, 0  ;;  %vm1046_vm11 = vcmp.eq.s32.totalorder %v8749_v24, 2 }
 0x175   :  { %v1130_v7 = vor.u32 4788187, %v1129_v35  ;;  %v8820_v19 = vsel %vm8810_vm13, 0, %v1138_v25  ;;  %v1210_v9 = vmul.u32 %v8774_v39, %v1194_v53  ;;  %vm1212_vm1 = vc.u32 %v8805_v54, %v8794_v37 }
 0x176   :  { %12028 = vst [vmem:[#allocation28_spill] sm:$0xff] %v8820_v19  ;;  %v1266_v42 = vand.u32 8388607, %v12029_v48  ;;  %v8824_v32 = vpop.eup %7570  ;;  %v1273_v14 = vand.u32 31, %v1271_v21  ;;  %v1133_v15 = vcvt.s32.f32 %v1126_v40  ;;  %v1214_v20 = vsel %vm1212_vm1, %v1213_v28, %v8795_v50 }
 0x177   :  { %12030 = vst [vmem:[#allocation29_spill] sm:$0xff] %v8824_v32  ;;  %v8830_v45 = vpop.eup %7572  ;;  %v11757_v46 = vxor.u32 2147483648, %v8824_v32  ;;  %v1131_v47 = vand.u32 2147483647, %v1130_v7  ;;  %v1144_v43 = vadd.s32 3, %v8820_v19  ;;  %v1215_v60 = vadd.s32 %v1214_v20, %v1210_v9 }
 0x178   :  { %12031 = vst [vmem:[#allocation30_spill] sm:$0xff] %v8830_v45  ;;  %v11758_v38 = vxor.u32 2147483648, %v8830_v45  ;;  %v1274_v51 = vsub.s32 32, %v1273_v14  ;;  %v1267_v13 = vor.u32 8388608, %v1266_v42  ;;  %v1366_v31 = vand.u32 2139095040, %v8747_v26 }
 0x179   :  { %v1048_v39 = vsel %vm1046_vm11, %v11757_v46, %v8830_v45  ;;  %v1134_v25 = vmul.f32 %v1133_v15, %v1131_v47  ;;  %v1216_v5 = vadd.s32 536870912, %v1215_v60  ;;  %v8845_v40 = vshrl.u32 %v1271_v21, 5 }
 0x17a   :  { %v1045_v50 = vsel %vm1043_vm8, %v8824_v32, %v11758_v38  ;;  %v1277_v35 = vshrl.u32 %v11986_v52, %v1274_v51  ;;  %v1276_v7 = vshll.u32 %v11985_v17, %v1273_v14  ;;  %v1280_v48 = vshrl.u32 %v11987_v56, %v1274_v51 }
 0x17b   :  { %v1049_v53 = vsel %vm1042_vm6, %v1045_v50, %v1048_v39  ;;  %v1135_v28 = vxor.u32 2147483648, %v1134_v25  ;;  %v8854_v9 = vshrl.u32 %v1216_v5, 30  ;;  %v1279_v47 = vshll.u32 %v11986_v52, %v1273_v14 }
 0x17c   :  { %v1050_v42 = vsel %vm1039_vm10, nan, %v1049_v53  ;;  %v1283_v21 = vshrl.u32 %v11988_v23, %v1274_v51  ;;  %v1282_v24 = vshll.u32 %v11987_v56, %v1273_v14  ;;  %v1285_v20 = vshll.u32 %v11988_v23, %v1273_v14 }
 0x17d   :  { %v1136_v15 = vsel %vm1053_vm14, %v1135_v28, %v1134_v25  ;;  %v1286_v39 = vshrl.u32 %v11989_v27, %v1274_v51  ;;  %7056 = vst [vmem:[%s11709_s2 + $0x28] sm:$0xff] %v1050_v42  ;;  %7120 = vst [vmem:[%s11709_s2 + $0x228] sm:$0xff] %v1050_v42  ;;  %v1218_v25 = vshll.u32 %v8854_v9, 30  ;;  %v1278_v5 = vor.u32 %v1277_v35, %v1276_v7 }
 0x17e   :  { %v1139_v50 = vsel %vm8810_vm13, %v8280_v29, %v1136_v15  ;;  %v1281_v53 = vor.u32 %v1280_v48, %v1279_v47  ;;  %v1288_v46 = vshll.u32 %v11989_v27, %v1273_v14  ;;  %v1289_v38 = vshrl.u32 %v11990_v22, %v1274_v51 }
 0x17f   :  { %7574 = vcosq.f32 %v1139_v50  ;;  %v1287_v28 = vor.u32 %v1286_v39, %v1285_v20  ;;  %v8875_v12 = vsub.s32 %v1215_v60, %v1218_v25  ;;  %v1284_v19 = vor.u32 %v1283_v21, %v1282_v24 }
 0x180   :  { %7576 = vsinq.f32 %v1139_v50  ;;  %v1145_v32 = vand.u32 3, %v1144_v43  ;;  %v1290_v42 = vor.u32 %v1289_v38, %v1288_v46  ;;  %v11767_v45 = vand.u32 2147483647, %v8747_v26 }
 0x181   :  { %v1367_v59 = vshrl.u32 %v1366_v31, 23  ;;  %vm1157_vm14 = vcmp.lt.s32.totalorder %v8539_v57, 0  ;;  %v1221_v35 = vsub.s32 0, %v8875_v12  ;;  %vm1291_vm9 = vcmp.lt.s32.totalorder %v8845_v40, 1 }
 0x182   :  { %vm1294_vm15 = vcmp.lt.s32.totalorder %v8845_v40, 4  ;;  %v1307_v14 = vshll.u32 %v1267_v13, 8  ;;  %v1275_v7 = vshrl.u32 %v11985_v17, %v1274_v51  ;;  %vm1293_vm5 = vcmp.lt.s32.totalorder %v8845_v40, 3 }
 0x183   :  { %v1299_v43 = vsel %vm1291_vm9, %v1278_v5, %v1281_v53  ;;  %v1300_v46 = vsel %vm1294_vm15, %v1287_v28, 920167782  ;;  %v7180_v38 = vmin.u32 %v1221_v35, %v8875_v12  ;;  %vm1292_vm13 = vcmp.lt.s32.totalorder %v8845_v40, 2 }
 0x184   :  { %v1296_v60 = vsel %vm1294_vm15, %v1284_v19, 2102212464  ;;  %v1301_v31 = vsel %vm1293_vm5, %v1284_v19, %v1300_v46  ;;  %vm1146_vm6 = vcmp.lt.s32.totalorder %v1145_v32, 2  ;;  %v1303_v51 = vsel %vm1291_vm9, %v1281_v53, %v1284_v19 }
 0x185   :  { %v1302_v13 = vsel %vm1292_vm13, %v1299_v43, %v1301_v31  ;;  %v1304_v48 = vsel %vm1294_vm15, %v1290_v42, 1326507024  ;;  %v7187_v47 = vadd.s32 4294967169, %v1367_v59  ;;  %vm11971_vm8 = vweird.f32 %v8280_v29 }
 0x186   :  { %vm1147_vm12 = vcmp.eq.s32.totalorder %v1145_v32, 0  ;;  %v1223_v21 = vclz %v7180_v38  ;;  %v1241_v15 = vsub.s32 4, %v8854_v9  ;;  %v1295_v24 = vsel %vm1291_vm9, %v1275_v7, %v1278_v5 }
 0x187   :  { %v1297_v20 = vsel %vm1293_vm5, %v1281_v53, %v1296_v60  ;;  %v1305_v39 = vsel %vm1293_vm5, %v1287_v28, %v1304_v48  ;;  %v8902_v50 = vmul.u32.u64.low %v1307_v14, %v1302_v13  ;;  %v8903_v25 = vmul.u32.u64.high %v1307_v14, %v1302_v13, %v8902_v50 }
 0x188   :  { %vm1150_vm11 = vcmp.eq.s32.totalorder %v1145_v32, 2  ;;  %v7181_v19 = vadd.s32 4294967294, %v1223_v21  ;;  %v1306_v42 = vsel %vm1292_vm13, %v1303_v51, %v1305_v39  ;;  %v1373_v59 = vadd.s32 1, %v7187_v47 }
 0x189   :  { %v8908_v35 = vpop.eup %7574  ;;  %v1211_v5 = vadd.s32 %v8794_v37, %v8805_v54  ;;  %v8912_v7 = vmul.u32.u64.low %v1307_v14, %v1306_v42  ;;  %v8913_v53 = vmul.u32.u64.high %v1307_v14, %v1306_v42, %v8912_v7  ;;  %v8917_v28 = vand.u32 8388607, %v11767_v45 }
 0x18a   :  { %12032 = vst [vmem:[#allocation31_spill] sm:$0xff] %v8908_v35  ;;  %v8919_v43 = vpop.eup %7576  ;;  %v11765_v46 = vxor.u32 2147483648, %v8908_v35  ;;  %vm7182_vm1 = vcmp.lt.s32.totalorder %v7181_v19, 0  ;;  %v1298_v38 = vsel %vm1292_vm13, %v1295_v24, %v1297_v20  ;;  %vm1374_vm9 = vcmp.gt.s32.totalorder %v1373_v59, 0 }
 0x18b   :  { %12033 = vst [vmem:[#allocation32_spill] sm:$0xff] %v8919_v43  ;;  %v11766_v60 = vxor.u32 2147483648, %v8919_v43  ;;  %v1226_v31 = vsel %vm7182_vm1, 0, %v7181_v19  ;;  %v1242_v37 = vsel %vm1157_vm14, %v1241_v15, %v8854_v9  ;;  %v1317_v54 = vadd.s32 1, %v8903_v25 }
 0x18c   :  { %v1152_v13 = vsel %vm1150_vm11, %v11765_v46, %v8919_v43  ;;  %v1227_v51 = vsub.s32 32, %v1226_v31  ;;  %v1231_v48 = vsub.s32 4294967266, %v1226_v31  ;;  %v1375_v47 = vsel %vm1374_vm9, %v1373_v59, 0 }
 0x18d   :  { %v1149_v40 = vsel %vm1147_vm12, %v8908_v35, %v11766_v60  ;;  %v1228_v21 = vshll.u32 %v8875_v12, %v1226_v31  ;;  %v1314_v24 = vmul.u32 %v1307_v14, %v1298_v38  ;;  %vm1316_vm15 = vc.u32 %v8913_v53, %v8902_v50 }
 0x18e   :  { %v1153_v9 = vsel %vm1146_vm6, %v1149_v40, %v1152_v13  ;;  %v1229_v15 = vshrl.u32 %v1211_v5, %v1227_v51  ;;  %v1232_v20 = vadd.s32 127, %v1231_v48  ;;  %v1318_v39 = vsel %vm1316_vm15, %v1317_v54, %v8903_v25 }
 0x18f   :  { %v1154_v19 = vsel %vm11971_vm8, nan, %v1153_v9  ;;  %v1319_v42 = vadd.s32 %v1318_v39, %v1314_v24  ;;  %v1377_v59 = vand.u32 31, %v1375_v47  ;;  %v8945_v7 = vmul.f32 6.2831855, %v7987_v49 }
 0x190   :  { %v12035_v12 = vand.u32 2147483647, %v8539_v57  ;;  %v1230_v32 = vor.u32 %v1229_v15, %v1228_v21  ;;  %v1233_v38 = vshll.u32 %v1232_v20, 23  ;;  %7057 = vst [vmem:[%s11709_s2 + $0x30] sm:$0xff] %v1154_v19  ;;  %7121 = vst [vmem:[%s11709_s2 + $0x230] sm:$0xff] %v1154_v19  ;;  %v1371_v5 = vor.u32 8388608, %v8917_v28 }
 0x191   :  { %12034 = vst [vmem:[#allocation33_spill] sm:$0xff] %v8945_v7  ;;  %v1320_v25 = vadd.s32 536870912, %v1319_v42  ;;  %v1378_v31 = vsub.s32 32, %v1377_v59  ;;  %v1376_v13 = vshrl.u32 %v1375_v47, 5  ;;  %v1380_v51 = vshll.u32 %v11985_v17, %v1377_v59 }
 0x192   :  { %vm8949_vm5 = vcmp.le.f32.partialorder %v12035_v12, 0.7853982  ;;  %v1234_v54 = vor.u32 4788187, %v1233_v38  ;;  %v1383_v48 = vshll.u32 %v11986_v52, %v1377_v59  ;;  %v1237_v40 = vcvt.s32.f32 %v1230_v32 }
 0x193   :  { %v8961_v49 = vsel %vm8949_vm5, 0, %v1242_v37  ;;  %v8966_v21 = vshrl.u32 %v1320_v25, 30  ;;  %v1381_v24 = vshrl.u32 %v11986_v52, %v1378_v31  ;;  %v1384_v9 = vshrl.u32 %v11987_v56, %v1378_v31 }
 0x194   :  { %v1235_v15 = vand.u32 2147483647, %v1234_v54  ;;  %v1387_v37 = vshrl.u32 %v11988_v23, %v1378_v31  ;;  %v1389_v20 = vshll.u32 %v11988_v23, %v1377_v59  ;;  %v1390_v28 = vshrl.u32 %v11989_v27, %v1378_v31 }
 0x195   :  { %v1322_v47 = vshll.u32 %v8966_v21, 30  ;;  %v1382_v39 = vor.u32 %v1381_v24, %v1380_v51  ;;  %v1385_v19 = vor.u32 %v1384_v9, %v1383_v48  ;;  %v1386_v12 = vshll.u32 %v11987_v56, %v1377_v59 }
 0x196   :  { %v1238_v32 = vmul.f32 %v1237_v40, %v1235_v15  ;;  %v1391_v38 = vor.u32 %v1390_v28, %v1389_v20  ;;  %v1392_v25 = vshll.u32 %v11989_v27, %v1377_v59  ;;  %v1393_v46 = vshrl.u32 %v11990_v22, %v1378_v31 }
 0x197   :  { %v8978_v54 = vmul.f32 6.2831855, %v7990_v33  ;;  %v1248_v60 = vadd.s32 3, %v8961_v49  ;;  %v8981_v45 = vsub.s32 %v1319_v42, %v1322_v47  ;;  %v1388_v29 = vor.u32 %v1387_v37, %v1386_v12 }
 0x198   :  { %v1239_v35 = vxor.u32 2147483648, %v1238_v32  ;;  %v1394_v43 = vor.u32 %v1393_v46, %v1392_v25  ;;  %vm1395_vm13 = vcmp.lt.s32.totalorder %v1376_v13, 1  ;;  %v1411_v51 = vshll.u32 %v1371_v5, 8 }
 0x199   :  { %12038 = vst [vmem:[#allocation34_spill] sm:$0xff] %v8978_v54  ;;  %v1325_v48 = vsub.s32 0, %v8981_v45  ;;  %vm1396_vm6 = vcmp.lt.s32.totalorder %v1376_v13, 2  ;;  %vm1398_vm12 = vcmp.lt.s32.totalorder %v1376_v13, 4  ;;  %v1403_v59 = vsel %vm1395_vm13, %v1382_v39, %v1385_v19 }
 0x19a   :  { %v1240_v40 = vsel %vm1157_vm14, %v1239_v35, %v1238_v32  ;;  %v1379_v33 = vshrl.u32 %v11985_v17, %v1378_v31  ;;  %vm1397_vm11 = vcmp.lt.s32.totalorder %v1376_v13, 3  ;;  %v1404_v24 = vsel %vm1398_vm12, %v1391_v38, 920167782 }
 0x19b   :  { %v1243_v42 = vsel %vm8949_vm5, %v8539_v57, %v1240_v40  ;;  %v7184_v46 = vmin.u32 %v1325_v48, %v8981_v45  ;;  %v1400_v5 = vsel %vm1398_vm12, %v1388_v29, 2102212464  ;;  %v1405_v9 = vsel %vm1397_vm11, %v1388_v29, %v1404_v24 }
 0x19c   :  { %7578 = vcosq.f32 %v1243_v42  ;;  %v1406_v15 = vsel %vm1396_vm6, %v1403_v59, %v1405_v9  ;;  %v1407_v37 = vsel %vm1395_vm13, %v1385_v19, %v1388_v29  ;;  %v1408_v20 = vsel %vm1398_vm12, %v1394_v43, 1326507024 }
 0x19d   :  { %7580 = vsinq.f32 %v1243_v42  ;;  %v1249_v35 = vand.u32 3, %v1248_v60  ;;  %v1327_v28 = vclz %v7184_v46  ;;  %v1399_v31 = vsel %vm1395_vm13, %v1379_v33, %v1382_v39 }
 0x19e   :  { %v1401_v47 = vsel %vm1397_vm11, %v1385_v19, %v1400_v5  ;;  %v1409_v12 = vsel %vm1397_vm11, %v1391_v38, %v1408_v20  ;;  %v8995_v32 = vmul.u32.u64.low %v1411_v51, %v1406_v15  ;;  %v8996_v14 = vmul.u32.u64.high %v1411_v51, %v1406_v15, %v8995_v32 }
 0x19f   :  { %v7185_v25 = vadd.s32 4294967294, %v1327_v28  ;;  %v1345_v48 = vsub.s32 4, %v8966_v21  ;;  %v1410_v40 = vsel %vm1396_vm6, %v1407_v37, %v1409_v12  ;;  %v1470_v59 = vand.u32 2139095040, %v8945_v7 }
 0x1a0   :  { %vm1261_vm14 = vcmp.lt.s32.totalorder %v8716_v2, 0  ;;  %v9003_v29 = vmul.u32.u64.low %v1411_v51, %v1410_v40  ;;  %v9004_v43 = vmul.u32.u64.high %v1411_v51, %v1410_v40, %v9003_v29  ;;  %v11775_v60 = vand.u32 2147483647, %v8945_v7 }
 0x1a1   :  { %v12039_v39 = vand.u32 2147483647, %v8716_v2  ;;  %vm7186_vm9 = vcmp.lt.s32.totalorder %v7185_v25, 0  ;;  %v1402_v38 = vsel %vm1396_vm6, %v1399_v31, %v1401_v47  ;;  %v1471_v33 = vshrl.u32 %v1470_v59, 23 }
 0x1a2   :  { %vm1250_vm15 = vcmp.lt.s32.totalorder %v1249_v35, 2  ;;  %v1315_v24 = vadd.s32 %v8902_v50, %v8913_v53  ;;  %v1330_v42 = vsel %vm7186_vm9, 0, %v7185_v25  ;;  %v1421_v46 = vadd.s32 1, %v8996_v14 }
 0x1a3   :  { %vm9009_vm1 = vcmp.le.f32.partialorder %v12039_v39, 0.7853982  ;;  %v1331_v5 = vsub.s32 32, %v1330_v42  ;;  %v1335_v9 = vsub.s32 4294967266, %v1330_v42  ;;  %v1346_v15 = vsel %vm1261_vm14, %v1345_v48, %v8966_v21 }
 0x1a4   :  { %v7191_v37 = vadd.s32 4294967169, %v1471_v33  ;;  %v1332_v20 = vshll.u32 %v8981_v45, %v1330_v42  ;;  %v1418_v28 = vmul.u32 %v1411_v51, %v1402_v38  ;;  %vm1420_vm5 = vc.u32 %v9004_v43, %v8995_v32 }
 0x1a5   :  { %v1474_v13 = vand.u32 8388607, %v11775_v60  ;;  %v1333_v50 = vshrl.u32 %v1315_v24, %v1331_v5  ;;  %v1336_v53 = vadd.s32 127, %v1335_v9  ;;  %v1422_v31 = vsel %vm1420_vm5, %v1421_v46, %v8996_v14 }
 0x1a6   :  { %v1477_v47 = vadd.s32 1, %v7191_v37  ;;  %v9026_v12 = vpop.eup %7578  ;;  %vm1251_vm13 = vcmp.eq.s32.totalorder %v1249_v35, 0  ;;  %v9030_v21 = vsel %vm9009_vm1, 0, %v1346_v15  ;;  %v1423_v45 = vadd.s32 %v1422_v31, %v1418_v28 }
 0x1a7   :  { %12042 = vst [vmem:[#allocation35_spill] sm:$0xff] %v9026_v12  ;;  %v1574_v51 = vand.u32 2139095040, %v8978_v54  ;;  %v9033_v25 = vpop.eup %7580  ;;  %v11773_v48 = vxor.u32 2147483648, %v9026_v12  ;;  %v1334_v40 = vor.u32 %v1333_v50, %v1332_v20  ;;  %v1337_v59 = vshll.u32 %v1336_v53, 23 }
 0x1a8   :  { %12043 = vst [vmem:[#allocation36_spill] sm:$0xff] %v9033_v25  ;;  %vm1478_vm6 = vcmp.gt.s32.totalorder %v1477_v47, 0  ;;  %v11774_v14 = vxor.u32 2147483648, %v9033_v25  ;;  %vm1254_vm12 = vcmp.eq.s32.totalorder %v1249_v35, 2  ;;  %v1424_v29 = vadd.s32 536870912, %v1423_v45 }
 0x1a9   :  { %v1479_v39 = vsel %vm1478_vm6, %v1477_v47, 0  ;;  %v1256_v38 = vsel %vm1254_vm12, %v11773_v48, %v9033_v25  ;;  %v1338_v33 = vor.u32 4788187, %v1337_v59  ;;  %v1352_v24 = vadd.s32 3, %v9030_v21 }
 0x1aa   :  { %v1475_v42 = vor.u32 8388608, %v1474_v13  ;;  %v1253_v46 = vsel %vm1251_vm13, %v9026_v12, %v11774_v14  ;;  %v9045_v5 = vshrl.u32 %v1424_v29, 30  ;;  %v1481_v9 = vand.u32 31, %v1479_v39 }
 0x1ab   :  { %v1575_v15 = vshrl.u32 %v1574_v51, 23  ;;  %vm11970_vm11 = vweird.f32 %v8539_v57  ;;  %v1257_v37 = vsel %vm1250_vm15, %v1253_v46, %v1256_v38  ;;  %v1339_v20 = vand.u32 2147483647, %v1338_v33 }
 0x1ac   :  { %v1341_v28 = vcvt.s32.f32 %v1334_v40  ;;  %v1258_v50 = vsel %vm11970_vm11, nan, %v1257_v37  ;;  %v1426_v13 = vshll.u32 %v9045_v5, 30  ;;  %v9052_v53 = vshrl.u32 %v1479_v39, 5 }
 0x1ad   :  { %v1482_v31 = vsub.s32 32, %v1481_v9  ;;  %v9055_v47 = vmul.f32 6.2831855, %v8009_v16  ;;  %v9058_v59 = vmul.f32 6.2831855, %v8012_v41  ;;  %v9060_v29 = vand.u32 3, %v1352_v24 }
 0x1ae   :  { %v1342_v51 = vmul.f32 %v1341_v28, %v1339_v20  ;;  %7058 = vst [vmem:[%s11709_s2 + $0x38] sm:$0xff] %v1258_v50  ;;  %7122 = vst [vmem:[%s11709_s2 + $0x238] sm:$0xff] %v1258_v50  ;;  %v9068_v35 = vsub.s32 %v1423_v45, %v1426_v13  ;;  %v9071_v16 = vshll.u32 %v1475_v42, 8  ;;  %v7195_v39 = vadd.s32 4294967169, %v1575_v15 }
 0x1af   :  { %12044 = vst [vmem:[#allocation37_spill] sm:$0xff] %v9055_v47  ;;  %12045 = vst [vmem:[#allocation38_spill] sm:$0xff] %v9058_v59  ;;  %v1485_v40 = vshrl.u32 %v11986_v52, %v1482_v31  ;;  %v1484_v38 = vshll.u32 %v11985_v17, %v1481_v9  ;;  %v1488_v33 = vshrl.u32 %v11987_v56, %v1482_v31  ;;  %vm1499_vm9 = vcmp.lt.s32.totalorder %v9052_v53, 1 }
 0x1b0   :  { %v1343_v41 = vxor.u32 2147483648, %v1342_v51  ;;  %v1491_v24 = vshrl.u32 %v11988_v23, %v1482_v31  ;;  %v1429_v46 = vsub.s32 0, %v9068_v35  ;;  %v1487_v37 = vshll.u32 %v11986_v52, %v1481_v9 }
 0x1b1   :  { %v1490_v20 = vshll.u32 %v11987_v56, %v1481_v9  ;;  %v1486_v42 = vor.u32 %v1485_v40, %v1484_v38  ;;  %v1493_v15 = vshll.u32 %v11988_v23, %v1481_v9  ;;  %v1494_v28 = vshrl.u32 %v11989_v27, %v1482_v31 }
 0x1b2   :  { %v1344_v45 = vsel %vm1261_vm14, %v1343_v41, %v1342_v51  ;;  %v7188_v13 = vmin.u32 %v1429_v46, %v9068_v35  ;;  %v1489_v48 = vor.u32 %v1488_v33, %v1487_v37  ;;  %v1496_v57 = vshll.u32 %v11989_v27, %v1481_v9 }
 0x1b3   :  { %v1347_v50 = vsel %vm9009_vm1, %v8716_v2, %v1344_v45  ;;  %v1492_v14 = vor.u32 %v1491_v24, %v1490_v20  ;;  %v1495_v60 = vor.u32 %v1494_v28, %v1493_v15  ;;  %v1497_v12 = vshrl.u32 %v11990_v22, %v1482_v31 }
 0x1b4   :  { %7582 = vcosq.f32 %v1347_v50  ;;  %vm1365_vm14 = vcmp.lt.s32.totalorder %v8747_v26, 0  ;;  %v1431_v51 = vclz %v7188_v13  ;;  %v1449_v40 = vsub.s32 4, %v9045_v5 }
 0x1b5   :  { %7584 = vsinq.f32 %v1347_v50  ;;  %vm1500_vm15 = vcmp.lt.s32.totalorder %v9052_v53, 2  ;;  %v1483_v19 = vshrl.u32 %v11985_v17, %v1482_v31  ;;  %v1498_v41 = vor.u32 %v1497_v12, %v1496_v57 }
 0x1b6   :  { %vm1501_vm1 = vcmp.lt.s32.totalorder %v9052_v53, 3  ;;  %vm1502_vm5 = vcmp.lt.s32.totalorder %v9052_v53, 4  ;;  %v7189_v38 = vadd.s32 4294967294, %v1431_v51  ;;  %v1507_v9 = vsel %vm1499_vm9, %v1486_v42, %v1489_v48 }
 0x1b7   :  { %v1504_v33 = vsel %vm1502_vm5, %v1492_v14, 2102212464  ;;  %v1508_v24 = vsel %vm1502_vm5, %v1495_v60, 920167782  ;;  %v1503_v46 = vsel %vm1499_vm9, %v1483_v19, %v1486_v42  ;;  %v1511_v20 = vsel %vm1499_vm9, %v1489_v48, %v1492_v14 }
 0x1b8   :  { %v1509_v37 = vsel %vm1501_vm1, %v1492_v14, %v1508_v24  ;;  %v1512_v45 = vsel %vm1502_vm5, %v1498_v41, 1326507024  ;;  %vm7190_vm13 = vcmp.lt.s32.totalorder %v7189_v38, 0  ;;  %v1505_v57 = vsel %vm1501_vm1, %v1489_v48, %v1504_v33 }
 0x1b9   :  { %v1510_v12 = vsel %vm1500_vm15, %v1507_v9, %v1509_v37  ;;  %v1513_v31 = vsel %vm1501_vm1, %v1495_v60, %v1512_v45  ;;  %v1434_v15 = vsel %vm7190_vm13, 0, %v7189_v38  ;;  %vm11787_vm6 = vweird.f32 %v8716_v2 }
 0x1ba   :  { %v1514_v28 = vsel %vm1500_vm15, %v1511_v20, %v1513_v31  ;;  %v9107_v50 = vmul.u32.u64.low %v9071_v16, %v1510_v12  ;;  %v9108_v13 = vmul.u32.u64.high %v9071_v16, %v1510_v12, %v9107_v50  ;;  %v12046_v14 = vand.u32 2147483647, %v8747_v26 }
 0x1bb   :  { %v1419_v60 = vadd.s32 %v8995_v32, %v9004_v43  ;;  %v1435_v48 = vsub.s32 32, %v1434_v15  ;;  %v1439_v51 = vsub.s32 4294967266, %v1434_v15  ;;  %vm1355_vm9 = vcmp.eq.s32.totalorder %v9060_v29, 0 }
 0x1bc   :  { %vm9114_vm12 = vcmp.le.f32.partialorder %v12046_v14, 0.7853982  ;;  %v9122_v19 = vmul.u32.u64.low %v9071_v16, %v1514_v28  ;;  %v9123_v41 = vmul.u32.u64.high %v9071_v16, %v1514_v28, %v9122_v19  ;;  %v1581_v38 = vadd.s32 1, %v7195_v39 }
 0x1bd   :  { %v1436_v33 = vshll.u32 %v9068_v35, %v1434_v15  ;;  %v1437_v9 = vshrl.u32 %v1419_v60, %v1435_v48  ;;  %v1440_v24 = vadd.s32 127, %v1439_v51  ;;  %v1506_v37 = vsel %vm1500_vm15, %v1503_v46, %v1505_v57 }
 0x1be   :  { %v9128_v20 = vpop.eup %7582  ;;  %v1450_v32 = vsel %vm1365_vm14, %v1449_v40, %v9045_v5  ;;  %v1525_v43 = vadd.s32 1, %v9108_v13  ;;  %v11781_v45 = vand.u32 2147483647, %v8978_v54  ;;  %vm1582_vm1 = vcmp.gt.s32.totalorder %v1581_v38, 0 }
 0x1bf   :  { %12049 = vst [vmem:[#allocation39_spill] sm:$0xff] %v9128_v20  ;;  %v9135_v12 = vpop.eup %7584  ;;  %v11779_v35 = vxor.u32 2147483648, %v9128_v20  ;;  %v1438_v39 = vor.u32 %v1437_v9, %v1436_v33  ;;  %v1441_v31 = vshll.u32 %v1440_v24, 23  ;;  %v1583_v15 = vsel %vm1582_vm1, %v1581_v38, 0 }
 0x1c0   :  { %12050 = vst [vmem:[#allocation40_spill] sm:$0xff] %v9135_v12  ;;  %v11780_v53 = vxor.u32 2147483648, %v9135_v12  ;;  %vm1358_vm15 = vcmp.eq.s32.totalorder %v9060_v29, 2  ;;  %v1522_v46 = vmul.u32 %v9071_v16, %v1506_v37  ;;  %vm1524_vm5 = vc.u32 %v9123_v41, %v9107_v50 }
 0x1c1   :  { %v1360_v5 = vsel %vm1358_vm15, %v11779_v35, %v9135_v12  ;;  %v1442_v40 = vor.u32 4788187, %v1441_v31  ;;  %v9148_v57 = vsel %vm9114_vm12, 0, %v1450_v32  ;;  %v1526_v28 = vsel %vm1524_vm5, %v1525_v43, %v9108_v13 }
 0x1c2   :  { %vm1354_vm13 = vcmp.lt.s32.totalorder %v9060_v29, 2  ;;  %v1357_v16 = vsel %vm1355_vm9, %v9128_v20, %v11780_v53  ;;  %v1527_v14 = vadd.s32 %v1526_v28, %v1522_v46  ;;  %v1585_v60 = vand.u32 31, %v1583_v15 }
 0x1c3   :  { %v1361_v48 = vsel %vm1354_vm13, %v1357_v16, %v1360_v5  ;;  %v1443_v51 = vand.u32 2147483647, %v1442_v40  ;;  %v1445_v19 = vcvt.s32.f32 %v1438_v39  ;;  %v1578_v38 = vand.u32 8388607, %v11781_v45 }
 0x1c4   :  { %v1362_v33 = vsel %vm11787_vm6, nan, %v1361_v48  ;;  %v1456_v13 = vadd.s32 3, %v9148_v57  ;;  %v1528_v9 = vadd.s32 536870912, %v1527_v14  ;;  %v1586_v24 = vsub.s32 32, %v1585_v60 }
 0x1c5   :  { %v1446_v37 = vmul.f32 %v1445_v19, %v1443_v51  ;;  %v1584_v32 = vshrl.u32 %v1583_v15, 5  ;;  %v1588_v29 = vshll.u32 %v11985_v17, %v1585_v60  ;;  %v1591_v43 = vshll.u32 %v11986_v52, %v1585_v60  ;;  %7059 = vst [vmem:[%s11709_s2 + $0x40] sm:$0xff] %v1362_v33  ;;  %7123 = vst [vmem:[%s11709_s2 + $0x240] sm:$0xff] %v1362_v33 }
 0x1c6   :  { %v1529_v39 = vshrl.u32 %v1528_v9, 30  ;;  %v1589_v31 = vshrl.u32 %v11986_v52, %v1586_v24  ;;  %v1592_v46 = vshrl.u32 %v11987_v56, %v1586_v24  ;;  %v1594_v5 = vshll.u32 %v11987_v56, %v1585_v60 }
 0x1c7   :  { %v1447_v15 = vxor.u32 2147483648, %v1446_v37  ;;  %v1595_v40 = vshrl.u32 %v11988_v23, %v1586_v24  ;;  %v1597_v28 = vshll.u32 %v11988_v23, %v1585_v60  ;;  %v1598_v16 = vshrl.u32 %v11989_v27, %v1586_v24 }
 0x1c8   :  { %v1530_v48 = vshll.u32 %v1529_v39, 30  ;;  %v1590_v51 = vor.u32 %v1589_v31, %v1588_v29  ;;  %v1593_v19 = vor.u32 %v1592_v46, %v1591_v43  ;;  %v1600_v35 = vshll.u32 %v11989_v27, %v1585_v60 }
 0x1c9   :  { %v1448_v33 = vsel %vm1365_vm14, %v1447_v15, %v1446_v37  ;;  %vm1469_vm9 = vcmp.lt.s32.totalorder %v8945_v7, 0  ;;  %v1596_v9 = vor.u32 %v1595_v40, %v1594_v5  ;;  %v1599_v53 = vor.u32 %v1598_v16, %v1597_v28 }
 0x1ca   :  { %v1601_v45 = vshrl.u32 %v11990_v22, %v1586_v24  ;;  %v1451_v2 = vsel %vm9114_vm12, %v8747_v26, %v1448_v33  ;;  %v9184_v20 = vand.u32 3, %v1456_v13  ;;  %v9186_v12 = vsub.s32 %v1527_v14, %v1530_v48 }
 0x1cb   :  { %v1579_v29 = vor.u32 8388608, %v1578_v38  ;;  %7586 = vcosq.f32 %v1451_v2  ;;  %vm1603_vm1 = vcmp.lt.s32.totalorder %v1584_v32, 1  ;;  %v1678_v37 = vand.u32 2139095040, %v9055_v47 }
 0x1cc   :  { %v1602_v60 = vor.u32 %v1601_v45, %v1600_v35  ;;  %7588 = vsinq.f32 %v1451_v2  ;;  %v1533_v43 = vsub.s32 0, %v9186_v12  ;;  %vm1604_vm14 = vcmp.lt.s32.totalorder %v1584_v32, 2 }
 0x1cd   :  { %vm1606_vm15 = vcmp.lt.s32.totalorder %v1584_v32, 4  ;;  %vm1605_vm5 = vcmp.lt.s32.totalorder %v1584_v32, 3  ;;  %v1611_v42 = vsel %vm1603_vm1, %v1590_v51, %v1593_v19  ;;  %v1553_v14 = vsub.s32 4, %v1529_v39 }
 0x1ce   :  { %v1608_v31 = vsel %vm1606_vm15, %v1596_v9, 2102212464  ;;  %v1612_v46 = vsel %vm1606_vm15, %v1599_v53, 920167782  ;;  %v7192_v13 = vmin.u32 %v1533_v43, %v9186_v12  ;;  %v1587_v38 = vshrl.u32 %v11985_v17, %v1586_v24 }
 0x1cf   :  { %v1613_v45 = vsel %vm1605_vm5, %v1596_v9, %v1612_v46  ;;  %v1615_v2 = vsel %vm1603_vm1, %v1593_v19, %v1596_v9  ;;  %v1616_v5 = vsel %vm1606_vm15, %v1602_v60, 1326507024  ;;  %v1619_v15 = vshll.u32 %v1579_v29, 8 }
 0x1d0   :  { %v1614_v35 = vsel %vm1604_vm14, %v1611_v42, %v1613_v45  ;;  %v12051_v40 = vand.u32 2147483647, %v8945_v7  ;;  %v1535_v16 = vclz %v7192_v13  ;;  %v1607_v48 = vsel %vm1603_vm1, %v1587_v38, %v1590_v51 }
 0x1d1   :  { %v1609_v33 = vsel %vm1605_vm5, %v1593_v19, %v1608_v31  ;;  %vm1458_vm13 = vcmp.lt.s32.totalorder %v9184_v20, 2  ;;  %v1617_v24 = vsel %vm1605_vm5, %v1599_v53, %v1616_v5  ;;  %v1679_v9 = vshrl.u32 %v1678_v37, 23 }
 0x1d2   :  { %vm9198_vm12 = vcmp.le.f32.partialorder %v12051_v40, 0.7853982  ;;  %v9206_v43 = vmul.u32.u64.low %v1619_v15, %v1614_v35  ;;  %v9207_v42 = vmul.u32.u64.high %v1619_v15, %v1614_v35, %v9206_v43  ;;  %vm1459_vm15 = vcmp.eq.s32.totalorder %v9184_v20, 0 }
 0x1d3   :  { %v7193_v29 = vadd.s32 4294967294, %v1535_v16  ;;  %v1554_v60 = vsel %vm1469_vm9, %v1553_v14, %v1529_v39  ;;  %v1618_v46 = vsel %vm1604_vm14, %v1615_v2, %v1617_v24  ;;  %v1610_v51 = vsel %vm1604_vm14, %v1607_v48, %v1609_v33 }
 0x1d4   :  { %v9215_v19 = vmul.u32.u64.low %v1619_v15, %v1618_v46  ;;  %v9216_v31 = vmul.u32.u64.high %v1619_v15, %v1618_v46, %v9215_v19  ;;  %v7199_v13 = vadd.s32 4294967169, %v1679_v9  ;;  %vm1462_vm1 = vcmp.eq.s32.totalorder %v9184_v20, 2 }
 0x1d5   :  { %v1523_v53 = vadd.s32 %v9107_v50, %v9123_v41  ;;  %vm7194_vm5 = vcmp.lt.s32.totalorder %v7193_v29, 0  ;;  %v11790_v37 = vand.u32 2147483647, %v9055_v47  ;;  %v9222_v38 = vpop.eup %7586  ;;  %v9226_v39 = vsel %vm9198_vm12, 0, %v1554_v60 }
 0x1d6   :  { %12054 = vst [vmem:[#allocation41_spill] sm:$0xff] %v9222_v38  ;;  %v1538_v45 = vsel %vm7194_vm5, 0, %v7193_v29  ;;  %12055 = vst [vmem:[#allocation42_spill] sm:$0xff] %v9226_v39  ;;  %v1629_v32 = vadd.s32 1, %v9207_v42  ;;  %v1685_v14 = vadd.s32 1, %v7199_v13  ;;  %v9229_v35 = vpop.eup %7588  ;;  %v11788_v2 = vxor.u32 2147483648, %v9222_v38 }
 0x1d7   :  { %12056 = vst [vmem:[#allocation43_spill] sm:$0xff] %v9229_v35  ;;  %v1539_v5 = vsub.s32 32, %v1538_v45  ;;  %v1543_v40 = vsub.s32 4294967266, %v1538_v45  ;;  %v1626_v50 = vmul.u32 %v1619_v15, %v1610_v51  ;;  %v11789_v41 = vxor.u32 2147483648, %v9229_v35 }
 0x1d8   :  { %v1540_v16 = vshll.u32 %v9186_v12, %v1538_v45  ;;  %vm1628_vm14 = vc.u32 %v9216_v31, %v9206_v43  ;;  %vm1686_vm5 = vcmp.gt.s32.totalorder %v1685_v14, 0  ;;  %v1464_v48 = vsel %vm1462_vm1, %v11788_v2, %v9229_v35 }
 0x1d9   :  { %v1541_v33 = vshrl.u32 %v1523_v53, %v1539_v5  ;;  %v1544_v24 = vadd.s32 127, %v1543_v40  ;;  %v1630_v9 = vsel %vm1628_vm14, %v1629_v32, %v9207_v42  ;;  %v1461_v12 = vsel %vm1459_vm15, %v9222_v38, %v11789_v41 }
 0x1da   :  { %v1631_v15 = vadd.s32 %v1630_v9, %v1626_v50  ;;  %v1682_v29 = vand.u32 8388607, %v11790_v37  ;;  %v1687_v60 = vsel %vm1686_vm5, %v1685_v14, 0  ;;  %vm11821_vm6 = vweird.f32 %v8747_v26 }
 0x1db   :  { %v1465_v46 = vsel %vm1458_vm13, %v1461_v12, %v1464_v48  ;;  %v1542_v51 = vor.u32 %v1541_v33, %v1540_v16  ;;  %v1545_v19 = vshll.u32 %v1544_v24, 23  ;;  %v9253_v42 = vmul.f32 6.2831855, %v8015_v3 }
 0x1dc   :  { %v1466_v13 = vsel %vm11821_vm6, nan, %v1465_v46  ;;  %v1632_v53 = vadd.s32 536870912, %v1631_v15  ;;  %v1689_v45 = vand.u32 31, %v1687_v60  ;;  %v9258_v32 = vmul.f32 6.2831855, %v8018_v55 }
 0x1dd   :  { %12057 = vst [vmem:[#allocation44_spill] sm:$0xff] %v9253_v42  ;;  %v1546_v5 = vor.u32 4788187, %v1545_v19  ;;  %v9261_v14 = vadd.s32 3, %v9226_v39  ;;  %7060 = vst [vmem:[%s11709_s2 + $0x48] sm:$0xff] %v1466_v13  ;;  %v1683_v20 = vor.u32 8388608, %v1682_v29  ;;  %v1549_v55 = vcvt.s32.f32 %v1542_v51 }
 0x1de   :  { %12058 = vst [vmem:[#allocation45_spill] sm:$0xff] %v9258_v32  ;;  %7124 = vst [vmem:[%s11709_s2 + $0x248] sm:$0xff] %v1466_v13  ;;  %v1633_v3 = vshrl.u32 %v1632_v53, 30  ;;  %v1690_v40 = vsub.s32 32, %v1689_v45  ;;  %v1782_v50 = vand.u32 2139095040, %v9058_v59  ;;  %v9270_v48 = vshrl.u32 %v1687_v60, 5 }
 0x1df   :  { %v1547_v16 = vand.u32 2147483647, %v1546_v5  ;;  %v1692_v33 = vshll.u32 %v11985_v17, %v1689_v45  ;;  %vm1573_vm13 = vcmp.lt.s32.totalorder %v8978_v54, 0  ;;  %v1695_v12 = vshll.u32 %v11986_v52, %v1689_v45 }
 0x1e0   :  { %v1634_v24 = vshll.u32 %v1633_v3, 30  ;;  %v1693_v9 = vshrl.u32 %v11986_v52, %v1690_v40  ;;  %v1698_v46 = vshll.u32 %v11987_v56, %v1689_v45  ;;  %v1696_v29 = vshrl.u32 %v11987_v56, %v1690_v40 }
 0x1e1   :  { %v1550_v19 = vmul.f32 %v1549_v55, %v1547_v16  ;;  %v1699_v13 = vshrl.u32 %v11988_v23, %v1690_v40  ;;  %v1702_v51 = vshrl.u32 %v11989_v27, %v1690_v40  ;;  %v1701_v53 = vshll.u32 %v11988_v23, %v1689_v45 }
 0x1e2   :  { %v9280_v60 = vsub.s32 %v1631_v15, %v1634_v24  ;;  %v1705_v5 = vshrl.u32 %v11990_v22, %v1690_v40  ;;  %v9284_v2 = vshll.u32 %v1683_v20, 8  ;;  %v1694_v37 = vor.u32 %v1693_v9, %v1692_v33 }
 0x1e3   :  { %v1551_v41 = vxor.u32 2147483648, %v1550_v19  ;;  %v1697_v26 = vor.u32 %v1696_v29, %v1695_v12  ;;  %v1700_v38 = vor.u32 %v1699_v13, %v1698_v46  ;;  %v1703_v55 = vor.u32 %v1702_v51, %v1701_v53 }
 0x1e4   :  { %v1637_v16 = vsub.s32 0, %v9280_v60  ;;  %v1704_v35 = vshll.u32 %v11989_v27, %v1689_v45  ;;  %v1783_v25 = vshrl.u32 %v1782_v50, 23  ;;  %v1657_v24 = vsub.s32 4, %v1633_v3 }
 0x1e5   :  { %v1552_v15 = vsel %vm1469_vm9, %v1551_v41, %v1550_v19  ;;  %v1691_v39 = vshrl.u32 %v11985_v17, %v1690_v40  ;;  %vm1707_vm15 = vcmp.lt.s32.totalorder %v9270_v48, 1  ;;  %vm1710_vm1 = vcmp.lt.s32.totalorder %v9270_v48, 4 }
 0x1e6   :  { %v1555_v20 = vsel %vm9198_vm12, %v8945_v7, %v1552_v15  ;;  %v7196_v33 = vmin.u32 %v1637_v16, %v9280_v60  ;;  %v1706_v9 = vor.u32 %v1705_v5, %v1704_v35  ;;  %v1712_v45 = vsel %vm1710_vm1, %v1700_v38, 2102212464 }
 0x1e7   :  { %7590 = vcosq.f32 %v1555_v20  ;;  %v1715_v41 = vsel %vm1707_vm15, %v1694_v37, %v1697_v26  ;;  %v1716_v40 = vsel %vm1710_vm1, %v1703_v55, 920167782  ;;  %vm1708_vm9 = vcmp.lt.s32.totalorder %v9270_v48, 2 }
 0x1e8   :  { %7592 = vsinq.f32 %v1555_v20  ;;  %v1639_v50 = vclz %v7196_v33  ;;  %vm1709_vm12 = vcmp.lt.s32.totalorder %v9270_v48, 3  ;;  %v1658_v28 = vsel %vm1573_vm13, %v1657_v24, %v1633_v3 }
 0x1e9   :  { %v1711_v35 = vsel %vm1707_vm15, %v1691_v39, %v1694_v37  ;;  %v1717_v12 = vsel %vm1709_vm12, %v1700_v38, %v1716_v40  ;;  %v1719_v46 = vsel %vm1707_vm15, %v1697_v26, %v1700_v38  ;;  %v1713_v29 = vsel %vm1709_vm12, %v1697_v26, %v1712_v45 }
 0x1ea   :  { %v7197_v19 = vadd.s32 4294967294, %v1639_v50  ;;  %v1718_v13 = vsel %vm1708_vm9, %v1715_v41, %v1717_v12  ;;  %v1720_v51 = vsel %vm1710_vm1, %v1706_v9, 1326507024  ;;  %v7203_v3 = vadd.s32 4294967169, %v1783_v25 }
 0x1eb   :  { %v1721_v53 = vsel %vm1709_vm12, %v1703_v55, %v1720_v51  ;;  %v9316_v5 = vmul.u32.u64.low %v9284_v2, %v1718_v13  ;;  %v9317_v16 = vmul.u32.u64.high %v9284_v2, %v1718_v13, %v9316_v5  ;;  %v12059_v37 = vand.u32 2147483647, %v8978_v54 }
 0x1ec   :  { %v1627_v26 = vadd.s32 %v9206_v43, %v9216_v31  ;;  %vm7198_vm5 = vcmp.lt.s32.totalorder %v7197_v19, 0  ;;  %v1722_v38 = vsel %vm1708_vm9, %v1719_v46, %v1721_v53  ;;  %v1789_v20 = vadd.s32 1, %v7203_v3 }
 0x1ed   :  { %vm9322_vm14 = vcmp.le.f32.partialorder %v12059_v37, 0.7853982  ;;  %v1642_v55 = vsel %vm7198_vm5, 0, %v7197_v19  ;;  %v9331_v15 = vmul.u32.u64.low %v9284_v2, %v1722_v38  ;;  %v9332_v24 = vmul.u32.u64.high %v9284_v2, %v1722_v38, %v9331_v15 }
 0x1ee   :  { %vm11806_vm15 = vweird.f32 %v8945_v7  ;;  %v1643_v25 = vsub.s32 32, %v1642_v55  ;;  %v1647_v33 = vsub.s32 4294967266, %v1642_v55  ;;  %v9337_v9 = vsel %vm9322_vm14, 0, %v1658_v28 }
 0x1ef   :  { %12062 = vst [vmem:[#allocation46_spill] sm:$0xff] %v9337_v9  ;;  %v1714_v43 = vsel %vm1708_vm9, %v1711_v35, %v1713_v29  ;;  %v1561_v31 = vand.u32 3, %v9261_v14  ;;  %v1733_v45 = vadd.s32 1, %v9317_v16  ;;  %v11801_v41 = vand.u32 2147483647, %v9058_v59 }
 0x1f0   :  { %vm1790_vm1 = vcmp.gt.s32.totalorder %v1789_v20, 0  ;;  %v1644_v40 = vshll.u32 %v9280_v60, %v1642_v55  ;;  %v1645_v50 = vshrl.u32 %v1627_v26, %v1643_v25  ;;  %v1648_v12 = vadd.s32 127, %v1647_v33 }
 0x1f1   :  { %v1791_v46 = vsel %vm1790_vm1, %v1789_v20, 0  ;;  %v9345_v19 = vpop.eup %7590  ;;  %v1664_v28 = vadd.s32 3, %v9337_v9  ;;  %v1730_v13 = vmul.u32 %v9284_v2, %v1714_v43  ;;  %vm1732_vm9 = vc.u32 %v9332_v24, %v9316_v5 }
 0x1f2   :  { %12063 = vst [vmem:[#allocation47_spill] sm:$0xff] %v9345_v19  ;;  %v1793_v14 = vand.u32 31, %v1791_v46  ;;  %v9351_v48 = vpop.eup %7592  ;;  %v11799_v35 = vxor.u32 2147483648, %v9345_v19  ;;  %v1646_v29 = vor.u32 %v1645_v50, %v1644_v40  ;;  %v1649_v51 = vshll.u32 %v1648_v12, 23 }
 0x1f3   :  { %12064 = vst [vmem:[#allocation48_spill] sm:$0xff] %v9351_v48  ;;  %v1734_v60 = vsel %vm1732_vm9, %v1733_v45, %v9317_v16  ;;  %v11800_v53 = vxor.u32 2147483648, %v9351_v48  ;;  %vm1566_vm12 = vcmp.eq.s32.totalorder %v1561_v31, 2  ;;  %vm1562_vm5 = vcmp.lt.s32.totalorder %v1561_v31, 2 }
 0x1f4   :  { %v1735_v3 = vadd.s32 %v1734_v60, %v1730_v13  ;;  %v1794_v37 = vsub.s32 32, %v1793_v14  ;;  %vm1563_vm1 = vcmp.eq.s32.totalorder %v1561_v31, 0  ;;  %v1568_v2 = vsel %vm1566_vm12, %v11799_v35, %v9351_v48 }
 0x1f5   :  { %v1650_v26 = vor.u32 4788187, %v1649_v51  ;;  %v1565_v38 = vsel %vm1563_vm1, %v9345_v19, %v11800_v53  ;;  %v9362_v55 = vand.u32 3, %v1664_v28  ;;  %v1786_v16 = vand.u32 8388607, %v11801_v41 }
 0x1f6   :  { %v1736_v15 = vadd.s32 536870912, %v1735_v3  ;;  %v1569_v20 = vsel %vm1562_vm5, %v1565_v38, %v1568_v2  ;;  %v1653_v33 = vcvt.s32.f32 %v1646_v29  ;;  %v1797_v43 = vshrl.u32 %v11986_v52, %v1794_v37 }
 0x1f7   :  { %v1651_v25 = vand.u32 2147483647, %v1650_v26  ;;  %v1570_v31 = vsel %vm11806_vm15, nan, %v1569_v20  ;;  %v1800_v40 = vshrl.u32 %v11987_v56, %v1794_v37  ;;  %v1803_v50 = vshrl.u32 %v11988_v23, %v1794_v37 }
 0x1f8   :  { %v1737_v45 = vshrl.u32 %v1736_v15, 30  ;;  %vm1677_vm9 = vcmp.lt.s32.totalorder %v9055_v47, 0  ;;  %v1792_v28 = vshrl.u32 %v1791_v46, 5  ;;  %v1805_v13 = vshll.u32 %v11988_v23, %v1793_v14  ;;  %7061 = vst [vmem:[%s11709_s2 + $0x50] sm:$0xff] %v1570_v31  ;;  %7125 = vst [vmem:[%s11709_s2 + $0x250] sm:$0xff] %v1570_v31 }
 0x1f9   :  { %v1654_v12 = vmul.f32 %v1653_v33, %v1651_v25  ;;  %v1806_v51 = vshrl.u32 %v11989_v27, %v1794_v37  ;;  %v1796_v60 = vshll.u32 %v11985_v17, %v1793_v14  ;;  %v1799_v2 = vshll.u32 %v11986_v52, %v1793_v14 }
 0x1fa   :  { %v1738_v29 = vshll.u32 %v1737_v45, 30  ;;  %v1802_v26 = vshll.u32 %v11987_v56, %v1793_v14  ;;  %v1808_v15 = vshll.u32 %v11989_v27, %v1793_v14  ;;  %v1809_v20 = vshrl.u32 %v11990_v22, %v1794_v37 }
 0x1fb   :  { %v1655_v46 = vxor.u32 2147483648, %v1654_v12  ;;  %v1807_v38 = vor.u32 %v1806_v51, %v1805_v13  ;;  %v12065_v25 = vand.u32 2147483647, %v9055_v47  ;;  %v1798_v35 = vor.u32 %v1797_v43, %v1796_v60 }
 0x1fc   :  { %v9391_v31 = vsub.s32 %v1735_v3, %v1738_v29  ;;  %v1801_v53 = vor.u32 %v1800_v40, %v1799_v2  ;;  %v1804_v41 = vor.u32 %v1803_v50, %v1802_v26  ;;  %v1787_v9 = vor.u32 8388608, %v1786_v16 }
 0x1fd   :  { %vm9387_vm12 = vcmp.le.f32.partialorder %v12065_v25, 0.7853982  ;;  %v1656_v7 = vsel %vm1573_vm13, %v1655_v46, %v1654_v12  ;;  %v1810_v13 = vor.u32 %v1809_v20, %v1808_v15  ;;  %v1886_v14 = vand.u32 2139095040, %v9253_v42 }
 0x1fe   :  { %v1659_v51 = vsel %vm9322_vm14, %v8978_v54, %v1656_v7  ;;  %v1741_v25 = vsub.s32 0, %v9391_v31  ;;  %v1761_v19 = vsub.s32 4, %v1737_v45  ;;  %vm1814_vm5 = vcmp.lt.s32.totalorder %v1792_v28, 4 }
 0x1ff   :  { %7594 = vcosq.f32 %v1659_v51  ;;  %vm1811_vm1 = vcmp.lt.s32.totalorder %v1792_v28, 1  ;;  %vm1813_vm15 = vcmp.lt.s32.totalorder %v1792_v28, 3  ;;  %v1820_v3 = vsel %vm1814_vm5, %v1807_v38, 920167782 }
 0x200   :  { %7596 = vsinq.f32 %v1659_v51  ;;  %v7200_v43 = vmin.u32 %v1741_v25, %v9391_v31  ;;  %v1816_v40 = vsel %vm1814_vm5, %v1804_v41, 2102212464  ;;  %v1819_v16 = vsel %vm1811_vm1, %v1798_v35, %v1801_v53 }
 0x201   :  { %v1795_v50 = vshrl.u32 %v11985_v17, %v1794_v37  ;;  %v1821_v12 = vsel %vm1813_vm15, %v1804_v41, %v1820_v3  ;;  %v1823_v29 = vsel %vm1811_vm1, %v1801_v53, %v1804_v41  ;;  %v1824_v39 = vsel %vm1814_vm5, %v1810_v13, 1326507024 }
 0x202   :  { %v1743_v7 = vclz %v7200_v43  ;;  %v1762_v60 = vsel %vm1677_vm9, %v1761_v19, %v1737_v45  ;;  %vm1812_vm13 = vcmp.lt.s32.totalorder %v1792_v28, 2  ;;  %v1827_v2 = vshll.u32 %v1787_v9, 8 }
 0x203   :  { %v1815_v26 = vsel %vm1811_vm1, %v1795_v50, %v1798_v35  ;;  %v1817_v46 = vsel %vm1813_vm15, %v1801_v53, %v1816_v40  ;;  %v1822_v15 = vsel %vm1812_vm13, %v1819_v16, %v1821_v12  ;;  %v1825_v20 = vsel %vm1813_vm15, %v1807_v38, %v1824_v39 }
 0x204   :  { %v7201_v51 = vadd.s32 4294967294, %v1743_v7  ;;  %v1826_v25 = vsel %vm1812_vm13, %v1823_v29, %v1825_v20  ;;  %v9407_v48 = vmul.u32.u64.low %v1827_v2, %v1822_v15  ;;  %v9408_v37 = vmul.u32.u64.high %v1827_v2, %v1822_v15, %v9407_v48 }
 0x205   :  { %v9413_v41 = vsel %vm9387_vm12, 0, %v1762_v60  ;;  %v9415_v13 = vmul.u32.u64.low %v1827_v2, %v1826_v25  ;;  %v9416_v19 = vmul.u32.u64.high %v1827_v2, %v1826_v25, %v9415_v13  ;;  %v1887_v9 = vshrl.u32 %v1886_v14, 23 }
 0x206   :  { %vm1667_vm14 = vcmp.eq.s32.totalorder %v9362_v55, 0  ;;  %vm1670_vm5 = vcmp.eq.s32.totalorder %v9362_v55, 2  ;;  %vm7202_vm1 = vcmp.lt.s32.totalorder %v7201_v51, 0  ;;  %v1818_v35 = vsel %vm1812_vm13, %v1815_v26, %v1817_v46 }
 0x207   :  { %v1731_v53 = vadd.s32 %v9316_v5, %v9332_v24  ;;  %v1746_v45 = vsel %vm7202_vm1, 0, %v7201_v51  ;;  %v11811_v28 = vand.u32 2147483647, %v9253_v42  ;;  %v7207_v38 = vadd.s32 4294967169, %v1887_v9 }
 0x208   :  { %v1747_v3 = vsub.s32 32, %v1746_v45  ;;  %v1751_v43 = vsub.s32 4294967266, %v1746_v45  ;;  %v1768_v40 = vadd.s32 3, %v9413_v41  ;;  %v1837_v16 = vadd.s32 1, %v9408_v37 }
 0x209   :  { %v9425_v14 = vpop.eup %7594  ;;  %v1748_v50 = vshll.u32 %v9391_v31, %v1746_v45  ;;  %v1834_v12 = vmul.u32 %v1827_v2, %v1818_v35  ;;  %vm1836_vm15 = vc.u32 %v9416_v19, %v9407_v48  ;;  %v1893_v29 = vadd.s32 1, %v7207_v38 }
 0x20a   :  { %12068 = vst [vmem:[#allocation49_spill] sm:$0xff] %v9425_v14  ;;  %v9430_v5 = vpop.eup %7596  ;;  %v11809_v24 = vxor.u32 2147483648, %v9425_v14  ;;  %v1749_v39 = vshrl.u32 %v1731_v53, %v1747_v3  ;;  %v1752_v7 = vadd.s32 127, %v1751_v43  ;;  %v1838_v60 = vsel %vm1836_vm15, %v1837_v16, %v9408_v37 }
 0x20b   :  { %v11810_v26 = vxor.u32 2147483648, %v9430_v5  ;;  %v1839_v46 = vadd.s32 %v1838_v60, %v1834_v12  ;;  %v1890_v15 = vand.u32 8388607, %v11811_v28  ;;  %vm1894_vm13 = vcmp.gt.s32.totalorder %v1893_v29, 0 }
 0x20c   :  { %v1672_v31 = vsel %vm1670_vm5, %v11809_v24, %v9430_v5  ;;  %v1750_v2 = vor.u32 %v1749_v39, %v1748_v50  ;;  %v1753_v20 = vshll.u32 %v1752_v7, 23  ;;  %v1895_v51 = vsel %vm1894_vm13, %v1893_v29, 0 }
 0x20d   :  { %vm1666_vm1 = vcmp.lt.s32.totalorder %v9362_v55, 2  ;;  %v1669_v25 = vsel %vm1667_vm14, %v9425_v14, %v11810_v26  ;;  %v1840_v37 = vadd.s32 536870912, %v1839_v46  ;;  %v1897_v13 = vand.u32 31, %v1895_v51 }
 0x20e   :  { %vm11813_vm15 = vweird.f32 %v8978_v54  ;;  %v1673_v9 = vsel %vm1666_vm1, %v1669_v25, %v1672_v31  ;;  %v1754_v35 = vor.u32 4788187, %v1753_v20  ;;  %v1891_v38 = vor.u32 8388608, %v1890_v15 }
 0x20f   :  { %v1674_v53 = vsel %vm11813_vm15, nan, %v1673_v9  ;;  %v9451_v45 = vshrl.u32 %v1840_v37, 30  ;;  %v1898_v3 = vsub.s32 32, %v1897_v13  ;;  %v1757_v16 = vcvt.s32.f32 %v1750_v2 }
 0x210   :  { %v1755_v43 = vand.u32 2147483647, %v1754_v35  ;;  %v9453_v50 = vand.u32 3, %v1768_v40  ;;  %7062 = vst [vmem:[%s11709_s2 + $0x58] sm:$0xff] %v1674_v53  ;;  %7126 = vst [vmem:[%s11709_s2 + $0x258] sm:$0xff] %v1674_v53  ;;  %v1900_v12 = vshll.u32 %v11985_v17, %v1897_v13  ;;  %v1990_v39 = vand.u32 2139095040, %v9258_v32 }
 0x211   :  { %v1842_v55 = vshll.u32 %v9451_v45, 30  ;;  %v1901_v29 = vshrl.u32 %v11986_v52, %v1898_v3  ;;  %v1904_v40 = vshrl.u32 %v11987_v56, %v1898_v3  ;;  %v1907_v60 = vshrl.u32 %v11988_v23, %v1898_v3 }
 0x212   :  { %v1758_v7 = vmul.f32 %v1757_v16, %v1755_v43  ;;  %v1910_v15 = vshrl.u32 %v11989_v27, %v1898_v3  ;;  %v1896_v2 = vshrl.u32 %v1895_v51, 5  ;;  %v1903_v20 = vshll.u32 %v11986_v52, %v1897_v13 }
 0x213   :  { %v9468_v31 = vsub.s32 %v1839_v46, %v1842_v55  ;;  %v9471_v25 = vshll.u32 %v1891_v38, 8  ;;  %v1902_v9 = vor.u32 %v1901_v29, %v1900_v12  ;;  %v1906_v35 = vshll.u32 %v11987_v56, %v1897_v13 }
 0x214   :  { %v1759_v37 = vxor.u32 2147483648, %v1758_v7  ;;  %v1909_v53 = vshll.u32 %v11988_v23, %v1897_v13  ;;  %v1905_v16 = vor.u32 %v1904_v40, %v1903_v20  ;;  %v1912_v24 = vshll.u32 %v11989_v27, %v1897_v13 }
 0x215   :  { %v1845_v43 = vsub.s32 0, %v9468_v31  ;;  %v1913_v26 = vshrl.u32 %v11990_v22, %v1898_v3  ;;  %vm1781_vm14 = vcmp.lt.s32.totalorder %v9058_v59, 0  ;;  %v1908_v51 = vor.u32 %v1907_v60, %v1906_v35 }
 0x216   :  { %v1760_v46 = vsel %vm1677_vm9, %v1759_v37, %v1758_v7  ;;  %v1911_v38 = vor.u32 %v1910_v15, %v1909_v53  ;;  %v1991_v55 = vshrl.u32 %v1990_v39, 23  ;;  %v1865_v40 = vsub.s32 4, %v9451_v45 }
 0x217   :  { %v1763_v12 = vsel %vm9387_vm12, %v9055_v47, %v1760_v46  ;;  %v7204_v29 = vmin.u32 %v1845_v43, %v9468_v31  ;;  %v1914_v20 = vor.u32 %v1913_v26, %v1912_v24  ;;  %v1899_v13 = vshrl.u32 %v11985_v17, %v1898_v3 }
 0x218   :  { %7598 = vcosq.f32 %v1763_v12  ;;  %vm1915_vm5 = vcmp.lt.s32.totalorder %v1896_v2, 1  ;;  %vm1916_vm13 = vcmp.lt.s32.totalorder %v1896_v2, 2  ;;  %vm1918_vm9 = vcmp.lt.s32.totalorder %v1896_v2, 4 }
 0x219   :  { %7600 = vsinq.f32 %v1763_v12  ;;  %v1847_v7 = vclz %v7204_v29  ;;  %v1923_v60 = vsel %vm1915_vm5, %v1902_v9, %v1905_v16  ;;  %vm1917_vm1 = vcmp.lt.s32.totalorder %v1896_v2, 3 }
 0x21a   :  { %v1920_v39 = vsel %vm1918_vm9, %v1908_v51, 2102212464  ;;  %v1924_v15 = vsel %vm1918_vm9, %v1911_v38, 920167782  ;;  %v1927_v37 = vsel %vm1915_vm5, %v1905_v16, %v1908_v51  ;;  %v1919_v35 = vsel %vm1915_vm5, %v1899_v13, %v1902_v9 }
 0x21b   :  { %v7205_v33 = vadd.s32 4294967294, %v1847_v7  ;;  %v1925_v53 = vsel %vm1917_vm1, %v1908_v51, %v1924_v15  ;;  %v1928_v43 = vsel %vm1918_vm9, %v1914_v20, 1326507024  ;;  %v1921_v46 = vsel %vm1917_vm1, %v1905_v16, %v1920_v39 }
 0x21c   :  { %v1926_v24 = vsel %vm1916_vm13, %v1923_v60, %v1925_v53  ;;  %v1929_v26 = vsel %vm1917_vm1, %v1911_v38, %v1928_v43  ;;  %v7211_v28 = vadd.s32 4294967169, %v1991_v55  ;;  %v1835_v54 = vadd.s32 %v9407_v48, %v9416_v19 }
 0x21d   :  { %vm7206_vm12 = vcmp.lt.s32.totalorder %v7205_v33, 0  ;;  %v1930_v3 = vsel %vm1916_vm13, %v1927_v37, %v1929_v26  ;;  %v9490_v12 = vmul.u32.u64.low %v9471_v25, %v1926_v24  ;;  %v9491_v29 = vmul.u32.u64.high %v9471_v25, %v1926_v24, %v9490_v12 }
 0x21e   :  { %v1850_v7 = vsel %vm7206_vm12, 0, %v7205_v33  ;;  %v9497_v9 = vmul.u32.u64.low %v9471_v25, %v1930_v3  ;;  %v9498_v51 = vmul.u32.u64.high %v9471_v25, %v1930_v3, %v9497_v9  ;;  %v1866_v38 = vsel %vm1781_vm14, %v1865_v40, %v9451_v45 }
 0x21f   :  { %v1851_v16 = vsub.s32 32, %v1850_v7  ;;  %v1855_v20 = vsub.s32 4294967266, %v1850_v7  ;;  %v1922_v55 = vsel %vm1916_vm13, %v1919_v35, %v1921_v46  ;;  %vm1771_vm5 = vcmp.eq.s32.totalorder %v9453_v50, 0 }
 0x220   :  { %v12069_v13 = vand.u32 2147483647, %v9058_v59  ;;  %v11816_v48 = vand.u32 2147483647, %v9258_v32  ;;  %v1997_v19 = vadd.s32 1, %v7211_v28  ;;  %v1852_v39 = vshll.u32 %v9468_v31, %v1850_v7 }
 0x221   :  { %v1853_v15 = vshrl.u32 %v1835_v54, %v1851_v16  ;;  %v1856_v37 = vadd.s32 127, %v1855_v20  ;;  %v1941_v33 = vadd.s32 1, %v9491_v29  ;;  %v1938_v40 = vmul.u32 %v9471_v25, %v1922_v55 }
 0x222   :  { %vm9507_vm9 = vcmp.le.f32.partialorder %v12069_v13, 0.7853982  ;;  %v9514_v45 = vpop.eup %7598  ;;  %vm1940_vm13 = vc.u32 %v9498_v51, %v9490_v12  ;;  %vm1998_vm1 = vcmp.gt.s32.totalorder %v1997_v19, 0  ;;  %vm1774_vm12 = vcmp.eq.s32.totalorder %v9453_v50, 2 }
 0x223   :  { %12072 = vst [vmem:[#allocation50_spill] sm:$0xff] %v9514_v45  ;;  %v9518_v2 = vsel %vm9507_vm9, 0, %v1866_v38  ;;  %v9523_v35 = vpop.eup %7600  ;;  %v11814_v28 = vxor.u32 2147483648, %v9514_v45  ;;  %v1854_v54 = vor.u32 %v1853_v15, %v1852_v39  ;;  %v1857_v31 = vshll.u32 %v1856_v37, 23 }
 0x224   :  { %12073 = vst [vmem:[#allocation51_spill] sm:$0xff] %v9523_v35  ;;  %v1942_v53 = vsel %vm1940_vm13, %v1941_v33, %v9491_v29  ;;  %v11815_v43 = vxor.u32 2147483648, %v9523_v35  ;;  %v1999_v24 = vsel %vm1998_vm1, %v1997_v19, 0  ;;  %v1872_v3 = vadd.s32 3, %v9518_v2 }
 0x225   :  { %v1943_v46 = vadd.s32 %v1942_v53, %v1938_v40  ;;  %v1776_v25 = vsel %vm1774_vm12, %v11814_v28, %v9523_v35  ;;  %v1858_v26 = vor.u32 4788187, %v1857_v31  ;;  %v1994_v7 = vand.u32 8388607, %v11816_v48 }
 0x226   :  { %vm1770_vm15 = vcmp.lt.s32.totalorder %v9453_v50, 2  ;;  %v1773_v29 = vsel %vm1771_vm5, %v9514_v45, %v11815_v43  ;;  %v2001_v16 = vand.u32 31, %v1999_v24  ;;  %vm11820_vm13 = vweird.f32 %v9055_v47 }
 0x227   :  { %v1944_v9 = vadd.s32 536870912, %v1943_v46  ;;  %v1777_v20 = vsel %vm1770_vm15, %v1773_v29, %v1776_v25  ;;  %v1859_v38 = vand.u32 2147483647, %v1858_v26  ;;  %v1861_v55 = vcvt.s32.f32 %v1854_v54 }
 0x228   :  { %v9543_v13 = vmul.f32 6.2831855, %v7992_v61  ;;  %v1778_v19 = vsel %vm11820_vm13, nan, %v1777_v20  ;;  %v2002_v15 = vsub.s32 32, %v2001_v16  ;;  %v9550_v37 = vmul.f32 6.2831855, %v7994_v62 }
 0x229   :  { %v9547_v39 = vshrl.u32 %v1944_v9, 30  ;;  %v1862_v50 = vmul.f32 %v1861_v55, %v1859_v38  ;;  %v9552_v33 = vand.u32 3, %v1872_v3  ;;  %v1995_v40 = vor.u32 8388608, %v1994_v7  ;;  %7063 = vst [vmem:[%s11709_s2 + $0x60] sm:$0xff] %v1778_v19  ;;  %7127 = vst [vmem:[%s11709_s2 + $0x260] sm:$0xff] %v1778_v19 }
 0x22a   :  { %12074 = vst [vmem:[#allocation52_spill] sm:$0xff] %v9543_v13  ;;  %12075 = vst [vmem:[#allocation53_spill] sm:$0xff] %v9550_v37  ;;  %v2004_v54 = vshll.u32 %v11985_v17, %v2001_v16  ;;  %v2005_v31 = vshrl.u32 %v11986_v52, %v2002_v15  ;;  %v2007_v62 = vshll.u32 %v11986_v52, %v2001_v16  ;;  %v2000_v29 = vshrl.u32 %v1999_v24, 5 }
 0x22b   :  { %v1946_v61 = vshll.u32 %v9547_v39, 30  ;;  %v1863_v53 = vxor.u32 2147483648, %v1862_v50  ;;  %v2008_v25 = vshrl.u32 %v11987_v56, %v2002_v15  ;;  %v2011_v26 = vshrl.u32 %v11988_v23, %v2002_v15 }
 0x22c   :  { %v2014_v3 = vshrl.u32 %v11989_v27, %v2002_v15  ;;  %v2010_v9 = vshll.u32 %v11987_v56, %v2001_v16  ;;  %v2013_v20 = vshll.u32 %v11988_v23, %v2001_v16  ;;  %v2006_v55 = vor.u32 %v2005_v31, %v2004_v54 }
 0x22d   :  { %v9567_v7 = vsub.s32 %v1943_v46, %v1946_v61  ;;  %v1864_v38 = vsel %vm1781_vm14, %v1863_v53, %v1862_v50  ;;  %v2009_v19 = vor.u32 %v2008_v25, %v2007_v62  ;;  %v9573_v28 = vshll.u32 %v1995_v40, 8 }
 0x22e   :  { %v1867_v43 = vsel %vm9507_vm9, %v9058_v59, %v1864_v38  ;;  %v2012_v46 = vor.u32 %v2011_v26, %v2010_v9  ;;  %v2015_v61 = vor.u32 %v2014_v3, %v2013_v20  ;;  %v2016_v24 = vshll.u32 %v11989_v27, %v2001_v16 }
 0x22f   :  { %v1949_v48 = vsub.s32 0, %v9567_v7  ;;  %7602 = vcosq.f32 %v1867_v43  ;;  %v2017_v47 = vshrl.u32 %v11990_v22, %v2002_v15  ;;  %v2094_v45 = vand.u32 2139095040, %v9543_v13 }
 0x230   :  { %7604 = vsinq.f32 %v1867_v43  ;;  %vm1885_vm15 = vcmp.lt.s32.totalorder %v9253_v42, 0  ;;  %vm2019_vm14 = vcmp.lt.s32.totalorder %v2000_v29, 1  ;;  %vm2022_vm5 = vcmp.lt.s32.totalorder %v2000_v29, 4 }
 0x231   :  { %v7208_v50 = vmin.u32 %v1949_v48, %v9567_v7  ;;  %v2018_v60 = vor.u32 %v2017_v47, %v2016_v24  ;;  %vm2020_vm9 = vcmp.lt.s32.totalorder %v2000_v29, 2  ;;  %v2027_v40 = vsel %vm2019_vm14, %v2006_v55, %v2009_v19 }
 0x232   :  { %v2028_v54 = vsel %vm2022_vm5, %v2015_v61, 920167782  ;;  %v2003_v62 = vshrl.u32 %v11985_v17, %v2002_v15  ;;  %vm2021_vm1 = vcmp.lt.s32.totalorder %v2000_v29, 3  ;;  %v2024_v16 = vsel %vm2022_vm5, %v2012_v46, 2102212464 }
 0x233   :  { %v1951_v31 = vclz %v7208_v50  ;;  %v1969_v53 = vsub.s32 4, %v9547_v39  ;;  %v2029_v25 = vsel %vm2021_vm1, %v2012_v46, %v2028_v54  ;;  %v2031_v26 = vsel %vm2019_vm14, %v2009_v19, %v2012_v46 }
 0x234   :  { %v2032_v43 = vsel %vm2022_vm5, %v2018_v60, 1326507024  ;;  %v2023_v9 = vsel %vm2019_vm14, %v2003_v62, %v2006_v55  ;;  %v2030_v48 = vsel %vm2020_vm9, %v2027_v40, %v2029_v25  ;;  %v2025_v38 = vsel %vm2021_vm1, %v2009_v19, %v2024_v16 }
 0x235   :  { %v7209_v3 = vadd.s32 4294967294, %v1951_v31  ;;  %v2033_v20 = vsel %vm2021_vm1, %v2015_v61, %v2032_v43  ;;  %v9589_v24 = vmul.u32.u64.low %v9573_v28, %v2030_v48  ;;  %v9590_v50 = vmul.u32.u64.high %v9573_v28, %v2030_v48, %v9589_v24 }
 0x236   :  { %v2034_v47 = vsel %vm2020_vm9, %v2031_v26, %v2033_v20  ;;  %vm11832_vm12 = vweird.f32 %v9058_v59  ;;  %v2095_v60 = vshrl.u32 %v2094_v45, 23  ;;  %vm1875_vm14 = vcmp.eq.s32.totalorder %v9552_v33, 0 }
 0x237   :  { %vm7210_vm13 = vcmp.lt.s32.totalorder %v7209_v3, 0  ;;  %v9595_v15 = vmul.u32.u64.low %v9573_v28, %v2034_v47  ;;  %v9596_v46 = vmul.u32.u64.high %v9573_v28, %v2034_v47, %v9595_v15  ;;  %v12076_v55 = vand.u32 2147483647, %v9253_v42 }
 0x238   :  { %v1939_v61 = vadd.s32 %v9490_v12, %v9498_v51  ;;  %v1954_v40 = vsel %vm7210_vm13, 0, %v7209_v3  ;;  %v2026_v62 = vsel %vm2020_vm9, %v2023_v9, %v2025_v38  ;;  %v7215_v16 = vadd.s32 4294967169, %v2095_v60 }
 0x239   :  { %vm9601_vm5 = vcmp.le.f32.partialorder %v12076_v55, 0.7853982  ;;  %v1955_v54 = vsub.s32 32, %v1954_v40  ;;  %v1959_v31 = vsub.s32 4294967266, %v1954_v40  ;;  %v9608_v25 = vpop.eup %7602  ;;  %vm1878_vm1 = vcmp.eq.s32.totalorder %v9552_v33, 2 }
 0x23a   :  { %12079 = vst [vmem:[#allocation54_spill] sm:$0xff] %v9608_v25  ;;  %v1970_v45 = vsel %vm1885_vm15, %v1969_v53, %v9547_v39  ;;  %v2045_v26 = vadd.s32 1, %v9590_v50  ;;  %v11824_v43 = vand.u32 2147483647, %v9543_v13  ;;  %v9616_v48 = vpop.eup %7604  ;;  %v11822_v12 = vxor.u32 2147483648, %v9608_v25 }
 0x23b   :  { %12080 = vst [vmem:[#allocation55_spill] sm:$0xff] %v9616_v48  ;;  %v1956_v51 = vshll.u32 %v9567_v7, %v1954_v40  ;;  %v1957_v29 = vshrl.u32 %v1939_v61, %v1955_v54  ;;  %v1960_v3 = vadd.s32 127, %v1959_v31  ;;  %v11823_v9 = vxor.u32 2147483648, %v9616_v48 }
 0x23c   :  { %v2042_v20 = vmul.u32 %v9573_v28, %v2026_v62  ;;  %vm2044_vm13 = vc.u32 %v9596_v46, %v9589_v24  ;;  %v2101_v39 = vadd.s32 1, %v7215_v16  ;;  %v1880_v53 = vsel %vm1878_vm1, %v11822_v12, %v9616_v48 }
 0x23d   :  { %v1958_v38 = vor.u32 %v1957_v29, %v1956_v51  ;;  %v1961_v47 = vshll.u32 %v1960_v3, 23  ;;  %v2046_v15 = vsel %vm2044_vm13, %v2045_v26, %v9590_v50  ;;  %vm1874_vm9 = vcmp.lt.s32.totalorder %v9552_v33, 2 }
 0x23e   :  { %v1877_v28 = vsel %vm1875_vm14, %v9608_v25, %v11823_v9  ;;  %v2047_v7 = vadd.s32 %v2046_v15, %v2042_v20  ;;  %vm2102_vm6 = vcmp.gt.s32.totalorder %v2101_v39, 0  ;;  %v2098_v61 = vand.u32 8388607, %v11824_v43 }
 0x23f   :  { %v1881_v60 = vsel %vm1874_vm9, %v1877_v28, %v1880_v53  ;;  %v1962_v55 = vor.u32 4788187, %v1961_v47  ;;  %v2103_v40 = vsel %vm2102_vm6, %v2101_v39, 0  ;;  %v9640_v50 = vsel %vm9601_vm5, 0, %v1970_v45 }
 0x240   :  { %v1882_v54 = vsel %vm11832_vm12, nan, %v1881_v60  ;;  %v2048_v31 = vadd.s32 536870912, %v2047_v7  ;;  %v2105_v62 = vand.u32 31, %v2103_v40  ;;  %v1965_v33 = vcvt.s32.f32 %v1958_v38 }
 0x241   :  { %v1963_v16 = vand.u32 2147483647, %v1962_v55  ;;  %7064 = vst [vmem:[%s11709_s2 + $0x68] sm:$0xff] %v1882_v54  ;;  %7128 = vst [vmem:[%s11709_s2 + $0x268] sm:$0xff] %v1882_v54  ;;  %v9649_v26 = vmul.f32 6.2831855, %v7996_v63  ;;  %vm11875_vm12 = vweird.f32 %v9253_v42 }
 0x242   :  { %v9652_v51 = vmul.f32 6.2831855, %v7998_v0  ;;  %v9654_v45 = vshrl.u32 %v2048_v31, 30  ;;  %v2106_v29 = vsub.s32 32, %v2105_v62  ;;  %v1976_v20 = vadd.s32 3, %v9640_v50 }
 0x243   :  { %12081 = vst [vmem:[#allocation56_spill] sm:$0xff] %v9649_v26  ;;  %v1966_v3 = vmul.f32 %v1965_v33, %v1963_v16  ;;  %v2099_v39 = vor.u32 8388608, %v2098_v61  ;;  %v2198_v53 = vand.u32 2139095040, %v9550_v37  ;;  %v2104_v47 = vshrl.u32 %v2103_v40, 5 }
 0x244   :  { %12082 = vst [vmem:[#allocation57_spill] sm:$0xff] %v9652_v51  ;;  %v2050_v38 = vshll.u32 %v9654_v45, 30  ;;  %v2108_v15 = vshll.u32 %v11985_v17, %v2105_v62  ;;  %v2109_v63 = vshrl.u32 %v11986_v52, %v2106_v29  ;;  %v2112_v0 = vshrl.u32 %v11987_v56, %v2106_v29 }
 0x245   :  { %v1967_v28 = vxor.u32 2147483648, %v1966_v3  ;;  %v2115_v60 = vshrl.u32 %v11988_v23, %v2106_v29  ;;  %v2118_v55 = vshrl.u32 %v11989_v27, %v2106_v29  ;;  %v2111_v61 = vshll.u32 %v11986_v52, %v2105_v62 }
 0x246   :  { %v9664_v54 = vsub.s32 %v2047_v7, %v2050_v38  ;;  %v2114_v31 = vshll.u32 %v11987_v56, %v2105_v62  ;;  %v2121_v16 = vshrl.u32 %v11990_v22, %v2106_v29  ;;  %v2110_v33 = vor.u32 %v2109_v63, %v2108_v15 }
 0x247   :  { %v1968_v40 = vsel %vm1885_vm15, %v1967_v28, %v1966_v3  ;;  %v2117_v12 = vshll.u32 %v11988_v23, %v2105_v62  ;;  %v2120_v9 = vshll.u32 %v11989_v27, %v2105_v62  ;;  %v2113_v38 = vor.u32 %v2112_v0, %v2111_v61 }
 0x248   :  { %v1971_v43 = vsel %vm9601_vm5, %v9253_v42, %v1968_v40  ;;  %v2053_v7 = vsub.s32 0, %v9664_v54  ;;  %v2116_v59 = vor.u32 %v2115_v60, %v2114_v31  ;;  %v9677_v25 = vand.u32 3, %v1976_v20 }
 0x249   :  { %7606 = vcosq.f32 %v1971_v43  ;;  %v2119_v48 = vor.u32 %v2118_v55, %v2117_v12  ;;  %v2122_v35 = vor.u32 %v2121_v16, %v2120_v9  ;;  %vm1989_vm6 = vcmp.lt.s32.totalorder %v9258_v32, 0 }
 0x24a   :  { %7608 = vsinq.f32 %v1971_v43  ;;  %v7212_v3 = vmin.u32 %v2053_v7, %v9664_v54  ;;  %v2139_v15 = vshll.u32 %v2099_v39, 8  ;;  %v2199_v62 = vshrl.u32 %v2198_v53, 23 }
 0x24b   :  { %v2107_v63 = vshrl.u32 %v11985_v17, %v2106_v29  ;;  %vm2123_vm15 = vcmp.lt.s32.totalorder %v2104_v47, 1  ;;  %vm2124_vm14 = vcmp.lt.s32.totalorder %v2104_v47, 2  ;;  %vm2125_vm5 = vcmp.lt.s32.totalorder %v2104_v47, 3 }
 0x24c   :  { %v2055_v19 = vclz %v7212_v3  ;;  %vm2126_vm1 = vcmp.lt.s32.totalorder %v2104_v47, 4  ;;  %v2131_v28 = vsel %vm2123_vm15, %v2110_v33, %v2113_v38  ;;  %v2135_v0 = vsel %vm2123_vm15, %v2113_v38, %v2116_v59 }
 0x24d   :  { %v2127_v20 = vsel %vm2123_vm15, %v2107_v63, %v2110_v33  ;;  %v2128_v60 = vsel %vm2126_vm1, %v2116_v59, 2102212464  ;;  %v2132_v12 = vsel %vm2126_vm1, %v2119_v48, 920167782  ;;  %v2136_v9 = vsel %vm2126_vm1, %v2122_v35, 1326507024 }
 0x24e   :  { %v12083_v43 = vand.u32 2147483647, %v9258_v32  ;;  %v7213_v39 = vadd.s32 4294967294, %v2055_v19  ;;  %v2129_v53 = vsel %vm2125_vm5, %v2113_v38, %v2128_v60  ;;  %v2133_v29 = vsel %vm2125_vm5, %v2116_v59, %v2132_v12 }
 0x24f   :  { %v2137_v61 = vsel %vm2125_vm5, %v2119_v48, %v2136_v9  ;;  %vm1978_vm9 = vcmp.lt.s32.totalorder %v9677_v25, 2  ;;  %v2073_v31 = vsub.s32 4, %v9654_v45  ;;  %v2134_v16 = vsel %vm2124_vm14, %v2131_v28, %v2133_v29 }
 0x250   :  { %vm9684_vm13 = vcmp.le.f32.partialorder %v12083_v43, 0.7853982  ;;  %v2138_v40 = vsel %vm2124_vm14, %v2135_v0, %v2137_v61  ;;  %v7219_v33 = vadd.s32 4294967169, %v2199_v62  ;;  %vm7214_vm15 = vcmp.lt.s32.totalorder %v7213_v39, 0 }
 0x251   :  { %v2130_v35 = vsel %vm2124_vm14, %v2127_v20, %v2129_v53  ;;  %v9693_v7 = vmul.u32.u64.low %v2139_v15, %v2138_v40  ;;  %v9694_v3 = vmul.u32.u64.high %v2139_v15, %v2138_v40, %v9693_v7  ;;  %vm1979_vm1 = vcmp.eq.s32.totalorder %v9677_v25, 0 }
 0x252   :  { %v2058_v38 = vsel %vm7214_vm15, 0, %v7213_v39  ;;  %v9697_v59 = vmul.u32.u64.low %v2139_v15, %v2134_v16  ;;  %v9698_v48 = vmul.u32.u64.high %v2139_v15, %v2134_v16, %v9697_v59  ;;  %v2043_v63 = vadd.s32 %v9589_v24, %v9596_v46 }
 0x253   :  { %v2059_v19 = vsub.s32 32, %v2058_v38  ;;  %v2063_v28 = vsub.s32 4294967266, %v2058_v38  ;;  %v2205_v0 = vadd.s32 1, %v7219_v33  ;;  %v9703_v62 = vpop.eup %7606  ;;  %vm1982_vm14 = vcmp.eq.s32.totalorder %v9677_v25, 2 }
 0x254   :  { %12086 = vst [vmem:[#allocation58_spill] sm:$0xff] %v9703_v62  ;;  %v2074_v47 = vsel %vm1989_vm6, %v2073_v31, %v9654_v45  ;;  %v2146_v20 = vmul.u32 %v2139_v15, %v2130_v35  ;;  %v11835_v60 = vand.u32 2147483647, %v9550_v37  ;;  %v9710_v12 = vpop.eup %7608  ;;  %v11833_v9 = vxor.u32 2147483648, %v9703_v62 }
 0x255   :  { %12087 = vst [vmem:[#allocation59_spill] sm:$0xff] %v9710_v12  ;;  %v2060_v24 = vshll.u32 %v9664_v54, %v2058_v38  ;;  %v2061_v46 = vshrl.u32 %v2043_v63, %v2059_v19  ;;  %v2064_v43 = vadd.s32 127, %v2063_v28  ;;  %v11834_v39 = vxor.u32 2147483648, %v9710_v12 }
 0x256   :  { %vm2148_vm5 = vc.u32 %v9694_v3, %v9697_v59  ;;  %v2149_v53 = vadd.s32 1, %v9698_v48  ;;  %vm2206_vm15 = vcmp.gt.s32.totalorder %v2205_v0, 0  ;;  %v1984_v45 = vsel %vm1982_vm14, %v11833_v9, %v9710_v12 }
 0x257   :  { %v2062_v15 = vor.u32 %v2061_v46, %v2060_v24  ;;  %v2065_v29 = vshll.u32 %v2064_v43, 23  ;;  %v2207_v61 = vsel %vm2206_vm15, %v2205_v0, 0  ;;  %v1981_v54 = vsel %vm1979_vm1, %v9703_v62, %v11834_v39 }
 0x258   :  { %v9728_v31 = vsel %vm9684_vm13, 0, %v2074_v47  ;;  %v2150_v16 = vsel %vm2148_vm5, %v2149_v53, %v9698_v48  ;;  %v2209_v40 = vand.u32 31, %v2207_v61  ;;  %v1985_v33 = vsel %vm1978_vm9, %v1981_v54, %v1984_v45 }
 0x259   :  { %v2066_v35 = vor.u32 4788187, %v2065_v29  ;;  %v2151_v7 = vadd.s32 %v2150_v16, %v2146_v20  ;;  %v9735_v38 = vmul.f32 6.2831855, %v8039_v10  ;;  %v1986_v63 = vsel %vm11875_vm12, nan, %v1985_v33 }
 0x25a   :  { %v2202_v19 = vand.u32 8388607, %v11835_v60  ;;  %v2210_v28 = vsub.s32 32, %v2209_v40  ;;  %v2069_v48 = vcvt.s32.f32 %v2062_v15  ;;  %v2080_v47 = vadd.s32 3, %v9728_v31  ;;  %7065 = vst [vmem:[%s11709_s2 + $0x70] sm:$0xff] %v1986_v63  ;;  %7129 = vst [vmem:[%s11709_s2 + $0x270] sm:$0xff] %v1986_v63 }
 0x25b   :  { %12088 = vst [vmem:[#allocation60_spill] sm:$0xff] %v9735_v38  ;;  %v2067_v0 = vand.u32 2147483647, %v2066_v35  ;;  %v2152_v24 = vadd.s32 536870912, %v2151_v7  ;;  %v2208_v10 = vshrl.u32 %v2207_v61, 5  ;;  %v2212_v45 = vshll.u32 %v11985_v17, %v2209_v40 }
 0x25c   :  { %v2213_v25 = vshrl.u32 %v11986_v52, %v2210_v28  ;;  %v2216_v20 = vshrl.u32 %v11987_v56, %v2210_v28  ;;  %v2219_v46 = vshrl.u32 %v11988_v23, %v2210_v28  ;;  %v2222_v15 = vshrl.u32 %v11989_v27, %v2210_v28 }
 0x25d   :  { %v2070_v43 = vmul.f32 %v2069_v48, %v2067_v0  ;;  %v2153_v53 = vshrl.u32 %v2152_v24, 30  ;;  %v2215_v29 = vshll.u32 %v11986_v52, %v2209_v40  ;;  %v2218_v54 = vshll.u32 %v11987_v56, %v2209_v40 }
 0x25e   :  { %v2221_v16 = vshll.u32 %v11988_v23, %v2209_v40  ;;  %v2225_v61 = vshrl.u32 %v11990_v22, %v2210_v28  ;;  %v9757_v35 = vand.u32 3, %v2080_v47  ;;  %v2224_v9 = vshll.u32 %v11989_v27, %v2209_v40 }
 0x25f   :  { %v2071_v33 = vxor.u32 2147483648, %v2070_v43  ;;  %v2154_v63 = vshll.u32 %v2153_v53, 30  ;;  %vm2093_vm9 = vcmp.lt.s32.totalorder %v9543_v13, 0  ;;  %v2214_v0 = vor.u32 %v2213_v25, %v2212_v45 }
 0x260   :  { %v2217_v48 = vor.u32 %v2216_v20, %v2215_v29  ;;  %v2220_v24 = vor.u32 %v2219_v46, %v2218_v54  ;;  %v2223_v39 = vor.u32 %v2222_v15, %v2221_v16  ;;  %v2203_v62 = vor.u32 8388608, %v2202_v19 }
 0x261   :  { %v2072_v60 = vsel %vm1989_vm6, %v2071_v33, %v2070_v43  ;;  %v9763_v42 = vsub.s32 %v2151_v7, %v2154_v63  ;;  %v2302_v12 = vand.u32 2139095040, %v9649_v26  ;;  %v2211_v40 = vshrl.u32 %v11985_v17, %v2210_v28 }
 0x262   :  { %v2075_v47 = vsel %vm9684_vm13, %v9258_v32, %v2072_v60  ;;  %v2226_v14 = vor.u32 %v2225_v61, %v2224_v9  ;;  %vm2227_vm1 = vcmp.lt.s32.totalorder %v2208_v10, 1  ;;  %vm2229_vm14 = vcmp.lt.s32.totalorder %v2208_v10, 3 }
 0x263   :  { %7610 = vcosq.f32 %v2075_v47  ;;  %v2157_v25 = vsub.s32 0, %v9763_v42  ;;  %vm2230_vm5 = vcmp.lt.s32.totalorder %v2208_v10, 4  ;;  %v2235_v7 = vsel %vm2227_vm1, %v2214_v0, %v2217_v48 }
 0x264   :  { %7612 = vsinq.f32 %v2075_v47  ;;  %v2232_v20 = vsel %vm2230_vm5, %v2220_v24, 2102212464  ;;  %v2236_v19 = vsel %vm2230_vm5, %v2223_v39, 920167782  ;;  %v2177_v43 = vsub.s32 4, %v2153_v53 }
 0x265   :  { %v7216_v46 = vmin.u32 %v2157_v25, %v9763_v42  ;;  %vm2228_vm6 = vcmp.lt.s32.totalorder %v2208_v10, 2  ;;  %v2237_v55 = vsel %vm2229_vm14, %v2220_v24, %v2236_v19  ;;  %v2239_v9 = vsel %vm2227_vm1, %v2217_v48, %v2220_v24 }
 0x266   :  { %v2238_v60 = vsel %vm2228_vm6, %v2235_v7, %v2237_v55  ;;  %v2240_v28 = vsel %vm2230_vm5, %v2226_v14, 1326507024  ;;  %v2243_v45 = vshll.u32 %v2203_v62, 8  ;;  %v12089_v15 = vand.u32 2147483647, %v9543_v13 }
 0x267   :  { %v2159_v54 = vclz %v7216_v46  ;;  %v2231_v16 = vsel %vm2227_vm1, %v2211_v40, %v2214_v0  ;;  %v2233_v61 = vsel %vm2229_vm14, %v2217_v48, %v2232_v20  ;;  %v2241_v33 = vsel %vm2229_vm14, %v2223_v39, %v2240_v28 }
 0x268   :  { %vm9778_vm13 = vcmp.le.f32.partialorder %v12089_v15, 0.7853982  ;;  %v9785_v63 = vmul.u32.u64.low %v2243_v45, %v2238_v60  ;;  %v9786_v47 = vmul.u32.u64.high %v2243_v45, %v2238_v60, %v9785_v63  ;;  %v2303_v24 = vshrl.u32 %v2302_v12, 23 }
 0x269   :  { %vm2082_vm15 = vcmp.lt.s32.totalorder %v9757_v35, 2  ;;  %v7217_v14 = vadd.s32 4294967294, %v2159_v54  ;;  %v2178_v62 = vsel %vm2093_vm9, %v2177_v43, %v2153_v53  ;;  %v2242_v25 = vsel %vm2228_vm6, %v2239_v9, %v2241_v33 }
 0x26a   :  { %v2234_v7 = vsel %vm2228_vm6, %v2231_v16, %v2233_v61  ;;  %v9794_v0 = vmul.u32.u64.low %v2243_v45, %v2242_v25  ;;  %v9795_v40 = vmul.u32.u64.high %v2243_v45, %v2242_v25, %v9794_v0  ;;  %v7223_v48 = vadd.s32 4294967169, %v2303_v24 }
 0x26b   :  { %vm2083_vm1 = vcmp.eq.s32.totalorder %v9757_v35, 0  ;;  %vm2086_vm14 = vcmp.eq.s32.totalorder %v9757_v35, 2  ;;  %vm7218_vm5 = vcmp.lt.s32.totalorder %v7217_v14, 0  ;;  %v11845_v12 = vand.u32 2147483647, %v9649_v26 }
 0x26c   :  { %v2147_v39 = vadd.s32 %v9697_v59, %v9694_v3  ;;  %v2162_v20 = vsel %vm7218_vm5, 0, %v7217_v14  ;;  %v2253_v53 = vadd.s32 1, %v9786_v47  ;;  %v2309_v19 = vadd.s32 1, %v7223_v48 }
 0x26d   :  { %v9803_v10 = vpop.eup %7610  ;;  %v2163_v46 = vsub.s32 32, %v2162_v20  ;;  %v2167_v43 = vsub.s32 4294967266, %v2162_v20  ;;  %v9807_v55 = vsel %vm9778_vm13, 0, %v2178_v62  ;;  %v2250_v60 = vmul.u32 %v2243_v45, %v2234_v7 }
 0x26e   :  { %12092 = vst [vmem:[#allocation61_spill] sm:$0xff] %v9803_v10  ;;  %12093 = vst [vmem:[#allocation62_spill] sm:$0xff] %v9807_v55  ;;  %v9809_v9 = vpop.eup %7612  ;;  %v11843_v28 = vxor.u32 2147483648, %v9803_v10  ;;  %v2164_v15 = vshll.u32 %v9763_v42, %v2162_v20  ;;  %vm2252_vm6 = vc.u32 %v9795_v40, %v9785_v63  ;;  %vm2310_vm5 = vcmp.gt.s32.totalorder %v2309_v19, 0 }
 0x26f   :  { %v11844_v3 = vxor.u32 2147483648, %v9809_v9  ;;  %v2165_v59 = vshrl.u32 %v2147_v39, %v2163_v46  ;;  %v2168_v54 = vadd.s32 127, %v2167_v43  ;;  %v2254_v16 = vsel %vm2252_vm6, %v2253_v53, %v9786_v47 }
 0x270   :  { %v2088_v45 = vsel %vm2086_vm14, %v11843_v28, %v9809_v9  ;;  %v2255_v61 = vadd.s32 %v2254_v16, %v2250_v60  ;;  %v2306_v42 = vand.u32 8388607, %v11845_v12  ;;  %v2311_v33 = vsel %vm2310_vm5, %v2309_v19, 0 }
 0x271   :  { %v2085_v24 = vsel %vm2083_vm1, %v9803_v10, %v11844_v3  ;;  %v2166_v14 = vor.u32 %v2165_v59, %v2164_v15  ;;  %v2169_v62 = vshll.u32 %v2168_v54, 23  ;;  %v2406_v47 = vand.u32 2139095040, %v9652_v51 }
 0x272   :  { %vm11850_vm6 = vweird.f32 %v9258_v32  ;;  %v2089_v25 = vsel %vm2082_vm15, %v2085_v24, %v2088_v45  ;;  %v2256_v7 = vadd.s32 536870912, %v2255_v61  ;;  %v2313_v0 = vand.u32 31, %v2311_v33 }
 0x273   :  { %v9834_v48 = vmul.f32 6.2831855, %v8042_v11  ;;  %v2090_v39 = vsel %vm11850_vm6, nan, %v2089_v25  ;;  %v2170_v20 = vor.u32 4788187, %v2169_v62  ;;  %v9839_v53 = vadd.s32 3, %v9807_v55 }
 0x274   :  { %v2257_v19 = vshrl.u32 %v2256_v7, 30  ;;  %v2307_v46 = vor.u32 8388608, %v2306_v42  ;;  %v2314_v43 = vsub.s32 32, %v2313_v0  ;;  %7066 = vst [vmem:[%s11709_s2 + $0x78] sm:$0xff] %v2090_v39  ;;  %7130 = vst [vmem:[%s11709_s2 + $0x278] sm:$0xff] %v2090_v39  ;;  %v2173_v35 = vcvt.s32.f32 %v2166_v14 }
 0x275   :  { %12094 = vst [vmem:[#allocation63_spill] sm:$0xff] %v9834_v48  ;;  %v2171_v11 = vand.u32 2147483647, %v2170_v20  ;;  %v9847_v60 = vshrl.u32 %v2311_v33, 5  ;;  %v2407_v15 = vshrl.u32 %v2406_v47, 23  ;;  %vm2197_vm15 = vcmp.lt.s32.totalorder %v9550_v37, 0 }
 0x276   :  { %v2258_v59 = vshll.u32 %v2257_v19, 30  ;;  %v2316_v54 = vshll.u32 %v11985_v17, %v2313_v0  ;;  %v2317_v16 = vshrl.u32 %v11986_v52, %v2314_v43  ;;  %v2319_v45 = vshll.u32 %v11986_v52, %v2313_v0 }
 0x277   :  { %v2174_v42 = vmul.f32 %v2173_v35, %v2171_v11  ;;  %v2320_v24 = vshrl.u32 %v11987_v56, %v2314_v43  ;;  %v2323_v62 = vshrl.u32 %v11988_v23, %v2314_v43  ;;  %v2326_v25 = vshrl.u32 %v11989_v27, %v2314_v43 }
 0x278   :  { %v9856_v14 = vsub.s32 %v2255_v61, %v2258_v59  ;;  %v2322_v33 = vshll.u32 %v11987_v56, %v2313_v0  ;;  %v2325_v47 = vshll.u32 %v11988_v23, %v2313_v0  ;;  %v2329_v7 = vshrl.u32 %v11990_v22, %v2314_v43 }
 0x279   :  { %v2175_v39 = vxor.u32 2147483648, %v2174_v42  ;;  %v2318_v20 = vor.u32 %v2317_v16, %v2316_v54  ;;  %v2321_v28 = vor.u32 %v2320_v24, %v2319_v45  ;;  %v9861_v3 = vshll.u32 %v2307_v46, 8 }
 0x27a   :  { %v12095_v11 = vand.u32 2147483647, %v9550_v37  ;;  %v2261_v61 = vsub.s32 0, %v9856_v14  ;;  %v2324_v59 = vor.u32 %v2323_v62, %v2322_v33  ;;  %v2327_v12 = vor.u32 %v2326_v25, %v2325_v47 }
 0x27b   :  { %v2328_v32 = vshll.u32 %v11989_v27, %v2313_v0  ;;  %v2176_v55 = vsel %vm2093_vm9, %v2175_v39, %v2174_v42  ;;  %v2281_v10 = vsub.s32 4, %v2257_v19  ;;  %vm2331_vm14 = vcmp.lt.s32.totalorder %v9847_v60, 1 }
 0x27c   :  { %vm9865_vm1 = vcmp.le.f32.partialorder %v12095_v11, 0.7853982  ;;  %v7227_v46 = vadd.s32 4294967169, %v2407_v15  ;;  %v2179_v54 = vsel %vm9778_vm13, %v9543_v13, %v2176_v55  ;;  %v7220_v16 = vmin.u32 %v2261_v61, %v9856_v14 }
 0x27d   :  { %v2330_v45 = vor.u32 %v2329_v7, %v2328_v32  ;;  %vm2334_vm5 = vcmp.lt.s32.totalorder %v9847_v60, 4  ;;  %7614 = vcosq.f32 %v2179_v54  ;;  %v2315_v24 = vshrl.u32 %v11985_v17, %v2314_v43 }
 0x27e   :  { %v2339_v0 = vsel %vm2331_vm14, %v2318_v20, %v2321_v28  ;;  %v2340_v42 = vsel %vm2334_vm5, %v2327_v12, 920167782  ;;  %7616 = vsinq.f32 %v2179_v54  ;;  %v2263_v15 = vclz %v7220_v16 }
 0x27f   :  { %vm2333_vm9 = vcmp.lt.s32.totalorder %v9847_v60, 3  ;;  %v2336_v29 = vsel %vm2334_vm5, %v2324_v59, 2102212464  ;;  %v2282_v32 = vsel %vm2197_vm15, %v2281_v10, %v2257_v19  ;;  %vm2332_vm13 = vcmp.lt.s32.totalorder %v9847_v60, 2 }
 0x280   :  { %v2341_v55 = vsel %vm2333_vm9, %v2324_v59, %v2340_v42  ;;  %v2343_v43 = vsel %vm2331_vm14, %v2321_v28, %v2324_v59  ;;  %v7221_v62 = vadd.s32 4294967294, %v2263_v15  ;;  %v2335_v25 = vsel %vm2331_vm14, %v2315_v24, %v2318_v20 }
 0x281   :  { %v2342_v33 = vsel %vm2332_vm13, %v2339_v0, %v2341_v55  ;;  %v2344_v47 = vsel %vm2334_vm5, %v2330_v45, 1326507024  ;;  %v2337_v7 = vsel %vm2333_vm9, %v2321_v28, %v2336_v29  ;;  %v2251_v11 = vadd.s32 %v9785_v63, %v9795_v40 }
 0x282   :  { %v2345_v39 = vsel %vm2333_vm9, %v2327_v12, %v2344_v47  ;;  %v9899_v10 = vmul.u32.u64.low %v9861_v3, %v2342_v33  ;;  %v9900_v19 = vmul.u32.u64.high %v9861_v3, %v2342_v33, %v9899_v10  ;;  %vm7222_vm6 = vcmp.lt.s32.totalorder %v7221_v62, 0 }
 0x283   :  { %v2346_v20 = vsel %vm2332_vm13, %v2343_v43, %v2345_v39  ;;  %v2413_v61 = vadd.s32 1, %v7227_v46  ;;  %v2266_v59 = vsel %vm7222_vm6, 0, %v7221_v62  ;;  %v9909_v54 = vsel %vm9865_vm1, 0, %v2282_v32 }
 0x284   :  { %v9912_v12 = vmul.u32.u64.low %v9861_v3, %v2346_v20  ;;  %v9913_v28 = vmul.u32.u64.high %v9861_v3, %v2346_v20, %v9912_v12  ;;  %v2267_v16 = vsub.s32 32, %v2266_v59  ;;  %v2271_v45 = vsub.s32 4294967266, %v2266_v59 }
 0x285   :  { %v2338_v24 = vsel %vm2332_vm13, %v2335_v25, %v2337_v7  ;;  %vm2414_vm14 = vcmp.gt.s32.totalorder %v2413_v61, 0  ;;  %vm11859_vm5 = vweird.f32 %v9543_v13  ;;  %v2185_v63 = vand.u32 3, %v9839_v53 }
 0x286   :  { %v2357_v40 = vadd.s32 1, %v9900_v19  ;;  %v2415_v46 = vsel %vm2414_vm14, %v2413_v61, 0  ;;  %v2268_v0 = vshll.u32 %v9856_v14, %v2266_v59  ;;  %v2269_v42 = vshrl.u32 %v2251_v11, %v2267_v16 }
 0x287   :  { %v2272_v15 = vadd.s32 127, %v2271_v45  ;;  %v2417_v29 = vand.u32 31, %v2415_v46  ;;  %v9921_v32 = vpop.eup %7614  ;;  %v2288_v55 = vadd.s32 3, %v9909_v54  ;;  %v2354_v60 = vmul.u32 %v9861_v3, %v2338_v24 }
 0x288   :  { %12098 = vst [vmem:[#allocation64_spill] sm:$0xff] %v9921_v32  ;;  %vm2356_vm6 = vc.u32 %v9913_v28, %v9899_v10  ;;  %v11853_v43 = vand.u32 2147483647, %v9652_v51  ;;  %v9928_v53 = vpop.eup %7616  ;;  %v11851_v62 = vxor.u32 2147483648, %v9921_v32  ;;  %v2270_v25 = vor.u32 %v2269_v42, %v2268_v0 }
 0x289   :  { %12099 = vst [vmem:[#allocation65_spill] sm:$0xff] %v9928_v53  ;;  %v2273_v14 = vshll.u32 %v2272_v15, 23  ;;  %v2358_v33 = vsel %vm2356_vm6, %v2357_v40, %v9900_v19  ;;  %v11852_v47 = vxor.u32 2147483648, %v9928_v53  ;;  %vm2190_vm9 = vcmp.eq.s32.totalorder %v2185_v63, 2 }
 0x28a   :  { %v2359_v7 = vadd.s32 %v2358_v33, %v2354_v60  ;;  %v2418_v39 = vsub.s32 32, %v2417_v29  ;;  %vm2186_vm13 = vcmp.lt.s32.totalorder %v2185_v63, 2  ;;  %vm2187_vm14 = vcmp.eq.s32.totalorder %v2185_v63, 0 }
 0x28b   :  { %v2192_v3 = vsel %vm2190_vm9, %v11851_v62, %v9928_v53  ;;  %v2274_v11 = vor.u32 4788187, %v2273_v14  ;;  %v2189_v20 = vsel %vm2187_vm14, %v9921_v32, %v11852_v47  ;;  %v9939_v61 = vand.u32 3, %v2288_v55 }
 0x28c   :  { %v2360_v59 = vadd.s32 536870912, %v2359_v7  ;;  %v2410_v19 = vand.u32 8388607, %v11853_v43  ;;  %v2193_v12 = vsel %vm2186_vm13, %v2189_v20, %v2192_v3  ;;  %v2277_v45 = vcvt.s32.f32 %v2270_v25 }
 0x28d   :  { %v2275_v16 = vand.u32 2147483647, %v2274_v11  ;;  %v2421_v24 = vshrl.u32 %v11986_v52, %v2418_v39  ;;  %v2194_v63 = vsel %vm11859_vm5, nan, %v2193_v12  ;;  %v2424_v0 = vshrl.u32 %v11987_v56, %v2418_v39 }
 0x28e   :  { %v2361_v40 = vshrl.u32 %v2360_v59, 30  ;;  %v2427_v42 = vshrl.u32 %v11988_v23, %v2418_v39  ;;  %vm2301_vm6 = vcmp.lt.s32.totalorder %v9649_v26, 0  ;;  %v2416_v55 = vshrl.u32 %v2415_v46, 5  ;;  %7067 = vst [vmem:[%s11709_s2 + $0x80] sm:$0xff] %v2194_v63  ;;  %7131 = vst [vmem:[%s11709_s2 + $0x280] sm:$0xff] %v2194_v63 }
 0x28f   :  { %v2278_v15 = vmul.f32 %v2277_v45, %v2275_v16  ;;  %v2429_v60 = vshll.u32 %v11988_v23, %v2417_v29  ;;  %v2430_v14 = vshrl.u32 %v11989_v27, %v2418_v39  ;;  %v2420_v33 = vshll.u32 %v11985_v17, %v2417_v29 }
 0x290   :  { %v2362_v25 = vshll.u32 %v2361_v40, 30  ;;  %v2423_v3 = vshll.u32 %v11986_v52, %v2417_v29  ;;  %v2426_v11 = vshll.u32 %v11987_v56, %v2417_v29  ;;  %v2432_v59 = vshll.u32 %v11989_v27, %v2417_v29 }
 0x291   :  { %v2279_v46 = vxor.u32 2147483648, %v2278_v15  ;;  %v2431_v20 = vor.u32 %v2430_v14, %v2429_v60  ;;  %v2433_v12 = vshrl.u32 %v11990_v22, %v2418_v39  ;;  %v12100_v16 = vand.u32 2147483647, %v9649_v26 }
 0x292   :  { %v9968_v63 = vsub.s32 %v2359_v7, %v2362_v25  ;;  %v2422_v62 = vor.u32 %v2421_v24, %v2420_v33  ;;  %v2425_v47 = vor.u32 %v2424_v0, %v2423_v3  ;;  %v2428_v43 = vor.u32 %v2427_v42, %v2426_v11 }
 0x293   :  { %vm9964_vm9 = vcmp.le.f32.partialorder %v12100_v16, 0.7853982  ;;  %v2280_v13 = vsel %vm2197_vm15, %v2279_v46, %v2278_v15  ;;  %v2411_v32 = vor.u32 8388608, %v2410_v19  ;;  %v2419_v60 = vshrl.u32 %v11985_v17, %v2418_v39 }
 0x294   :  { %v2434_v29 = vor.u32 %v2433_v12, %v2432_v59  ;;  %v2283_v14 = vsel %vm9865_vm1, %v9550_v37, %v2280_v13  ;;  %v2365_v16 = vsub.s32 0, %v9968_v63  ;;  %v2385_v53 = vsub.s32 4, %v2361_v40 }
 0x295   :  { %vm2438_vm13 = vcmp.lt.s32.totalorder %v2416_v55, 4  ;;  %7618 = vcosq.f32 %v2283_v14  ;;  %vm2435_vm14 = vcmp.lt.s32.totalorder %v2416_v55, 1  ;;  %vm2437_vm5 = vcmp.lt.s32.totalorder %v2416_v55, 3 }
 0x296   :  { %v2444_v7 = vsel %vm2438_vm13, %v2431_v20, 920167782  ;;  %7620 = vsinq.f32 %v2283_v14  ;;  %v7224_v24 = vmin.u32 %v2365_v16, %v9968_v63  ;;  %v2440_v0 = vsel %vm2438_vm13, %v2428_v43, 2102212464 }
 0x297   :  { %v2443_v19 = vsel %vm2435_vm14, %v2422_v62, %v2425_v47  ;;  %v2445_v39 = vsel %vm2437_vm5, %v2428_v43, %v2444_v7  ;;  %v2447_v42 = vsel %vm2435_vm14, %v2425_v47, %v2428_v43  ;;  %v2448_v15 = vsel %vm2438_vm13, %v2434_v29, 1326507024 }
 0x298   :  { %v2451_v25 = vshll.u32 %v2411_v32, 8  ;;  %v2367_v35 = vclz %v7224_v24  ;;  %v2386_v13 = vsel %vm2301_vm6, %v2385_v53, %v2361_v40  ;;  %vm2436_vm15 = vcmp.lt.s32.totalorder %v2416_v55, 2 }
 0x299   :  { %v2439_v33 = vsel %vm2435_vm14, %v2419_v60, %v2422_v62  ;;  %v2441_v3 = vsel %vm2437_vm5, %v2425_v47, %v2440_v0  ;;  %v2446_v11 = vsel %vm2436_vm15, %v2443_v19, %v2445_v39  ;;  %v2449_v46 = vsel %vm2437_vm5, %v2431_v20, %v2448_v15 }
 0x29a   :  { %v2510_v59 = vand.u32 2139095040, %v9735_v38  ;;  %v7225_v12 = vadd.s32 4294967294, %v2367_v35  ;;  %v2450_v14 = vsel %vm2436_vm15, %v2447_v42, %v2449_v46  ;;  %v9990_v32 = vsel %vm9964_vm9, 0, %v2386_v13 }
 0x29b   :  { %v9984_v16 = vmul.u32.u64.low %v2451_v25, %v2446_v11  ;;  %v9985_v7 = vmul.u32.u64.high %v2451_v25, %v2446_v11, %v9984_v16  ;;  %12103 = vst [vmem:[#allocation66_spill] sm:$0xff] %v9990_v32  ;;  %v9992_v43 = vmul.u32.u64.low %v2451_v25, %v2450_v14  ;;  %v9993_v53 = vmul.u32.u64.high %v2451_v25, %v2450_v14, %v9992_v43 }
 0x29c   :  { %v2511_v62 = vshrl.u32 %v2510_v59, 23  ;;  %vm2291_vm1 = vcmp.eq.s32.totalorder %v9939_v61, 0  ;;  %vm2294_vm5 = vcmp.eq.s32.totalorder %v9939_v61, 2  ;;  %vm7226_vm13 = vcmp.lt.s32.totalorder %v7225_v12, 0 }
 0x29d   :  { %v2442_v47 = vsel %vm2436_vm15, %v2439_v33, %v2441_v3  ;;  %v2355_v40 = vadd.s32 %v9899_v10, %v9913_v28  ;;  %v2370_v55 = vsel %vm7226_vm13, 0, %v7225_v12  ;;  %v11862_v20 = vand.u32 2147483647, %v9735_v38 }
 0x29e   :  { %v7231_v60 = vadd.s32 4294967169, %v2511_v62  ;;  %v2371_v29 = vsub.s32 32, %v2370_v55  ;;  %v2375_v24 = vsub.s32 4294967266, %v2370_v55  ;;  %v2392_v0 = vadd.s32 3, %v9990_v32 }
 0x29f   :  { %v2461_v19 = vadd.s32 1, %v9985_v7  ;;  %v10002_v39 = vpop.eup %7618  ;;  %v2372_v42 = vshll.u32 %v9968_v63, %v2370_v55  ;;  %v2458_v15 = vmul.u32 %v2451_v25, %v2442_v47  ;;  %vm2460_vm14 = vc.u32 %v9993_v53, %v9984_v16 }
 0x2a0   :  { %12104 = vst [vmem:[#allocation67_spill] sm:$0xff] %v10002_v39  ;;  %v2517_v35 = vadd.s32 1, %v7231_v60  ;;  %v10007_v10 = vpop.eup %7620  ;;  %v11860_v28 = vxor.u32 2147483648, %v10002_v39  ;;  %v2373_v13 = vshrl.u32 %v2355_v40, %v2371_v29  ;;  %v2376_v33 = vadd.s32 127, %v2375_v24 }
 0x2a1   :  { %12105 = vst [vmem:[#allocation68_spill] sm:$0xff] %v10007_v10  ;;  %v2462_v3 = vsel %vm2460_vm14, %v2461_v19, %v9985_v7  ;;  %v11861_v11 = vxor.u32 2147483648, %v10007_v10  ;;  %v2514_v59 = vand.u32 8388607, %v11862_v20  ;;  %vm2290_vm13 = vcmp.lt.s32.totalorder %v9939_v61, 2 }
 0x2a2   :  { %v2463_v46 = vadd.s32 %v2462_v3, %v2458_v15  ;;  %vm2518_vm15 = vcmp.gt.s32.totalorder %v2517_v35, 0  ;;  %v2296_v63 = vsel %vm2294_vm5, %v11860_v28, %v10007_v10  ;;  %v2374_v25 = vor.u32 %v2373_v13, %v2372_v42 }
 0x2a3   :  { %v2377_v12 = vshll.u32 %v2376_v33, 23  ;;  %v2519_v14 = vsel %vm2518_vm15, %v2517_v35, 0  ;;  %v2293_v7 = vsel %vm2291_vm1, %v10002_v39, %v11861_v11  ;;  %vm11866_vm14 = vweird.f32 %v9550_v37 }
 0x2a4   :  { %v2464_v43 = vadd.s32 536870912, %v2463_v46  ;;  %v2521_v62 = vand.u32 31, %v2519_v14  ;;  %v2297_v47 = vsel %vm2290_vm13, %v2293_v7, %v2296_v63  ;;  %v2515_v29 = vor.u32 8388608, %v2514_v59 }
 0x2a5   :  { %v2378_v40 = vor.u32 4788187, %v2377_v12  ;;  %v2298_v55 = vsel %vm11866_vm14, nan, %v2297_v47  ;;  %v2381_v42 = vcvt.s32.f32 %v2374_v25  ;;  %v10030_v15 = vand.u32 3, %v2392_v0 }
 0x2a6   :  { %v10028_v60 = vshrl.u32 %v2464_v43, 30  ;;  %v2522_v24 = vsub.s32 32, %v2521_v62  ;;  %7068 = vst [vmem:[%s11709_s2 + $0x88] sm:$0xff] %v2298_v55  ;;  %7132 = vst [vmem:[%s11709_s2 + $0x288] sm:$0xff] %v2298_v55  ;;  %v2524_v35 = vshll.u32 %v11985_v17, %v2521_v62  ;;  %v2614_v33 = vand.u32 2139095040, %v9834_v48 }
 0x2a7   :  { %v2379_v19 = vand.u32 2147483647, %v2378_v40  ;;  %v2520_v12 = vshrl.u32 %v2519_v14, 5  ;;  %v2527_v7 = vshll.u32 %v11986_v52, %v2521_v62  ;;  %v10048_v43 = vshll.u32 %v2515_v29, 8 }
 0x2a8   :  { %v2466_v61 = vshll.u32 %v10028_v60, 30  ;;  %v2525_v13 = vshrl.u32 %v11986_v52, %v2522_v24  ;;  %v2528_v0 = vshrl.u32 %v11987_v56, %v2522_v24  ;;  %v2531_v59 = vshrl.u32 %v11988_v23, %v2522_v24 }
 0x2a9   :  { %v2382_v3 = vmul.f32 %v2381_v42, %v2379_v19  ;;  %v2534_v63 = vshrl.u32 %v11989_v27, %v2522_v24  ;;  %v2530_v55 = vshll.u32 %v11987_v56, %v2521_v62  ;;  %v2533_v28 = vshll.u32 %v11988_v23, %v2521_v62 }
 0x2aa   :  { %v10045_v25 = vsub.s32 %v2463_v46, %v2466_v61  ;;  %v2526_v40 = vor.u32 %v2525_v13, %v2524_v35  ;;  %v2529_v42 = vor.u32 %v2528_v0, %v2527_v7  ;;  %v2536_v11 = vshll.u32 %v11989_v27, %v2521_v62 }
 0x2ab   :  { %v2383_v47 = vxor.u32 2147483648, %v2382_v3  ;;  %v2537_v20 = vshrl.u32 %v11990_v22, %v2522_v24  ;;  %vm2405_vm1 = vcmp.lt.s32.totalorder %v9652_v51, 0  ;;  %v2532_v14 = vor.u32 %v2531_v59, %v2530_v55 }
 0x2ac   :  { %v2469_v19 = vsub.s32 0, %v10045_v25  ;;  %v2535_v29 = vor.u32 %v2534_v63, %v2533_v28  ;;  %v2615_v61 = vshrl.u32 %v2614_v33, 23  ;;  %v2489_v0 = vsub.s32 4, %v10028_v60 }
 0x2ad   :  { %v2384_v46 = vsel %vm2301_vm6, %v2383_v47, %v2382_v3  ;;  %v2538_v7 = vor.u32 %v2537_v20, %v2536_v11  ;;  %v2523_v62 = vshrl.u32 %v11985_v17, %v2522_v24  ;;  %vm2539_vm5 = vcmp.lt.s32.totalorder %v2520_v12, 1 }
 0x2ae   :  { %v2387_v35 = vsel %vm9964_vm9, %v9649_v26, %v2384_v46  ;;  %v7228_v13 = vmin.u32 %v2469_v19, %v10045_v25  ;;  %vm2540_vm15 = vcmp.lt.s32.totalorder %v2520_v12, 2  ;;  %vm2542_vm6 = vcmp.lt.s32.totalorder %v2520_v12, 4 }
 0x2af   :  { %7622 = vcosq.f32 %v2387_v35  ;;  %v2547_v59 = vsel %vm2539_vm5, %v2526_v40, %v2529_v42  ;;  %vm2541_vm13 = vcmp.lt.s32.totalorder %v2520_v12, 3  ;;  %v2544_v28 = vsel %vm2542_vm6, %v2532_v14, 2102212464 }
 0x2b0   :  { %7624 = vsinq.f32 %v2387_v35  ;;  %v2471_v3 = vclz %v7228_v13  ;;  %v2548_v33 = vsel %vm2542_vm6, %v2535_v29, 920167782  ;;  %v2551_v63 = vsel %vm2539_vm5, %v2529_v42, %v2532_v14 }
 0x2b1   :  { %v2543_v47 = vsel %vm2539_vm5, %v2523_v62, %v2526_v40  ;;  %v2549_v55 = vsel %vm2541_vm13, %v2532_v14, %v2548_v33  ;;  %v2552_v19 = vsel %vm2542_vm6, %v2538_v7, 1326507024  ;;  %v2545_v46 = vsel %vm2541_vm13, %v2529_v42, %v2544_v28 }
 0x2b2   :  { %v7229_v45 = vadd.s32 4294967294, %v2471_v3  ;;  %v2550_v20 = vsel %vm2540_vm15, %v2547_v59, %v2549_v55  ;;  %v2553_v11 = vsel %vm2541_vm13, %v2535_v29, %v2552_v19  ;;  %v7235_v37 = vadd.s32 4294967169, %v2615_v61 }
 0x2b3   :  { %v2554_v24 = vsel %vm2540_vm15, %v2551_v63, %v2553_v11  ;;  %v10067_v35 = vmul.u32.u64.low %v10048_v43, %v2550_v20  ;;  %v10068_v13 = vmul.u32.u64.high %v10048_v43, %v2550_v20, %v10067_v35  ;;  %v2459_v39 = vadd.s32 %v9984_v16, %v9993_v53 }
 0x2b4   :  { %vm7230_vm9 = vcmp.lt.s32.totalorder %v7229_v45, 0  ;;  %v10074_v40 = vmul.u32.u64.low %v10048_v43, %v2554_v24  ;;  %v10075_v14 = vmul.u32.u64.high %v10048_v43, %v2554_v24, %v10074_v40  ;;  %v2490_v29 = vsel %vm2405_vm1, %v2489_v0, %v10028_v60 }
 0x2b5   :  { %v2474_v3 = vsel %vm7230_vm9, 0, %v7229_v45  ;;  %v2546_v61 = vsel %vm2540_vm15, %v2543_v47, %v2545_v46  ;;  %vm2395_vm5 = vcmp.eq.s32.totalorder %v10030_v15, 0  ;;  %v12106_v62 = vand.u32 2147483647, %v9652_v51 }
 0x2b6   :  { %v2475_v42 = vsub.s32 32, %v2474_v3  ;;  %v2479_v7 = vsub.s32 4294967266, %v2474_v3  ;;  %v11869_v16 = vand.u32 2147483647, %v9834_v48  ;;  %v2621_v53 = vadd.s32 1, %v7235_v37 }
 0x2b7   :  { %vm10084_vm6 = vcmp.le.f32.partialorder %v12106_v62, 0.7853982  ;;  %v2476_v28 = vshll.u32 %v10045_v25, %v2474_v3  ;;  %v2565_v45 = vadd.s32 1, %v10068_v13  ;;  %v2562_v0 = vmul.u32 %v10048_v43, %v2546_v61 }
 0x2b8   :  { %v2477_v33 = vshrl.u32 %v2459_v39, %v2475_v42  ;;  %v2480_v63 = vadd.s32 127, %v2479_v7  ;;  %v10095_v12 = vsel %vm10084_vm6, 0, %v2490_v29  ;;  %vm2564_vm15 = vc.u32 %v10075_v14, %v10067_v35 }
 0x2b9   :  { %v10091_v60 = vpop.eup %7622  ;;  %12110 = vst [vmem:[#allocation70_spill] sm:$0xff] %v10095_v12  ;;  %vm2622_vm13 = vcmp.gt.s32.totalorder %v2621_v53, 0  ;;  %v2566_v55 = vsel %vm2564_vm15, %v2565_v45, %v10068_v13  ;;  %vm2398_vm9 = vcmp.eq.s32.totalorder %v10030_v15, 2  ;;  %v2496_v24 = vadd.s32 3, %v10095_v12 }
 0x2ba   :  { %12109 = vst [vmem:[#allocation69_spill] sm:$0xff] %v10091_v60  ;;  %v10100_v47 = vpop.eup %7624  ;;  %v11867_v37 = vxor.u32 2147483648, %v10091_v60  ;;  %v2478_v39 = vor.u32 %v2477_v33, %v2476_v28  ;;  %v2481_v25 = vshll.u32 %v2480_v63, 23  ;;  %v2567_v46 = vadd.s32 %v2566_v55, %v2562_v0  ;;  %v12113_v63 = vld [vmem:[#allocation6_spill] sm:$0xff] }
 0x2bb   :  { %12111 = vst [vmem:[#allocation71_spill] sm:$0xff] %v10100_v47  ;;  %v11868_v19 = vxor.u32 2147483648, %v10100_v47  ;;  %v2623_v20 = vsel %vm2622_vm13, %v2621_v53, 0  ;;  %v2618_v3 = vand.u32 8388607, %v11869_v16  ;;  %vm2394_vm14 = vcmp.lt.s32.totalorder %v10030_v15, 2 }
 0x2bc   :  { %v2400_v43 = vsel %vm2398_vm9, %v11867_v37, %v10100_v47  ;;  %v2482_v11 = vor.u32 4788187, %v2481_v25  ;;  %v2568_v40 = vadd.s32 536870912, %v2567_v46  ;;  %v2625_v42 = vand.u32 31, %v2623_v20 }
 0x2bd   :  { %v2397_v13 = vsel %vm2395_vm5, %v10091_v60, %v11868_v19  ;;  %vm11874_vm15 = vweird.f32 %v9649_v26  ;;  %v2485_v61 = vcvt.s32.f32 %v2478_v39  ;;  %v10120_v62 = vmul.f32 6.2831855, %v8045_v44 }
 0x2be   :  { %v2401_v7 = vsel %vm2394_vm14, %v2397_v13, %v2400_v43  ;;  %v2483_v29 = vand.u32 2147483647, %v2482_v11  ;;  %v10124_v28 = vshrl.u32 %v2568_v40, 30  ;;  %v2626_v33 = vsub.s32 32, %v2625_v42 }
 0x2bf   :  { %12112 = vst [vmem:[#allocation72_spill] sm:$0xff] %v10120_v62  ;;  %v2402_v53 = vsel %vm11874_vm15, nan, %v2401_v7  ;;  %v10127_v45 = vmul.f32 6.2831855, %v12113_v63  ;;  %v10129_v0 = vand.u32 3, %v2496_v24  ;;  %v2619_v25 = vor.u32 8388608, %v2618_v3 }
 0x2c0   :  { %v2486_v15 = vmul.f32 %v2485_v61, %v2483_v29  ;;  %7069 = vst [vmem:[%s11709_s2 + $0x90] sm:$0xff] %v2402_v53  ;;  %7133 = vst [vmem:[%s11709_s2 + $0x290] sm:$0xff] %v2402_v53  ;;  %v2570_v44 = vshll.u32 %v10124_v28, 30  ;;  %v2628_v39 = vshll.u32 %v11985_v17, %v2625_v42  ;;  %v2629_v55 = vshrl.u32 %v11986_v52, %v2626_v33 }
 0x2c1   :  { %12114 = vst [vmem:[#allocation6_spill] sm:$0xff] %v10127_v45  ;;  %v2631_v43 = vshll.u32 %v11986_v52, %v2625_v42  ;;  %v2632_v24 = vshrl.u32 %v11987_v56, %v2626_v33  ;;  %v2635_v3 = vshrl.u32 %v11988_v23, %v2626_v33  ;;  %v2638_v13 = vshrl.u32 %v11989_v27, %v2626_v33 }
 0x2c2   :  { %v2487_v11 = vxor.u32 2147483648, %v2486_v15  ;;  %v10144_v40 = vsub.s32 %v2567_v46, %v2570_v44  ;;  %v2624_v7 = vshrl.u32 %v2623_v20, 5  ;;  %v2634_v29 = vshll.u32 %v11987_v56, %v2625_v42 }
 0x2c3   :  { %v2637_v61 = vshll.u32 %v11988_v23, %v2625_v42  ;;  %v2630_v63 = vor.u32 %v2629_v55, %v2628_v39  ;;  %v2633_v37 = vor.u32 %v2632_v24, %v2631_v43  ;;  %v10150_v19 = vshll.u32 %v2619_v25, 8 }
 0x2c4   :  { %v2488_v53 = vsel %vm2405_vm1, %v2487_v11, %v2486_v15  ;;  %v2573_v26 = vsub.s32 0, %v10144_v40  ;;  %v2636_v46 = vor.u32 %v2635_v3, %v2634_v29  ;;  %v2640_v20 = vshll.u32 %v11989_v27, %v2625_v42 }
 0x2c5   :  { %v2491_v16 = vsel %vm10084_vm6, %v9652_v51, %v2488_v53  ;;  %v2639_v44 = vor.u32 %v2638_v13, %v2637_v61  ;;  %v2641_v12 = vshrl.u32 %v11990_v22, %v2626_v33  ;;  %v2718_v60 = vand.u32 2139095040, %v10120_v62 }
 0x2c6   :  { %7626 = vcosq.f32 %v2491_v16  ;;  %v7232_v15 = vmin.u32 %v2573_v26, %v10144_v40  ;;  %vm2643_vm14 = vcmp.lt.s32.totalorder %v2624_v7, 1  ;;  %vm2646_vm1 = vcmp.lt.s32.totalorder %v2624_v7, 4 }
 0x2c7   :  { %7628 = vsinq.f32 %v2491_v16  ;;  %v2642_v25 = vor.u32 %v2641_v12, %v2640_v20  ;;  %vm2644_vm5 = vcmp.lt.s32.totalorder %v2624_v7, 2  ;;  %v2651_v59 = vsel %vm2643_vm14, %v2630_v63, %v2633_v37 }
 0x2c8   :  { %v2652_v39 = vsel %vm2646_vm1, %v2639_v44, 920167782  ;;  %v2575_v55 = vclz %v7232_v15  ;;  %v2627_v43 = vshrl.u32 %v11985_v17, %v2626_v33  ;;  %vm2645_vm6 = vcmp.lt.s32.totalorder %v2624_v7, 3 }
 0x2c9   :  { %v2648_v11 = vsel %vm2646_vm1, %v2636_v46, 2102212464  ;;  %v2593_v42 = vsub.s32 4, %v10124_v28  ;;  %v2653_v24 = vsel %vm2645_vm6, %v2636_v46, %v2652_v39  ;;  %v2655_v3 = vsel %vm2643_vm14, %v2633_v37, %v2636_v46 }
 0x2ca   :  { %v2656_v13 = vsel %vm2646_vm1, %v2642_v25, 1326507024  ;;  %v7233_v29 = vadd.s32 4294967294, %v2575_v55  ;;  %v2647_v16 = vsel %vm2643_vm14, %v2627_v43, %v2630_v63  ;;  %v2654_v26 = vsel %vm2644_vm5, %v2651_v59, %v2653_v24 }
 0x2cb   :  { %v2657_v61 = vsel %vm2645_vm6, %v2639_v44, %v2656_v13  ;;  %v2649_v53 = vsel %vm2645_vm6, %v2633_v37, %v2648_v11  ;;  %v10165_v20 = vmul.u32.u64.low %v10150_v19, %v2654_v26  ;;  %v10166_v15 = vmul.u32.u64.high %v10150_v19, %v2654_v26, %v10165_v20 }
 0x2cc   :  { %v2658_v12 = vsel %vm2644_vm5, %v2655_v3, %v2657_v61  ;;  %vm11889_vm13 = vweird.f32 %v9652_v51  ;;  %v12115_v33 = vand.u32 2147483647, %v9735_v38  ;;  %vm7234_vm14 = vcmp.lt.s32.totalorder %v7233_v29, 0 }
 0x2cd   :  { %v10177_v63 = vmul.u32.u64.low %v10150_v19, %v2658_v12  ;;  %v10178_v44 = vmul.u32.u64.high %v10150_v19, %v2658_v12, %v10177_v63  ;;  %v2719_v37 = vshrl.u32 %v2718_v60, 23  ;;  %vm2499_vm1 = vcmp.eq.s32.totalorder %v10129_v0, 0 }
 0x2ce   :  { %vm10172_vm9 = vcmp.le.f32.partialorder %v12115_v33, 0.7853982  ;;  %vm2509_vm6 = vcmp.lt.s32.totalorder %v9735_v38, 0  ;;  %v2563_v25 = vadd.s32 %v10067_v35, %v10075_v14  ;;  %v2578_v59 = vsel %vm7234_vm14, 0, %v7233_v29 }
 0x2cf   :  { %v2579_v39 = vsub.s32 32, %v2578_v59  ;;  %v2583_v55 = vsub.s32 4294967266, %v2578_v59  ;;  %v2650_v43 = vsel %vm2644_vm5, %v2647_v16, %v2649_v53  ;;  %v7239_v11 = vadd.s32 4294967169, %v2719_v37 }
 0x2d0   :  { %v10185_v24 = vpop.eup %7626  ;;  %vm2502_vm15 = vcmp.eq.s32.totalorder %v10129_v0, 2  ;;  %v2594_v60 = vsel %vm2509_vm6, %v2593_v42, %v10124_v28  ;;  %v2669_v3 = vadd.s32 1, %v10166_v15  ;;  %v11878_v13 = vand.u32 2147483647, %v10120_v62 }
 0x2d1   :  { %12118 = vst [vmem:[#allocation73_spill] sm:$0xff] %v10185_v24  ;;  %v10193_v26 = vpop.eup %7628  ;;  %v11876_v35 = vxor.u32 2147483648, %v10185_v24  ;;  %v2580_v14 = vshll.u32 %v10144_v40, %v2578_v59  ;;  %v2581_v7 = vshrl.u32 %v2563_v25, %v2579_v39  ;;  %v2584_v29 = vadd.s32 127, %v2583_v55 }
 0x2d2   :  { %12119 = vst [vmem:[#allocation74_spill] sm:$0xff] %v10193_v26  ;;  %v11877_v16 = vxor.u32 2147483648, %v10193_v26  ;;  %v2666_v61 = vmul.u32 %v10150_v19, %v2650_v43  ;;  %vm2668_vm5 = vc.u32 %v10178_v44, %v10165_v20  ;;  %v2725_v28 = vadd.s32 1, %v7239_v11 }
 0x2d3   :  { %v2504_v42 = vsel %vm2502_vm15, %v11876_v35, %v10193_v26  ;;  %v2582_v53 = vor.u32 %v2581_v7, %v2580_v14  ;;  %v2585_v12 = vshll.u32 %v2584_v29, 23  ;;  %v2670_v33 = vsel %vm2668_vm5, %v2669_v3, %v10166_v15  ;;  %v12121_v3 = vld [vmem:[#allocation2_spill] sm:$0xff]  ;;  %v12123_v7 = vld [vmem:[#allocation3_spill] sm:$0xff] }
 0x2d4   :  { %vm2498_vm14 = vcmp.lt.s32.totalorder %v10129_v0, 2  ;;  %v2501_v19 = vsel %vm2499_vm1, %v10185_v24, %v11877_v16  ;;  %v2671_v40 = vadd.s32 %v2670_v33, %v2666_v61  ;;  %vm2726_vm12 = vcmp.gt.s32.totalorder %v2725_v28, 0 }
 0x2d5   :  { %v2505_v63 = vsel %vm2498_vm14, %v2501_v19, %v2504_v42  ;;  %v2586_v37 = vor.u32 4788187, %v2585_v12  ;;  %v2722_v25 = vand.u32 8388607, %v11878_v13  ;;  %v2727_v59 = vsel %vm2726_vm12, %v2725_v28, 0 }
 0x2d6   :  { %v2506_v39 = vsel %vm11889_vm13, nan, %v2505_v63  ;;  %v10217_v15 = vsel %vm10172_vm9, 0, %v2594_v60  ;;  %v2672_v55 = vadd.s32 536870912, %v2671_v40  ;;  %v2729_v43 = vand.u32 31, %v2727_v59 }
 0x2d7   :  { %12120 = vst [vmem:[#allocation75_spill] sm:$0xff] %v10217_v15  ;;  %v2587_v11 = vand.u32 2147483647, %v2586_v37  ;;  %v2589_v0 = vcvt.s32.f32 %v2582_v53  ;;  %7070 = vst [vmem:[%s11709_s2 + $0x98] sm:$0xff] %v2506_v39  ;;  %v10226_v14 = vmul.f32 6.2831855, %v12121_v3  ;;  %vm11938_vm13 = vweird.f32 %v9735_v38 }
 0x2d8   :  { %7134 = vst [vmem:[%s11709_s2 + $0x298] sm:$0xff] %v2506_v39  ;;  %v10229_v29 = vmul.f32 6.2831855, %v12123_v7  ;;  %v10231_v60 = vshrl.u32 %v2672_v55, 30  ;;  %v2730_v61 = vsub.s32 32, %v2729_v43  ;;  %v2600_v42 = vadd.s32 3, %v10217_v15 }
 0x2d9   :  { %12122 = vst [vmem:[#allocation2_spill] sm:$0xff] %v10226_v14  ;;  %v2590_v28 = vmul.f32 %v2589_v0, %v2587_v11  ;;  %v2723_v53 = vor.u32 8388608, %v2722_v25  ;;  %v2822_v12 = vand.u32 2139095040, %v10127_v45  ;;  %v2728_v19 = vshrl.u32 %v2727_v59, 5 }
 0x2da   :  { %12124 = vst [vmem:[#allocation3_spill] sm:$0xff] %v10229_v29  ;;  %v2674_v33 = vshll.u32 %v10231_v60, 30  ;;  %v2732_v63 = vshll.u32 %v11985_v17, %v2729_v43  ;;  %v2733_v37 = vshrl.u32 %v11986_v52, %v2730_v61  ;;  %v2736_v3 = vshrl.u32 %v11987_v56, %v2730_v61 }
 0x2db   :  { %v2591_v39 = vxor.u32 2147483648, %v2590_v28  ;;  %v2739_v55 = vshrl.u32 %v11988_v23, %v2730_v61  ;;  %v2742_v7 = vshrl.u32 %v11989_v27, %v2730_v61  ;;  %v2735_v25 = vshll.u32 %v11986_v52, %v2729_v43 }
 0x2dc   :  { %v10241_v11 = vsub.s32 %v2671_v40, %v2674_v33  ;;  %v2738_v0 = vshll.u32 %v11987_v56, %v2729_v43  ;;  %v2745_v35 = vshrl.u32 %v11990_v22, %v2730_v61  ;;  %v2734_v16 = vor.u32 %v2733_v37, %v2732_v63 }
 0x2dd   :  { %v2592_v59 = vsel %vm2509_vm6, %v2591_v39, %v2590_v28  ;;  %v2741_v13 = vshll.u32 %v11988_v23, %v2729_v43  ;;  %v2744_v51 = vshll.u32 %v11989_v27, %v2729_v43  ;;  %v2737_v33 = vor.u32 %v2736_v3, %v2735_v25 }
 0x2de   :  { %v2595_v24 = vsel %vm10172_vm9, %v9735_v38, %v2592_v59  ;;  %v2677_v40 = vsub.s32 0, %v10241_v11  ;;  %v2740_v26 = vor.u32 %v2739_v55, %v2738_v0  ;;  %v10254_v15 = vand.u32 3, %v2600_v42 }
 0x2df   :  { %7630 = vcosq.f32 %v2595_v24  ;;  %v2743_v47 = vor.u32 %v2742_v7, %v2741_v13  ;;  %v2746_v10 = vor.u32 %v2745_v35, %v2744_v51  ;;  %vm2613_vm12 = vcmp.lt.s32.totalorder %v9834_v48, 0 }
 0x2e0   :  { %7632 = vsinq.f32 %v2595_v24  ;;  %v7236_v28 = vmin.u32 %v2677_v40, %v10241_v11  ;;  %v2763_v63 = vshll.u32 %v2723_v53, 8  ;;  %v2823_v43 = vshrl.u32 %v2822_v12, 23 }
 0x2e1   :  { %v2731_v37 = vshrl.u32 %v11985_v17, %v2730_v61  ;;  %vm2747_vm15 = vcmp.lt.s32.totalorder %v2728_v19, 1  ;;  %vm2748_vm9 = vcmp.lt.s32.totalorder %v2728_v19, 2  ;;  %vm2749_vm1 = vcmp.lt.s32.totalorder %v2728_v19, 3 }
 0x2e2   :  { %v2679_v46 = vclz %v7236_v28  ;;  %vm2750_vm6 = vcmp.lt.s32.totalorder %v2728_v19, 4  ;;  %v2755_v39 = vsel %vm2747_vm15, %v2734_v16, %v2737_v33  ;;  %v2759_v3 = vsel %vm2747_vm15, %v2737_v33, %v2740_v26 }
 0x2e3   :  { %v2751_v42 = vsel %vm2747_vm15, %v2731_v37, %v2734_v16  ;;  %v2752_v55 = vsel %vm2750_vm6, %v2740_v26, 2102212464  ;;  %v2756_v13 = vsel %vm2750_vm6, %v2743_v47, 920167782  ;;  %v2760_v51 = vsel %vm2750_vm6, %v2746_v10, 1326507024 }
 0x2e4   :  { %v12125_v24 = vand.u32 2147483647, %v9834_v48  ;;  %v7237_v53 = vadd.s32 4294967294, %v2679_v46  ;;  %v2753_v12 = vsel %vm2749_vm1, %v2737_v33, %v2752_v55  ;;  %v2757_v61 = vsel %vm2749_vm1, %v2740_v26, %v2756_v13 }
 0x2e5   :  { %v2761_v7 = vsel %vm2749_vm1, %v2743_v47, %v2760_v51  ;;  %vm2602_vm14 = vcmp.lt.s32.totalorder %v10254_v15, 2  ;;  %v2697_v25 = vsub.s32 4, %v10231_v60  ;;  %v2758_v0 = vsel %vm2748_vm9, %v2755_v39, %v2757_v61 }
 0x2e6   :  { %vm10261_vm5 = vcmp.le.f32.partialorder %v12125_v24, 0.7853982  ;;  %v2762_v16 = vsel %vm2748_vm9, %v2759_v3, %v2761_v7  ;;  %v7243_v59 = vadd.s32 4294967169, %v2823_v43  ;;  %vm7238_vm15 = vcmp.lt.s32.totalorder %v7237_v53, 0 }
 0x2e7   :  { %v2754_v10 = vsel %vm2748_vm9, %v2751_v42, %v2753_v12  ;;  %v10270_v40 = vmul.u32.u64.low %v2763_v63, %v2762_v16  ;;  %v10271_v28 = vmul.u32.u64.high %v2763_v63, %v2762_v16, %v10270_v40  ;;  %vm2603_vm6 = vcmp.eq.s32.totalorder %v10254_v15, 0 }
 0x2e8   :  { %v2682_v33 = vsel %vm7238_vm15, 0, %v7237_v53  ;;  %v10274_v26 = vmul.u32.u64.low %v2763_v63, %v2758_v0  ;;  %v10275_v47 = vmul.u32.u64.high %v2763_v63, %v2758_v0, %v10274_v26  ;;  %v2667_v37 = vadd.s32 %v10165_v20, %v10178_v44 }
 0x2e9   :  { %v2683_v46 = vsub.s32 32, %v2682_v33  ;;  %v2687_v39 = vsub.s32 4294967266, %v2682_v33  ;;  %v2829_v3 = vadd.s32 1, %v7243_v59  ;;  %v10280_v43 = vpop.eup %7630  ;;  %vm2606_vm9 = vcmp.eq.s32.totalorder %v10254_v15, 2 }
 0x2ea   :  { %12128 = vst [vmem:[#allocation76_spill] sm:$0xff] %v10280_v43  ;;  %v2698_v19 = vsel %vm2613_vm12, %v2697_v25, %v10231_v60  ;;  %v2770_v42 = vmul.u32 %v2763_v63, %v2754_v10  ;;  %v11892_v55 = vand.u32 2147483647, %v10127_v45  ;;  %v10287_v13 = vpop.eup %7632  ;;  %v11890_v51 = vxor.u32 2147483648, %v10280_v43 }
 0x2eb   :  { %12129 = vst [vmem:[#allocation77_spill] sm:$0xff] %v10287_v13  ;;  %v2684_v20 = vshll.u32 %v10241_v11, %v2682_v33  ;;  %v2685_v44 = vshrl.u32 %v2667_v37, %v2683_v46  ;;  %v2688_v24 = vadd.s32 127, %v2687_v39  ;;  %v11891_v53 = vxor.u32 2147483648, %v10287_v13  ;;  %v12131_v33 = vld [vmem:[#allocation4_spill] sm:$0xff] }
 0x2ec   :  { %vm2772_vm1 = vc.u32 %v10271_v28, %v10274_v26  ;;  %v2773_v12 = vadd.s32 1, %v10275_v47  ;;  %vm2830_vm15 = vcmp.gt.s32.totalorder %v2829_v3, 0  ;;  %v2608_v60 = vsel %vm2606_vm9, %v11890_v51, %v10287_v13 }
 0x2ed   :  { %v2686_v63 = vor.u32 %v2685_v44, %v2684_v20  ;;  %v2689_v61 = vshll.u32 %v2688_v24, 23  ;;  %v2831_v7 = vsel %vm2830_vm15, %v2829_v3, 0  ;;  %v2605_v11 = vsel %vm2603_vm6, %v10280_v43, %v11891_v53 }
 0x2ee   :  { %v10305_v25 = vsel %vm10261_vm5, 0, %v2698_v19  ;;  %v2774_v0 = vsel %vm2772_vm1, %v2773_v12, %v10275_v47  ;;  %v2833_v16 = vand.u32 31, %v2831_v7  ;;  %v2609_v59 = vsel %vm2602_vm14, %v2605_v11, %v2608_v60 }
 0x2ef   :  { %12130 = vst [vmem:[#allocation78_spill] sm:$0xff] %v10305_v25  ;;  %v2690_v10 = vor.u32 4788187, %v2689_v61  ;;  %v2775_v40 = vadd.s32 %v2774_v0, %v2770_v42  ;;  %v10312_v37 = vmul.f32 6.2831855, %v12131_v33  ;;  %v2610_v46 = vsel %vm11938_vm13, nan, %v2609_v59 }
 0x2f0   :  { %v2826_v39 = vand.u32 8388607, %v11892_v55  ;;  %v2834_v3 = vsub.s32 32, %v2833_v16  ;;  %v2693_v47 = vcvt.s32.f32 %v2686_v63  ;;  %v2704_v20 = vadd.s32 3, %v10305_v25  ;;  %7071 = vst [vmem:[%s11709_s2 + $0xa0] sm:$0xff] %v2610_v46  ;;  %7135 = vst [vmem:[%s11709_s2 + $0x2a0] sm:$0xff] %v2610_v46 }
 0x2f1   :  { %12132 = vst [vmem:[#allocation4_spill] sm:$0xff] %v10312_v37  ;;  %v2691_v19 = vand.u32 2147483647, %v2690_v10  ;;  %v2776_v44 = vadd.s32 536870912, %v2775_v40  ;;  %v2832_v15 = vshrl.u32 %v2831_v7, 5  ;;  %v2836_v61 = vshll.u32 %v11985_v17, %v2833_v16 }
 0x2f2   :  { %v2837_v42 = vshrl.u32 %v11986_v52, %v2834_v3  ;;  %v2840_v24 = vshrl.u32 %v11987_v56, %v2834_v3  ;;  %v2843_v12 = vshrl.u32 %v11988_v23, %v2834_v3  ;;  %v2846_v11 = vshrl.u32 %v11989_v27, %v2834_v3 }
 0x2f3   :  { %v2694_v60 = vmul.f32 %v2693_v47, %v2691_v19  ;;  %v2777_v63 = vshrl.u32 %v2776_v44, 30  ;;  %v2839_v0 = vshll.u32 %v11986_v52, %v2833_v16  ;;  %v2842_v59 = vshll.u32 %v11987_v56, %v2833_v16 }
 0x2f4   :  { %v2845_v10 = vshll.u32 %v11988_v23, %v2833_v16  ;;  %v2849_v7 = vshrl.u32 %v11990_v22, %v2834_v3  ;;  %v10334_v46 = vand.u32 3, %v2704_v20  ;;  %v2848_v53 = vshll.u32 %v11989_v27, %v2833_v16 }
 0x2f5   :  { %v2695_v33 = vxor.u32 2147483648, %v2694_v60  ;;  %v2778_v51 = vshll.u32 %v2777_v63, 30  ;;  %vm2717_vm14 = vcmp.lt.s32.totalorder %v10120_v62, 0  ;;  %v2838_v19 = vor.u32 %v2837_v42, %v2836_v61 }
 0x2f6   :  { %v2841_v47 = vor.u32 %v2840_v24, %v2839_v0  ;;  %v2844_v44 = vor.u32 %v2843_v12, %v2842_v59  ;;  %v2847_v55 = vor.u32 %v2846_v11, %v2845_v10  ;;  %v2827_v13 = vor.u32 8388608, %v2826_v39 }
 0x2f7   :  { %v2696_v38 = vsel %vm2613_vm12, %v2695_v33, %v2694_v60  ;;  %v10340_v43 = vsub.s32 %v2775_v40, %v2778_v51  ;;  %v2926_v25 = vand.u32 2139095040, %v10226_v14  ;;  %v2835_v16 = vshrl.u32 %v11985_v17, %v2834_v3 }
 0x2f8   :  { %v2699_v20 = vsel %vm10261_vm5, %v9834_v48, %v2696_v38  ;;  %v2850_v32 = vor.u32 %v2849_v7, %v2848_v53  ;;  %vm2851_vm6 = vcmp.lt.s32.totalorder %v2832_v15, 1  ;;  %vm2853_vm9 = vcmp.lt.s32.totalorder %v2832_v15, 3 }
 0x2f9   :  { %7634 = vcosq.f32 %v2699_v20  ;;  %v2781_v42 = vsub.s32 0, %v10340_v43  ;;  %vm2854_vm1 = vcmp.lt.s32.totalorder %v2832_v15, 4  ;;  %v2859_v51 = vsel %vm2851_vm6, %v2838_v19, %v2841_v47 }
 0x2fa   :  { %7636 = vsinq.f32 %v2699_v20  ;;  %v2856_v24 = vsel %vm2854_vm1, %v2844_v44, 2102212464  ;;  %v2860_v40 = vsel %vm2854_vm1, %v2847_v55, 920167782  ;;  %v2801_v12 = vsub.s32 4, %v2777_v63 }
 0x2fb   :  { %v7240_v39 = vmin.u32 %v2781_v42, %v10340_v43  ;;  %vm2852_vm12 = vcmp.lt.s32.totalorder %v2832_v15, 2  ;;  %v2861_v38 = vsel %vm2853_vm9, %v2844_v44, %v2860_v40  ;;  %v2863_v53 = vsel %vm2851_vm6, %v2841_v47, %v2844_v44 }
 0x2fc   :  { %v2862_v35 = vsel %vm2852_vm12, %v2859_v51, %v2861_v38  ;;  %v2864_v3 = vsel %vm2854_vm1, %v2850_v32, 1326507024  ;;  %v2867_v60 = vshll.u32 %v2827_v13, 8  ;;  %v12133_v61 = vand.u32 2147483647, %v10120_v62 }
 0x2fd   :  { %v2783_v0 = vclz %v7240_v39  ;;  %v2855_v59 = vsel %vm2851_vm6, %v2835_v16, %v2838_v19  ;;  %v2857_v10 = vsel %vm2853_vm9, %v2841_v47, %v2856_v24  ;;  %v2865_v7 = vsel %vm2853_vm9, %v2847_v55, %v2864_v3 }
 0x2fe   :  { %vm10355_vm5 = vcmp.le.f32.partialorder %v12133_v61, 0.7853982  ;;  %v10362_v33 = vmul.u32.u64.low %v2867_v60, %v2862_v35  ;;  %v10363_v20 = vmul.u32.u64.high %v2867_v60, %v2862_v35, %v10362_v33  ;;  %v2927_v44 = vshrl.u32 %v2926_v25, 23 }
 0x2ff   :  { %vm2706_vm15 = vcmp.lt.s32.totalorder %v10334_v46, 2  ;;  %v7241_v32 = vadd.s32 4294967294, %v2783_v0  ;;  %v2802_v13 = vsel %vm2717_vm14, %v2801_v12, %v2777_v63  ;;  %v2866_v42 = vsel %vm2852_vm12, %v2863_v53, %v2865_v7 }
 0x300   :  { %v2858_v51 = vsel %vm2852_vm12, %v2855_v59, %v2857_v10  ;;  %v10371_v19 = vmul.u32.u64.low %v2867_v60, %v2866_v42  ;;  %v10372_v16 = vmul.u32.u64.high %v2867_v60, %v2866_v42, %v10371_v19  ;;  %v7247_v47 = vadd.s32 4294967169, %v2927_v44 }
 0x301   :  { %vm2707_vm6 = vcmp.eq.s32.totalorder %v10334_v46, 0  ;;  %vm2710_vm9 = vcmp.eq.s32.totalorder %v10334_v46, 2  ;;  %vm7242_vm1 = vcmp.lt.s32.totalorder %v7241_v32, 0  ;;  %v11902_v55 = vand.u32 2147483647, %v10226_v14 }
 0x302   :  { %v2771_v25 = vadd.s32 %v10274_v26, %v10271_v28  ;;  %v2786_v24 = vsel %vm7242_vm1, 0, %v7241_v32  ;;  %v2877_v63 = vadd.s32 1, %v10363_v20  ;;  %v2933_v40 = vadd.s32 1, %v7247_v47  ;;  %v12139_v47 = vld [vmem:[#allocation5_spill] sm:$0xff] }
 0x303   :  { %v10380_v15 = vpop.eup %7634  ;;  %v2787_v39 = vsub.s32 32, %v2786_v24  ;;  %v2791_v12 = vsub.s32 4294967266, %v2786_v24  ;;  %v10384_v38 = vsel %vm10355_vm5, 0, %v2802_v13  ;;  %v2874_v35 = vmul.u32 %v2867_v60, %v2858_v51 }
 0x304   :  { %12136 = vst [vmem:[#allocation79_spill] sm:$0xff] %v10380_v15  ;;  %12137 = vst [vmem:[#allocation80_spill] sm:$0xff] %v10384_v38  ;;  %v10386_v53 = vpop.eup %7636  ;;  %v11900_v3 = vxor.u32 2147483648, %v10380_v15  ;;  %v2788_v61 = vshll.u32 %v10340_v43, %v2786_v24  ;;  %vm2876_vm12 = vc.u32 %v10372_v16, %v10362_v33  ;;  %vm2934_vm1 = vcmp.gt.s32.totalorder %v2933_v40, 0 }
 0x305   :  { %12138 = vst [vmem:[#allocation81_spill] sm:$0xff] %v10386_v53  ;;  %v11901_v28 = vxor.u32 2147483648, %v10386_v53  ;;  %v2789_v26 = vshrl.u32 %v2771_v25, %v2787_v39  ;;  %v2792_v0 = vadd.s32 127, %v2791_v12  ;;  %v2878_v59 = vsel %vm2876_vm12, %v2877_v63, %v10363_v20 }
 0x306   :  { %v2712_v60 = vsel %vm2710_vm9, %v11900_v3, %v10386_v53  ;;  %v2879_v10 = vadd.s32 %v2878_v59, %v2874_v35  ;;  %v2930_v43 = vand.u32 8388607, %v11902_v55  ;;  %v2935_v7 = vsel %vm2934_vm1, %v2933_v40, 0 }
 0x307   :  { %v2709_v44 = vsel %vm2707_vm6, %v10380_v15, %v11901_v28  ;;  %v2790_v32 = vor.u32 %v2789_v26, %v2788_v61  ;;  %v2793_v13 = vshll.u32 %v2792_v0, 23  ;;  %v3030_v20 = vand.u32 2139095040, %v10229_v29 }
 0x308   :  { %vm11909_vm12 = vweird.f32 %v9834_v48  ;;  %v2713_v42 = vsel %vm2706_vm15, %v2709_v44, %v2712_v60  ;;  %v2880_v51 = vadd.s32 536870912, %v2879_v10  ;;  %v2937_v19 = vand.u32 31, %v2935_v7 }
 0x309   :  { %v10411_v25 = vmul.f32 6.2831855, %v12139_v47  ;;  %v2714_v24 = vsel %vm11909_vm12, nan, %v2713_v42  ;;  %v2794_v63 = vor.u32 4788187, %v2793_v13  ;;  %v10416_v40 = vadd.s32 3, %v10384_v38 }
 0x30a   :  { %v2881_v39 = vshrl.u32 %v2880_v51, 30  ;;  %v2931_v12 = vor.u32 8388608, %v2930_v43  ;;  %v2938_v35 = vsub.s32 32, %v2937_v19  ;;  %7072 = vst [vmem:[%s11709_s2 + $0xa8] sm:$0xff] %v2714_v24  ;;  %7136 = vst [vmem:[%s11709_s2 + $0x2a8] sm:$0xff] %v2714_v24  ;;  %v2797_v61 = vcvt.s32.f32 %v2790_v32 }
 0x30b   :  { %12140 = vst [vmem:[#allocation5_spill] sm:$0xff] %v10411_v25  ;;  %v2795_v46 = vand.u32 2147483647, %v2794_v63  ;;  %v10424_v26 = vshrl.u32 %v2935_v7, 5  ;;  %v3031_v0 = vshrl.u32 %v3030_v20, 23  ;;  %vm2821_vm15 = vcmp.lt.s32.totalorder %v10127_v45, 0 }
 0x30c   :  { %v2882_v59 = vshll.u32 %v2881_v39, 30  ;;  %v2940_v60 = vshll.u32 %v11985_v17, %v2937_v19  ;;  %v2941_v43 = vshrl.u32 %v11986_v52, %v2938_v35  ;;  %v2943_v44 = vshll.u32 %v11986_v52, %v2937_v19 }
 0x30d   :  { %v2798_v13 = vmul.f32 %v2797_v61, %v2795_v46  ;;  %v2944_v42 = vshrl.u32 %v11987_v56, %v2938_v35  ;;  %v2947_v51 = vshrl.u32 %v11988_v23, %v2938_v35  ;;  %v2950_v47 = vshrl.u32 %v11989_v27, %v2938_v35 }
 0x30e   :  { %v10433_v32 = vsub.s32 %v2879_v10, %v2882_v59  ;;  %v2946_v7 = vshll.u32 %v11987_v56, %v2937_v19  ;;  %v2949_v20 = vshll.u32 %v11988_v23, %v2937_v19  ;;  %v2953_v24 = vshrl.u32 %v11990_v22, %v2938_v35 }
 0x30f   :  { %v2799_v63 = vxor.u32 2147483648, %v2798_v13  ;;  %v2942_v3 = vor.u32 %v2941_v43, %v2940_v60  ;;  %v2945_v28 = vor.u32 %v2944_v42, %v2943_v44  ;;  %v10438_v55 = vshll.u32 %v2931_v12, 8 }
 0x310   :  { %v12141_v46 = vand.u32 2147483647, %v10127_v45  ;;  %v2885_v10 = vsub.s32 0, %v10433_v32  ;;  %v2948_v59 = vor.u32 %v2947_v51, %v2946_v7  ;;  %v2951_v48 = vor.u32 %v2950_v47, %v2949_v20 }
 0x311   :  { %v2952_v38 = vshll.u32 %v11989_v27, %v2937_v19  ;;  %v2800_v15 = vsel %vm2717_vm14, %v2799_v63, %v2798_v13  ;;  %v2905_v53 = vsub.s32 4, %v2881_v39  ;;  %vm2955_vm9 = vcmp.lt.s32.totalorder %v10424_v26, 1 }
 0x312   :  { %vm10442_vm6 = vcmp.le.f32.partialorder %v12141_v46, 0.7853982  ;;  %v7251_v12 = vadd.s32 4294967169, %v3031_v0  ;;  %v2803_v60 = vsel %vm10355_vm5, %v10120_v62, %v2800_v15  ;;  %v7244_v43 = vmin.u32 %v2885_v10, %v10433_v32 }
 0x313   :  { %v2954_v44 = vor.u32 %v2953_v24, %v2952_v38  ;;  %vm2958_vm1 = vcmp.lt.s32.totalorder %v10424_v26, 4  ;;  %7638 = vcosq.f32 %v2803_v60  ;;  %v2939_v42 = vshrl.u32 %v11985_v17, %v2938_v35 }
 0x314   :  { %v2963_v19 = vsel %vm2955_vm9, %v2942_v3, %v2945_v28  ;;  %v2964_v13 = vsel %vm2958_vm1, %v2951_v48, 920167782  ;;  %7640 = vsinq.f32 %v2803_v60  ;;  %v2887_v0 = vclz %v7244_v43 }
 0x315   :  { %vm2957_vm14 = vcmp.lt.s32.totalorder %v10424_v26, 3  ;;  %v2960_v11 = vsel %vm2958_vm1, %v2948_v59, 2102212464  ;;  %v2906_v15 = vsel %vm2821_vm15, %v2905_v53, %v2881_v39  ;;  %vm2956_vm5 = vcmp.lt.s32.totalorder %v10424_v26, 2 }
 0x316   :  { %v2965_v38 = vsel %vm2957_vm14, %v2948_v59, %v2964_v13  ;;  %v2967_v35 = vsel %vm2955_vm9, %v2945_v28, %v2948_v59  ;;  %v7245_v51 = vadd.s32 4294967294, %v2887_v0  ;;  %v2959_v47 = vsel %vm2955_vm9, %v2939_v42, %v2942_v3 }
 0x317   :  { %v2966_v7 = vsel %vm2956_vm5, %v2963_v19, %v2965_v38  ;;  %v2968_v20 = vsel %vm2958_vm1, %v2954_v44, 1326507024  ;;  %v2961_v24 = vsel %vm2957_vm14, %v2945_v28, %v2960_v11  ;;  %v2875_v46 = vadd.s32 %v10362_v33, %v10372_v16 }
 0x318   :  { %v2969_v63 = vsel %vm2957_vm14, %v2951_v48, %v2968_v20  ;;  %v10476_v53 = vmul.u32.u64.low %v10438_v55, %v2966_v7  ;;  %v10477_v39 = vmul.u32.u64.high %v10438_v55, %v2966_v7, %v10476_v53  ;;  %vm7246_vm12 = vcmp.lt.s32.totalorder %v7245_v51, 0 }
 0x319   :  { %v2970_v3 = vsel %vm2956_vm5, %v2967_v35, %v2969_v63  ;;  %v3037_v10 = vadd.s32 1, %v7251_v12  ;;  %v2890_v59 = vsel %vm7246_vm12, 0, %v7245_v51  ;;  %v10486_v60 = vsel %vm10442_vm6, 0, %v2906_v15 }
 0x31a   :  { %12144 = vst [vmem:[#allocation82_spill] sm:$0xff] %v10486_v60  ;;  %v10489_v48 = vmul.u32.u64.low %v10438_v55, %v2970_v3  ;;  %v10490_v28 = vmul.u32.u64.high %v10438_v55, %v2970_v3, %v10489_v48  ;;  %v2891_v43 = vsub.s32 32, %v2890_v59  ;;  %v2895_v44 = vsub.s32 4294967266, %v2890_v59 }
 0x31b   :  { %v2962_v42 = vsel %vm2956_vm5, %v2959_v47, %v2961_v24  ;;  %vm3038_vm9 = vcmp.gt.s32.totalorder %v3037_v10, 0  ;;  %vm11918_vm1 = vweird.f32 %v10120_v62  ;;  %v2809_v33 = vand.u32 3, %v10416_v40 }
 0x31c   :  { %v2981_v16 = vadd.s32 1, %v10477_v39  ;;  %v3039_v12 = vsel %vm3038_vm9, %v3037_v10, 0  ;;  %v2892_v19 = vshll.u32 %v10433_v32, %v2890_v59  ;;  %v2893_v13 = vshrl.u32 %v2875_v46, %v2891_v43 }
 0x31d   :  { %v2896_v0 = vadd.s32 127, %v2895_v44  ;;  %v3041_v11 = vand.u32 31, %v3039_v12  ;;  %v10498_v15 = vpop.eup %7638  ;;  %v2912_v38 = vadd.s32 3, %v10486_v60  ;;  %v2978_v26 = vmul.u32 %v10438_v55, %v2962_v42 }
 0x31e   :  { %12145 = vst [vmem:[#allocation83_spill] sm:$0xff] %v10498_v15  ;;  %vm2980_vm12 = vc.u32 %v10490_v28, %v10476_v53  ;;  %v11912_v35 = vand.u32 2147483647, %v10229_v29  ;;  %v10505_v40 = vpop.eup %7640  ;;  %v11910_v51 = vxor.u32 2147483648, %v10498_v15  ;;  %v2894_v47 = vor.u32 %v2893_v13, %v2892_v19 }
 0x31f   :  { %12146 = vst [vmem:[#allocation84_spill] sm:$0xff] %v10505_v40  ;;  %v2897_v32 = vshll.u32 %v2896_v0, 23  ;;  %v2982_v7 = vsel %vm2980_vm12, %v2981_v16, %v10477_v39  ;;  %v11911_v20 = vxor.u32 2147483648, %v10505_v40  ;;  %vm2814_vm14 = vcmp.eq.s32.totalorder %v2809_v33, 2 }
 0x320   :  { %v2983_v24 = vadd.s32 %v2982_v7, %v2978_v26  ;;  %v3042_v63 = vsub.s32 32, %v3041_v11  ;;  %vm2810_vm5 = vcmp.lt.s32.totalorder %v2809_v33, 2  ;;  %vm2811_vm9 = vcmp.eq.s32.totalorder %v2809_v33, 0 }
 0x321   :  { %v2816_v55 = vsel %vm2814_vm14, %v11910_v51, %v10505_v40  ;;  %v2898_v46 = vor.u32 4788187, %v2897_v32  ;;  %v2813_v3 = vsel %vm2811_vm9, %v10498_v15, %v11911_v20  ;;  %v10516_v10 = vand.u32 3, %v2912_v38 }
 0x322   :  { %v2984_v59 = vadd.s32 536870912, %v2983_v24  ;;  %v3034_v39 = vand.u32 8388607, %v11912_v35  ;;  %v2817_v48 = vsel %vm2810_vm5, %v2813_v3, %v2816_v55  ;;  %v2901_v44 = vcvt.s32.f32 %v2894_v47 }
 0x323   :  { %v2899_v43 = vand.u32 2147483647, %v2898_v46  ;;  %v3045_v42 = vshrl.u32 %v11986_v52, %v3042_v63  ;;  %v2818_v33 = vsel %vm11918_vm1, nan, %v2817_v48  ;;  %v3048_v19 = vshrl.u32 %v11987_v56, %v3042_v63 }
 0x324   :  { %v2985_v16 = vshrl.u32 %v2984_v59, 30  ;;  %v3051_v13 = vshrl.u32 %v11988_v23, %v3042_v63  ;;  %vm2925_vm12 = vcmp.lt.s32.totalorder %v10226_v14, 0  ;;  %v3040_v38 = vshrl.u32 %v3039_v12, 5  ;;  %7073 = vst [vmem:[%s11709_s2 + $0xb0] sm:$0xff] %v2818_v33  ;;  %7137 = vst [vmem:[%s11709_s2 + $0x2b0] sm:$0xff] %v2818_v33 }
 0x325   :  { %v2902_v0 = vmul.f32 %v2901_v44, %v2899_v43  ;;  %v3053_v26 = vshll.u32 %v11988_v23, %v3041_v11  ;;  %v3054_v32 = vshrl.u32 %v11989_v27, %v3042_v63  ;;  %v3044_v7 = vshll.u32 %v11985_v17, %v3041_v11 }
 0x326   :  { %v2986_v47 = vshll.u32 %v2985_v16, 30  ;;  %v3047_v55 = vshll.u32 %v11986_v52, %v3041_v11  ;;  %v3050_v46 = vshll.u32 %v11987_v56, %v3041_v11  ;;  %v3056_v59 = vshll.u32 %v11989_v27, %v3041_v11 }
 0x327   :  { %v2903_v12 = vxor.u32 2147483648, %v2902_v0  ;;  %v3055_v3 = vor.u32 %v3054_v32, %v3053_v26  ;;  %v3057_v48 = vshrl.u32 %v11990_v22, %v3042_v63  ;;  %v12147_v43 = vand.u32 2147483647, %v10226_v14 }
 0x328   :  { %v10545_v33 = vsub.s32 %v2983_v24, %v2986_v47  ;;  %v3046_v51 = vor.u32 %v3045_v42, %v3044_v7  ;;  %v3049_v20 = vor.u32 %v3048_v19, %v3047_v55  ;;  %v3052_v35 = vor.u32 %v3051_v13, %v3050_v46 }
 0x329   :  { %vm10541_vm14 = vcmp.le.f32.partialorder %v12147_v43, 0.7853982  ;;  %v2904_v62 = vsel %vm2821_vm15, %v2903_v12, %v2902_v0  ;;  %v3035_v15 = vor.u32 8388608, %v3034_v39  ;;  %v3043_v26 = vshrl.u32 %v11985_v17, %v3042_v63 }
 0x32a   :  { %v3058_v11 = vor.u32 %v3057_v48, %v3056_v59  ;;  %v2907_v32 = vsel %vm10442_vm6, %v10127_v45, %v2904_v62  ;;  %v2989_v43 = vsub.s32 0, %v10545_v33  ;;  %v3009_v40 = vsub.s32 4, %v2985_v16 }
 0x32b   :  { %vm3062_vm5 = vcmp.lt.s32.totalorder %v3040_v38, 4  ;;  %7642 = vcosq.f32 %v2907_v32  ;;  %vm3059_vm9 = vcmp.lt.s32.totalorder %v3040_v38, 1  ;;  %vm3061_vm1 = vcmp.lt.s32.totalorder %v3040_v38, 3 }
 0x32c   :  { %v3068_v24 = vsel %vm3062_vm5, %v3055_v3, 920167782  ;;  %7644 = vsinq.f32 %v2907_v32  ;;  %v7248_v42 = vmin.u32 %v2989_v43, %v10545_v33  ;;  %v3064_v19 = vsel %vm3062_vm5, %v3052_v35, 2102212464 }
 0x32d   :  { %v3067_v39 = vsel %vm3059_vm9, %v3046_v51, %v3049_v20  ;;  %v3069_v63 = vsel %vm3061_vm1, %v3052_v35, %v3068_v24  ;;  %v3071_v13 = vsel %vm3059_vm9, %v3049_v20, %v3052_v35  ;;  %v3072_v0 = vsel %vm3062_vm5, %v3058_v11, 1326507024 }
 0x32e   :  { %v3075_v47 = vshll.u32 %v3035_v15, 8  ;;  %v2991_v61 = vclz %v7248_v42  ;;  %v3010_v62 = vsel %vm2925_vm12, %v3009_v40, %v2985_v16  ;;  %vm3060_vm15 = vcmp.lt.s32.totalorder %v3040_v38, 2 }
 0x32f   :  { %v3063_v7 = vsel %vm3059_vm9, %v3043_v26, %v3046_v51  ;;  %v3065_v55 = vsel %vm3061_vm1, %v3049_v20, %v3064_v19  ;;  %v3070_v46 = vsel %vm3060_vm15, %v3067_v39, %v3069_v63  ;;  %v3073_v12 = vsel %vm3061_vm1, %v3055_v3, %v3072_v0 }
 0x330   :  { %v3134_v59 = vand.u32 2139095040, %v10312_v37  ;;  %v7249_v48 = vadd.s32 4294967294, %v2991_v61  ;;  %v3074_v32 = vsel %vm3060_vm15, %v3071_v13, %v3073_v12  ;;  %v10567_v15 = vsel %vm10541_vm14, 0, %v3010_v62 }
 0x331   :  { %v10561_v43 = vmul.u32.u64.low %v3075_v47, %v3070_v46  ;;  %v10562_v24 = vmul.u32.u64.high %v3075_v47, %v3070_v46, %v10561_v43  ;;  %12150 = vst [vmem:[#allocation85_spill] sm:$0xff] %v10567_v15  ;;  %v10569_v35 = vmul.u32.u64.low %v3075_v47, %v3074_v32  ;;  %v10570_v40 = vmul.u32.u64.high %v3075_v47, %v3074_v32, %v10569_v35 }
 0x332   :  { %v3135_v51 = vshrl.u32 %v3134_v59, 23  ;;  %vm2915_vm6 = vcmp.eq.s32.totalorder %v10516_v10, 0  ;;  %vm2918_vm1 = vcmp.eq.s32.totalorder %v10516_v10, 2  ;;  %vm7250_vm5 = vcmp.lt.s32.totalorder %v7249_v48, 0 }
 0x333   :  { %v3066_v20 = vsel %vm3060_vm15, %v3063_v7, %v3065_v55  ;;  %v2979_v16 = vadd.s32 %v10476_v53, %v10490_v28  ;;  %v2994_v38 = vsel %vm7250_vm5, 0, %v7249_v48  ;;  %v11921_v3 = vand.u32 2147483647, %v10312_v37 }
 0x334   :  { %v7255_v26 = vadd.s32 4294967169, %v3135_v51  ;;  %v2995_v11 = vsub.s32 32, %v2994_v38  ;;  %v2999_v42 = vsub.s32 4294967266, %v2994_v38  ;;  %v3016_v19 = vadd.s32 3, %v10567_v15 }
 0x335   :  { %v3085_v39 = vadd.s32 1, %v10562_v24  ;;  %v10579_v63 = vpop.eup %7642  ;;  %v2996_v13 = vshll.u32 %v10545_v33, %v2994_v38  ;;  %v3082_v0 = vmul.u32 %v3075_v47, %v3066_v20  ;;  %vm3084_vm9 = vc.u32 %v10570_v40, %v10561_v43  ;;  %v12153_v20 = vld [vmem:[#allocation7_spill] sm:$0xff] }
 0x336   :  { %12151 = vst [vmem:[#allocation86_spill] sm:$0xff] %v10579_v63  ;;  %v3141_v61 = vadd.s32 1, %v7255_v26  ;;  %v10584_v53 = vpop.eup %7644  ;;  %v11919_v28 = vxor.u32 2147483648, %v10579_v63  ;;  %v2997_v62 = vshrl.u32 %v2979_v16, %v2995_v11  ;;  %v3000_v7 = vadd.s32 127, %v2999_v42 }
 0x337   :  { %12152 = vst [vmem:[#allocation87_spill] sm:$0xff] %v10584_v53  ;;  %v3086_v55 = vsel %vm3084_vm9, %v3085_v39, %v10562_v24  ;;  %v11920_v46 = vxor.u32 2147483648, %v10584_v53  ;;  %v3138_v59 = vand.u32 8388607, %v11921_v3  ;;  %vm2914_vm5 = vcmp.lt.s32.totalorder %v10516_v10, 2 }
 0x338   :  { %v3087_v12 = vadd.s32 %v3086_v55, %v3082_v0  ;;  %vm3142_vm15 = vcmp.gt.s32.totalorder %v3141_v61, 0  ;;  %v2920_v33 = vsel %vm2918_vm1, %v11919_v28, %v10584_v53  ;;  %v2998_v47 = vor.u32 %v2997_v62, %v2996_v13 }
 0x339   :  { %v3001_v48 = vshll.u32 %v3000_v7, 23  ;;  %v3143_v32 = vsel %vm3142_vm15, %v3141_v61, 0  ;;  %v2917_v24 = vsel %vm2915_vm6, %v10579_v63, %v11920_v46  ;;  %v10603_v16 = vmul.f32 6.2831855, %v12153_v20 }
 0x33a   :  { %v3088_v35 = vadd.s32 536870912, %v3087_v12  ;;  %v3145_v51 = vand.u32 31, %v3143_v32  ;;  %vm11927_vm9 = vweird.f32 %v10127_v45  ;;  %v2921_v38 = vsel %vm2914_vm5, %v2917_v24, %v2920_v33 }
 0x33b   :  { %v3002_v26 = vor.u32 4788187, %v3001_v48  ;;  %v2922_v11 = vsel %vm11927_vm9, nan, %v2921_v38  ;;  %v3139_v39 = vor.u32 8388608, %v3138_v59  ;;  %v3005_v61 = vcvt.s32.f32 %v2998_v47 }
 0x33c   :  { %v10608_v42 = vshrl.u32 %v3088_v35, 30  ;;  %v3146_v13 = vsub.s32 32, %v3145_v51  ;;  %v10610_v10 = vand.u32 3, %v3016_v19  ;;  %7074 = vst [vmem:[%s11709_s2 + $0xb8] sm:$0xff] %v2922_v11  ;;  %7138 = vst [vmem:[%s11709_s2 + $0x2b8] sm:$0xff] %v2922_v11  ;;  %v3148_v55 = vshll.u32 %v11985_v17, %v3145_v51 }
 0x33d   :  { %v3003_v0 = vand.u32 2147483647, %v3002_v26  ;;  %v3238_v33 = vand.u32 2139095040, %v10411_v25  ;;  %v3144_v20 = vshrl.u32 %v3143_v32, 5  ;;  %v3151_v38 = vshll.u32 %v11986_v52, %v3145_v51 }
 0x33e   :  { %v3090_v7 = vshll.u32 %v10608_v42, 30  ;;  %v3149_v59 = vshrl.u32 %v11986_v52, %v3146_v13  ;;  %v3152_v47 = vshrl.u32 %v11987_v56, %v3146_v13  ;;  %v3155_v48 = vshrl.u32 %v11988_v23, %v3146_v13 }
 0x33f   :  { %v3006_v19 = vmul.f32 %v3005_v61, %v3003_v0  ;;  %v3158_v24 = vshrl.u32 %v11989_v27, %v3146_v13  ;;  %v10629_v26 = vshll.u32 %v3139_v39, 8  ;;  %v3154_v46 = vshll.u32 %v11987_v56, %v3145_v51 }
 0x340   :  { %v10626_v35 = vsub.s32 %v3087_v12, %v3090_v7  ;;  %v3150_v28 = vor.u32 %v3149_v59, %v3148_v55  ;;  %v3157_v3 = vshll.u32 %v11988_v23, %v3145_v51  ;;  %v3153_v61 = vor.u32 %v3152_v47, %v3151_v38 }
 0x341   :  { %v3007_v11 = vxor.u32 2147483648, %v3006_v19  ;;  %v3160_v62 = vshll.u32 %v11989_v27, %v3145_v51  ;;  %v3161_v45 = vshrl.u32 %v11990_v22, %v3146_v13  ;;  %vm3029_vm6 = vcmp.lt.s32.totalorder %v10229_v29, 0 }
 0x342   :  { %v3093_v0 = vsub.s32 0, %v10626_v35  ;;  %v3156_v32 = vor.u32 %v3155_v48, %v3154_v46  ;;  %v3159_v39 = vor.u32 %v3158_v24, %v3157_v3  ;;  %v3239_v7 = vshrl.u32 %v3238_v33, 23 }
 0x343   :  { %v3008_v12 = vsel %vm2925_vm12, %v3007_v11, %v3006_v19  ;;  %v3113_v47 = vsub.s32 4, %v10608_v42  ;;  %v3162_v38 = vor.u32 %v3161_v45, %v3160_v62  ;;  %v3147_v51 = vshrl.u32 %v11985_v17, %v3146_v13 }
 0x344   :  { %v3011_v55 = vsel %vm10541_vm14, %v10226_v14, %v3008_v12  ;;  %v7252_v59 = vmin.u32 %v3093_v0, %v10626_v35  ;;  %vm3163_vm1 = vcmp.lt.s32.totalorder %v3144_v20, 1  ;;  %vm3164_vm15 = vcmp.lt.s32.totalorder %v3144_v20, 2 }
 0x345   :  { %7646 = vcosq.f32 %v3011_v55  ;;  %vm3166_vm12 = vcmp.lt.s32.totalorder %v3144_v20, 4  ;;  %v3171_v46 = vsel %vm3163_vm1, %v3150_v28, %v3153_v61  ;;  %vm3165_vm5 = vcmp.lt.s32.totalorder %v3144_v20, 3 }
 0x346   :  { %7648 = vsinq.f32 %v3011_v55  ;;  %v3095_v19 = vclz %v7252_v59  ;;  %v3168_v3 = vsel %vm3166_vm12, %v3156_v32, 2102212464  ;;  %v3172_v33 = vsel %vm3166_vm12, %v3159_v39, 920167782 }
 0x347   :  { %v3175_v48 = vsel %vm3163_vm1, %v3153_v61, %v3156_v32  ;;  %v3167_v24 = vsel %vm3163_vm1, %v3147_v51, %v3150_v28  ;;  %v3173_v11 = vsel %vm3165_vm5, %v3156_v32, %v3172_v33  ;;  %v3176_v0 = vsel %vm3166_vm12, %v3162_v38, 1326507024 }
 0x348   :  { %v7253_v44 = vadd.s32 4294967294, %v3095_v19  ;;  %v3169_v12 = vsel %vm3165_vm5, %v3153_v61, %v3168_v3  ;;  %v3174_v45 = vsel %vm3164_vm15, %v3171_v46, %v3173_v11  ;;  %v3177_v62 = vsel %vm3165_vm5, %v3159_v39, %v3176_v0 }
 0x349   :  { %v7259_v63 = vadd.s32 4294967169, %v3239_v7  ;;  %v3178_v13 = vsel %vm3164_vm15, %v3175_v48, %v3177_v62  ;;  %v10648_v55 = vmul.u32.u64.low %v10629_v26, %v3174_v45  ;;  %v10649_v59 = vmul.u32.u64.high %v10629_v26, %v3174_v45, %v10648_v55 }
 0x34a   :  { %vm7254_vm14 = vcmp.lt.s32.totalorder %v7253_v44, 0  ;;  %v3083_v53 = vadd.s32 %v10561_v43, %v10570_v40  ;;  %v10655_v28 = vmul.u32.u64.low %v10629_v26, %v3178_v13  ;;  %v10656_v32 = vmul.u32.u64.high %v10629_v26, %v3178_v13, %v10655_v28 }
 0x34b   :  { %v3098_v19 = vsel %vm7254_vm14, 0, %v7253_v44  ;;  %v3114_v39 = vsel %vm3029_vm6, %v3113_v47, %v10608_v42  ;;  %v3170_v7 = vsel %vm3164_vm15, %v3167_v24, %v3169_v12  ;;  %vm3019_vm1 = vcmp.eq.s32.totalorder %v10610_v10, 0 }
 0x34c   :  { %v3099_v61 = vsub.s32 32, %v3098_v19  ;;  %v3103_v38 = vsub.s32 4294967266, %v3098_v19  ;;  %v12154_v51 = vand.u32 2147483647, %v10229_v29  ;;  %v3100_v43 = vshll.u32 %v10626_v35, %v3098_v19 }
 0x34d   :  { %v3245_v40 = vadd.s32 1, %v7259_v63  ;;  %v3189_v48 = vadd.s32 1, %v10649_v59  ;;  %v12157_v44 = vand.u32 2147483647, %v10411_v25  ;;  %v3186_v24 = vmul.u32 %v10629_v26, %v3170_v7 }
 0x34e   :  { %vm10665_vm12 = vcmp.le.f32.partialorder %v12154_v51, 0.7853982  ;;  %v3101_v3 = vshrl.u32 %v3083_v53, %v3099_v61  ;;  %v3104_v33 = vadd.s32 127, %v3103_v38  ;;  %vm3188_vm15 = vc.u32 %v10656_v32, %v10648_v55 }
 0x34f   :  { %v3242_v42 = vand.u32 8388607, %v12157_v44  ;;  %v10673_v20 = vpop.eup %7646  ;;  %v10677_v47 = vsel %vm10665_vm12, 0, %v3114_v39  ;;  %vm3246_vm5 = vcmp.gt.s32.totalorder %v3245_v40, 0  ;;  %v3190_v0 = vsel %vm3188_vm15, %v3189_v48, %v10649_v59 }
 0x350   :  { %12158 = vst [vmem:[#allocation7_spill] sm:$0xff] %v10673_v20  ;;  %12159 = vst [vmem:[#allocation88_spill] sm:$0xff] %v10677_v47  ;;  %v10682_v63 = vpop.eup %7648  ;;  %v11928_v53 = vxor.u32 2147483648, %v10673_v20  ;;  %v3102_v35 = vor.u32 %v3101_v3, %v3100_v43  ;;  %v3105_v11 = vshll.u32 %v3104_v33, 23  ;;  %vm3022_vm14 = vcmp.eq.s32.totalorder %v10610_v10, 2  ;;  %v12161_v43 = vld [vmem:[#allocation8_spill] sm:$0xff] }
 0x351   :  { %12160 = vst [vmem:[#allocation89_spill] sm:$0xff] %v10682_v63  ;;  %v11929_v12 = vxor.u32 2147483648, %v10682_v63  ;;  %v3191_v45 = vadd.s32 %v3190_v0, %v3186_v24  ;;  %v3247_v62 = vsel %vm3246_vm5, %v3245_v40, 0  ;;  %v3120_v19 = vadd.s32 3, %v10677_v47 }
 0x352   :  { %v3024_v26 = vsel %vm3022_vm14, %v11928_v53, %v10682_v63  ;;  %v3106_v13 = vor.u32 4788187, %v3105_v11  ;;  %v3243_v28 = vor.u32 8388608, %v3242_v42  ;;  %vm3018_vm9 = vcmp.lt.s32.totalorder %v10610_v10, 2 }
 0x353   :  { %v3021_v59 = vsel %vm3019_vm1, %v10673_v20, %v11929_v12  ;;  %v3192_v61 = vadd.s32 536870912, %v3191_v45  ;;  %v3249_v38 = vand.u32 31, %v3247_v62  ;;  %vm11937_vm15 = vweird.f32 %v10226_v14 }
 0x354   :  { %v3025_v39 = vsel %vm3018_vm9, %v3021_v59, %v3024_v26  ;;  %v3107_v7 = vand.u32 2147483647, %v3106_v13  ;;  %v3109_v51 = vcvt.s32.f32 %v3102_v35  ;;  %v10700_v40 = vmul.f32 6.2831855, %v12161_v43 }
 0x355   :  { %v3026_v3 = vsel %vm11937_vm15, nan, %v3025_v39  ;;  %v3193_v33 = vshrl.u32 %v3192_v61, 30  ;;  %v3250_v48 = vsub.s32 32, %v3249_v38  ;;  %v10704_v42 = vand.u32 3, %v3120_v19 }
 0x356   :  { %v3110_v44 = vmul.f32 %v3109_v51, %v3107_v7  ;;  %v10706_v10 = vshll.u32 %v3243_v28, 8  ;;  %7075 = vst [vmem:[%s11709_s2 + $0xc0] sm:$0xff] %v3026_v3  ;;  %7139 = vst [vmem:[%s11709_s2 + $0x2c0] sm:$0xff] %v3026_v3  ;;  %vm3133_vm9 = vcmp.lt.s32.totalorder %v10312_v37, 0  ;;  %v3252_v11 = vshll.u32 %v11985_v17, %v3249_v38 }
 0x357   :  { %v3194_v35 = vshll.u32 %v3193_v33, 30  ;;  %v3253_v0 = vshrl.u32 %v11986_v52, %v3250_v48  ;;  %v3255_v26 = vshll.u32 %v11986_v52, %v3249_v38  ;;  %v3256_v19 = vshrl.u32 %v11987_v56, %v3250_v48 }
 0x358   :  { %v3111_v13 = vxor.u32 2147483648, %v3110_v44  ;;  %v3259_v28 = vshrl.u32 %v11988_v23, %v3250_v48  ;;  %v3262_v59 = vshrl.u32 %v11989_v27, %v3250_v48  ;;  %v3248_v39 = vshrl.u32 %v3247_v62, 5 }
 0x359   :  { %v10722_v61 = vsub.s32 %v3191_v45, %v3194_v35  ;;  %v3258_v7 = vshll.u32 %v11987_v56, %v3249_v38  ;;  %v3261_v51 = vshll.u32 %v11988_v23, %v3249_v38  ;;  %v3254_v3 = vor.u32 %v3253_v0, %v3252_v11 }
 0x35a   :  { %v3112_v43 = vsel %vm3029_vm6, %v3111_v13, %v3110_v44  ;;  %v3257_v53 = vor.u32 %v3256_v19, %v3255_v26  ;;  %v3342_v12 = vand.u32 2139095040, %v10603_v16  ;;  %v3217_v62 = vsub.s32 4, %v3193_v33 }
 0x35b   :  { %v3115_v24 = vsel %vm10665_vm12, %v10229_v29, %v3112_v43  ;;  %v3197_v14 = vsub.s32 0, %v10722_v61  ;;  %v3260_v45 = vor.u32 %v3259_v28, %v3258_v7  ;;  %v3263_v35 = vor.u32 %v3262_v59, %v3261_v51 }
 0x35c   :  { %7650 = vcosq.f32 %v3115_v24  ;;  %v3264_v20 = vshll.u32 %v11989_v27, %v3249_v38  ;;  %v3265_v63 = vshrl.u32 %v11990_v22, %v3250_v48  ;;  %v12162_v44 = vand.u32 2147483647, %v10312_v37 }
 0x35d   :  { %7652 = vsinq.f32 %v3115_v24  ;;  %v7256_v46 = vmin.u32 %v3197_v14, %v10722_v61  ;;  %vm3267_vm1 = vcmp.lt.s32.totalorder %v3248_v39, 1  ;;  %vm3270_vm12 = vcmp.lt.s32.totalorder %v3248_v39, 4 }
 0x35e   :  { %vm10737_vm6 = vcmp.le.f32.partialorder %v12162_v44, 0.7853982  ;;  %v3266_v0 = vor.u32 %v3265_v63, %v3264_v20  ;;  %vm3268_vm5 = vcmp.lt.s32.totalorder %v3248_v39, 2  ;;  %v3275_v26 = vsel %vm3267_vm1, %v3254_v3, %v3257_v53 }
 0x35f   :  { %v3276_v13 = vsel %vm3270_vm12, %v3263_v35, 920167782  ;;  %v3199_v19 = vclz %v7256_v46  ;;  %v3251_v38 = vshrl.u32 %v11985_v17, %v3250_v48  ;;  %vm3269_vm14 = vcmp.lt.s32.totalorder %v3248_v39, 3 }
 0x360   :  { %v3272_v28 = vsel %vm3270_vm12, %v3260_v45, 2102212464  ;;  %v3218_v24 = vsel %vm3133_vm9, %v3217_v62, %v3193_v33  ;;  %v3277_v59 = vsel %vm3269_vm14, %v3260_v45, %v3276_v13  ;;  %v3279_v7 = vsel %vm3267_vm1, %v3257_v53, %v3260_v45 }
 0x361   :  { %v3280_v51 = vsel %vm3270_vm12, %v3266_v0, 1326507024  ;;  %v7257_v43 = vadd.s32 4294967294, %v3199_v19  ;;  %v3271_v44 = vsel %vm3267_vm1, %v3251_v38, %v3254_v3  ;;  %v3278_v14 = vsel %vm3268_vm5, %v3275_v26, %v3277_v59 }
 0x362   :  { %v3281_v47 = vsel %vm3269_vm14, %v3263_v35, %v3280_v51  ;;  %v3273_v20 = vsel %vm3269_vm14, %v3257_v53, %v3272_v28  ;;  %v10748_v46 = vmul.u32.u64.low %v10706_v10, %v3278_v14  ;;  %v10749_v15 = vmul.u32.u64.high %v10706_v10, %v3278_v14, %v10748_v46 }
 0x363   :  { %v3282_v63 = vsel %vm3268_vm5, %v3279_v7, %v3281_v47  ;;  %vm11948_vm15 = vweird.f32 %v10229_v29  ;;  %vm7258_vm13 = vcmp.lt.s32.totalorder %v7257_v43, 0  ;;  %v3343_v45 = vshrl.u32 %v3342_v12, 23 }
 0x364   :  { %v10754_v33 = vmul.u32.u64.low %v10706_v10, %v3282_v63  ;;  %v10755_v48 = vmul.u32.u64.high %v10706_v10, %v3282_v63, %v10754_v33  ;;  %vm3122_vm1 = vcmp.lt.s32.totalorder %v10704_v42, 2  ;;  %vm3123_vm12 = vcmp.eq.s32.totalorder %v10704_v42, 0 }
 0x365   :  { %v3187_v47 = vadd.s32 %v10648_v55, %v10656_v32  ;;  %v3202_v53 = vsel %vm7258_vm13, 0, %v7257_v43  ;;  %v3274_v62 = vsel %vm3268_vm5, %v3271_v44, %v3273_v20  ;;  %v7263_v0 = vadd.s32 4294967169, %v3343_v45 }
 0x366   :  { %v3203_v3 = vsub.s32 32, %v3202_v53  ;;  %v3207_v35 = vsub.s32 4294967266, %v3202_v53  ;;  %v10762_v26 = vpop.eup %7650  ;;  %vm3126_vm14 = vcmp.eq.s32.totalorder %v10704_v42, 2  ;;  %v10767_v12 = vsel %vm10737_vm6, 0, %v3218_v24 }
 0x367   :  { %12165 = vst [vmem:[#allocation8_spill] sm:$0xff] %v10762_v26  ;;  %12166 = vst [vmem:[#allocation90_spill] sm:$0xff] %v10767_v12  ;;  %v3293_v13 = vadd.s32 1, %v10749_v15  ;;  %v12167_v19 = vand.u32 2147483647, %v10603_v16  ;;  %v10772_v55 = vpop.eup %7652  ;;  %v11939_v32 = vxor.u32 2147483648, %v10762_v26  ;;  %v3204_v39 = vshll.u32 %v10722_v61, %v3202_v53 }
 0x368   :  { %12168 = vst [vmem:[#allocation91_spill] sm:$0xff] %v10772_v55  ;;  %v3205_v28 = vshrl.u32 %v3187_v47, %v3203_v3  ;;  %v3208_v59 = vadd.s32 127, %v3207_v35  ;;  %v11940_v7 = vxor.u32 2147483648, %v10772_v55  ;;  %v3290_v51 = vmul.u32 %v10706_v10, %v3274_v62 }
 0x369   :  { %v3346_v38 = vand.u32 8388607, %v12167_v19  ;;  %vm3292_vm13 = vc.u32 %v10755_v48, %v10748_v46  ;;  %v3349_v24 = vadd.s32 1, %v7263_v0  ;;  %v3128_v43 = vsel %vm3126_vm14, %v11939_v32, %v10772_v55 }
 0x36a   :  { %v3206_v44 = vor.u32 %v3205_v28, %v3204_v39  ;;  %v3209_v14 = vshll.u32 %v3208_v59, 23  ;;  %v3294_v20 = vsel %vm3292_vm13, %v3293_v13, %v10749_v15  ;;  %v3125_v61 = vsel %vm3123_vm12, %v10762_v26, %v11940_v7 }
 0x36b   :  { %v3224_v10 = vadd.s32 3, %v10767_v12  ;;  %v3295_v63 = vadd.s32 %v3294_v20, %v3290_v51  ;;  %vm3350_vm5 = vcmp.gt.s32.totalorder %v3349_v24, 0  ;;  %v3129_v33 = vsel %vm3122_vm1, %v3125_v61, %v3128_v43 }
 0x36c   :  { %v3210_v45 = vor.u32 4788187, %v3209_v14  ;;  %v3347_v47 = vor.u32 8388608, %v3346_v38  ;;  %v3351_v53 = vsel %vm3350_vm5, %v3349_v24, 0  ;;  %v3130_v3 = vsel %vm11948_vm15, nan, %v3129_v33 }
 0x36d   :  { %v3296_v15 = vadd.s32 536870912, %v3295_v63  ;;  %v3353_v35 = vand.u32 31, %v3351_v53  ;;  %v3213_v0 = vcvt.s32.f32 %v3206_v44  ;;  %7076 = vst [vmem:[%s11709_s2 + $0xc8] sm:$0xff] %v3130_v3  ;;  %7140 = vst [vmem:[%s11709_s2 + $0x2c8] sm:$0xff] %v3130_v3  ;;  %v10800_v42 = vand.u32 3, %v3224_v10 }
 0x36e   :  { %v3211_v62 = vand.u32 2147483647, %v3210_v45  ;;  %vm3237_vm1 = vcmp.lt.s32.totalorder %v10411_v25, 0  ;;  %v3352_v28 = vshrl.u32 %v3351_v53, 5  ;;  %v10804_v59 = vshll.u32 %v3347_v47, 8 }
 0x36f   :  { %v3297_v13 = vshrl.u32 %v3296_v15, 30  ;;  %v3354_v19 = vsub.s32 32, %v3353_v35  ;;  %v3446_v51 = vand.u32 2139095040, %v10700_v40  ;;  %v3356_v43 = vshll.u32 %v11985_v17, %v3353_v35 }
 0x370   :  { %v3214_v39 = vmul.f32 %v3213_v0, %v3211_v62  ;;  %v3359_v14 = vshll.u32 %v11986_v52, %v3353_v35  ;;  %v12169_v45 = vand.u32 2147483647, %v10411_v25  ;;  %v3362_v3 = vshll.u32 %v11987_v56, %v3353_v35 }
 0x371   :  { %v3298_v24 = vshll.u32 %v3297_v13, 30  ;;  %v3357_v44 = vshrl.u32 %v11986_v52, %v3354_v19  ;;  %v3360_v61 = vshrl.u32 %v11987_v56, %v3354_v19  ;;  %v3363_v10 = vshrl.u32 %v11988_v23, %v3354_v19 }
 0x372   :  { %v3215_v20 = vxor.u32 2147483648, %v3214_v39  ;;  %v3366_v33 = vshrl.u32 %v11989_v27, %v3354_v19  ;;  %vm10815_vm12 = vcmp.le.f32.partialorder %v12169_v45, 0.7853982  ;;  %v3365_v15 = vshll.u32 %v11988_v23, %v3353_v35 }
 0x373   :  { %v10819_v53 = vsub.s32 %v3295_v63, %v3298_v24  ;;  %v3369_v62 = vshrl.u32 %v11990_v22, %v3354_v19  ;;  %v3321_v32 = vsub.s32 4, %v3297_v13  ;;  %v3358_v7 = vor.u32 %v3357_v44, %v3356_v43 }
 0x374   :  { %v3216_v0 = vsel %vm3133_vm9, %v3215_v20, %v3214_v39  ;;  %v3368_v38 = vshll.u32 %v11989_v27, %v3353_v35  ;;  %v3361_v24 = vor.u32 %v3360_v61, %v3359_v14  ;;  %v3364_v29 = vor.u32 %v3363_v10, %v3362_v3 }
 0x375   :  { %v3219_v45 = vsel %vm10737_vm6, %v10312_v37, %v3216_v0  ;;  %v3301_v63 = vsub.s32 0, %v10819_v53  ;;  %v3367_v12 = vor.u32 %v3366_v33, %v3365_v15  ;;  %v3447_v55 = vshrl.u32 %v3446_v51, 23 }
 0x376   :  { %7654 = vcosq.f32 %v3219_v45  ;;  %v3370_v26 = vor.u32 %v3369_v62, %v3368_v38  ;;  %v3355_v39 = vshrl.u32 %v11985_v17, %v3354_v19  ;;  %v12172_v43 = vand.u32 2147483647, %v10700_v40 }
 0x377   :  { %7656 = vsinq.f32 %v3219_v45  ;;  %v7260_v60 = vmin.u32 %v3301_v63, %v10819_v53  ;;  %v3322_v11 = vsel %vm3237_vm1, %v3321_v32, %v3297_v13  ;;  %vm3371_vm9 = vcmp.lt.s32.totalorder %v3352_v28, 1 }
 0x378   :  { %v10835_v35 = vand.u32 8388607, %v12172_v43  ;;  %vm3372_vm6 = vcmp.lt.s32.totalorder %v3352_v28, 2  ;;  %vm3373_vm14 = vcmp.lt.s32.totalorder %v3352_v28, 3  ;;  %vm3374_vm13 = vcmp.lt.s32.totalorder %v3352_v28, 4 }
 0x379   :  { %v3303_v44 = vclz %v7260_v60  ;;  %v3379_v14 = vsel %vm3371_vm9, %v3358_v7, %v3361_v24  ;;  %v3383_v38 = vsel %vm3371_vm9, %v3361_v24, %v3364_v29  ;;  %v3375_v51 = vsel %vm3371_vm9, %v3355_v39, %v3358_v7 }
 0x37a   :  { %v3376_v20 = vsel %vm3374_vm13, %v3364_v29, 2102212464  ;;  %v3380_v61 = vsel %vm3374_vm13, %v3367_v12, 920167782  ;;  %v3384_v10 = vsel %vm3374_vm13, %v3370_v26, 1326507024  ;;  %v3291_v63 = vadd.s32 %v10748_v46, %v10755_v48 }
 0x37b   :  { %v7261_v33 = vadd.s32 4294967294, %v3303_v44  ;;  %v3377_v19 = vsel %vm3373_vm14, %v3361_v24, %v3376_v20  ;;  %v3381_v3 = vsel %vm3373_vm14, %v3364_v29, %v3380_v61  ;;  %v3385_v15 = vsel %vm3373_vm14, %v3367_v12, %v3384_v10 }
 0x37c   :  { %v10841_v62 = vsel %vm10815_vm12, 0, %v3322_v11  ;;  %v3382_v32 = vsel %vm3372_vm6, %v3379_v14, %v3381_v3  ;;  %v3386_v13 = vsel %vm3372_vm6, %v3383_v38, %v3385_v15  ;;  %v7267_v60 = vadd.s32 4294967169, %v3447_v55 }
 0x37d   :  { %12173 = vst [vmem:[#allocation92_spill] sm:$0xff] %v10841_v62  ;;  %vm7262_vm5 = vcmp.lt.s32.totalorder %v7261_v33, 0  ;;  %v3378_v0 = vsel %vm3372_vm6, %v3375_v51, %v3377_v19  ;;  %v10847_v7 = vmul.u32.u64.low %v10804_v59, %v3386_v13  ;;  %v10848_v45 = vmul.u32.u64.high %v10804_v59, %v3386_v13, %v10847_v7 }
 0x37e   :  { %vm3227_vm9 = vcmp.eq.s32.totalorder %v10800_v42, 0  ;;  %v3306_v29 = vsel %vm7262_vm5, 0, %v7261_v33  ;;  %v10852_v26 = vmul.u32.u64.low %v10804_v59, %v3382_v32  ;;  %v10853_v12 = vmul.u32.u64.high %v10804_v59, %v3382_v32, %v10852_v26 }
 0x37f   :  { %v3307_v24 = vsub.s32 32, %v3306_v29  ;;  %v3311_v55 = vsub.s32 4294967266, %v3306_v29  ;;  %v3453_v39 = vadd.s32 1, %v7267_v60  ;;  %vm3230_vm6 = vcmp.eq.s32.totalorder %v10800_v42, 2  ;;  %v12176_v60 = vld [vmem:[#allocation9_spill] sm:$0xff] }
 0x380   :  { %v10858_v28 = vpop.eup %7654  ;;  %v3328_v43 = vadd.s32 3, %v10841_v62  ;;  %v3394_v11 = vmul.u32 %v10804_v59, %v3378_v0  ;;  %v3451_v44 = vor.u32 8388608, %v10835_v35  ;;  %v3308_v51 = vshll.u32 %v10819_v53, %v3306_v29 }
 0x381   :  { %12174 = vst [vmem:[#allocation93_spill] sm:$0xff] %v10858_v28  ;;  %v10864_v14 = vpop.eup %7656  ;;  %v11949_v38 = vxor.u32 2147483648, %v10858_v28  ;;  %v3309_v46 = vshrl.u32 %v3291_v63, %v3307_v24  ;;  %v3312_v48 = vadd.s32 127, %v3311_v55  ;;  %vm3396_vm14 = vc.u32 %v10848_v45, %v10852_v26 }
 0x382   :  { %12175 = vst [vmem:[#allocation94_spill] sm:$0xff] %v10864_v14  ;;  %v11950_v20 = vxor.u32 2147483648, %v10864_v14  ;;  %v3397_v61 = vadd.s32 1, %v10853_v12  ;;  %vm3454_vm13 = vcmp.gt.s32.totalorder %v3453_v39, 0  ;;  %vm3226_vm5 = vcmp.lt.s32.totalorder %v10800_v42, 2 }
 0x383   :  { %v3232_v59 = vsel %vm3230_vm6, %v11949_v38, %v10864_v14  ;;  %v3310_v35 = vor.u32 %v3309_v46, %v3308_v51  ;;  %v3313_v10 = vshll.u32 %v3312_v48, 23  ;;  %v3455_v33 = vsel %vm3454_vm13, %v3453_v39, 0 }
 0x384   :  { %v3229_v53 = vsel %vm3227_vm9, %v10858_v28, %v11950_v20  ;;  %v3398_v19 = vsel %vm3396_vm14, %v3397_v61, %v10853_v12  ;;  %v3457_v3 = vand.u32 31, %v3455_v33  ;;  %vm11956_vm15 = vweird.f32 %v10312_v37 }
 0x385   :  { %v3233_v15 = vsel %vm3226_vm5, %v3229_v53, %v3232_v59  ;;  %v3314_v32 = vor.u32 4788187, %v3313_v10  ;;  %v3399_v13 = vadd.s32 %v3398_v19, %v3394_v11  ;;  %v10884_v0 = vmul.f32 6.2831855, %v12176_v60 }
 0x386   :  { %v3234_v7 = vsel %vm11956_vm15, nan, %v3233_v15  ;;  %v10888_v29 = vand.u32 3, %v3328_v43  ;;  %v3458_v63 = vsub.s32 32, %v3457_v3  ;;  %v3317_v42 = vcvt.s32.f32 %v3310_v35 }
 0x387   :  { %v3315_v24 = vand.u32 2147483647, %v3314_v32  ;;  %vm3341_vm9 = vcmp.lt.s32.totalorder %v10603_v16, 0  ;;  %v3400_v12 = vadd.s32 536870912, %v3399_v13  ;;  %v10891_v55 = vshll.u32 %v3451_v44, 8  ;;  %7077 = vst [vmem:[%s11709_s2 + $0xd0] sm:$0xff] %v3234_v7 }
 0x388   :  { %7141 = vst [vmem:[%s11709_s2 + $0x2d0] sm:$0xff] %v3234_v7  ;;  %v3456_v39 = vshrl.u32 %v3455_v33, 5  ;;  %v3461_v43 = vshrl.u32 %v11986_v52, %v3458_v63  ;;  %v3464_v11 = vshrl.u32 %v11987_v56, %v3458_v63  ;;  %v3467_v51 = vshrl.u32 %v11988_v23, %v3458_v63 }
 0x389   :  { %v3318_v46 = vmul.f32 %v3317_v42, %v3315_v24  ;;  %v3401_v48 = vshrl.u32 %v3400_v12, 30  ;;  %v3466_v44 = vshll.u32 %v11987_v56, %v3457_v3  ;;  %v3470_v61 = vshrl.u32 %v11989_v27, %v3458_v63 }
 0x38a   :  { %v12177_v59 = vand.u32 2147483647, %v10603_v16  ;;  %v3460_v10 = vshll.u32 %v11985_v17, %v3457_v3  ;;  %v3463_v33 = vshll.u32 %v11986_v52, %v3457_v3  ;;  %v3469_v53 = vshll.u32 %v11988_v23, %v3457_v3 }
 0x38b   :  { %v3473_v19 = vshrl.u32 %v11990_v22, %v3458_v63  ;;  %v3319_v15 = vxor.u32 2147483648, %v3318_v46  ;;  %v3402_v32 = vshll.u32 %v3401_v48, 30  ;;  %v3468_v60 = vor.u32 %v3467_v51, %v3466_v44 }
 0x38c   :  { %vm10906_vm6 = vcmp.le.f32.partialorder %v12177_v59, 0.7853982  ;;  %v3472_v7 = vshll.u32 %v11989_v27, %v3457_v3  ;;  %v3425_v24 = vsub.s32 4, %v3401_v48  ;;  %v3462_v42 = vor.u32 %v3461_v43, %v3460_v10 }
 0x38d   :  { %v3465_v12 = vor.u32 %v3464_v11, %v3463_v33  ;;  %v3471_v59 = vor.u32 %v3470_v61, %v3469_v53  ;;  %v3320_v38 = vsel %vm3237_vm1, %v3319_v15, %v3318_v46  ;;  %v10917_v20 = vsub.s32 %v3399_v13, %v3402_v32  ;;  %v12180_v33 = vld [vmem:[#allocation10_spill] sm:$0xff] }
 0x38e   :  { %v3459_v37 = vshrl.u32 %v11985_v17, %v3458_v63  ;;  %v3550_v28 = vand.u32 2139095040, %v10884_v0  ;;  %v3323_v14 = vsel %vm10815_vm12, %v10411_v25, %v3320_v38  ;;  %v3474_v51 = vor.u32 %v3473_v19, %v3472_v7 }
 0x38f   :  { %vm3475_vm14 = vcmp.lt.s32.totalorder %v3456_v39, 1  ;;  %vm3478_vm13 = vcmp.lt.s32.totalorder %v3456_v39, 4  ;;  %7658 = vcosq.f32 %v3323_v14  ;;  %v3405_v3 = vsub.s32 0, %v10917_v20 }
 0x390   :  { %vm3477_vm5 = vcmp.lt.s32.totalorder %v3456_v39, 3  ;;  %v3480_v43 = vsel %vm3478_vm13, %v3468_v60, 2102212464  ;;  %7660 = vsinq.f32 %v3323_v14  ;;  %v3426_v13 = vsel %vm3341_vm9, %v3425_v24, %v3401_v48 }
 0x391   :  { %v3483_v63 = vsel %vm3475_vm14, %v3462_v42, %v3465_v12  ;;  %v3484_v11 = vsel %vm3478_vm13, %v3471_v59, 920167782  ;;  %v7264_v47 = vmin.u32 %v3405_v3, %v10917_v20  ;;  %vm3476_vm1 = vcmp.lt.s32.totalorder %v3456_v39, 2 }
 0x392   :  { %v3479_v38 = vsel %vm3475_vm14, %v3459_v37, %v3462_v42  ;;  %v3485_v46 = vsel %vm3477_vm5, %v3468_v60, %v3484_v11  ;;  %v3481_v44 = vsel %vm3477_vm5, %v3465_v12, %v3480_v43  ;;  %v3487_v10 = vsel %vm3475_vm14, %v3465_v12, %v3468_v60 }
 0x393   :  { %v3486_v61 = vsel %vm3476_vm1, %v3483_v63, %v3485_v46  ;;  %v3488_v14 = vsel %vm3478_vm13, %v3474_v51, 1326507024  ;;  %v10937_v48 = vmul.f32 6.2831855, %v12180_v33  ;;  %v3407_v53 = vclz %v7264_v47 }
 0x394   :  { %v10941_v19 = vsel %vm10906_vm6, 0, %v3426_v13  ;;  %v3489_v15 = vsel %vm3477_vm5, %v3471_v59, %v3488_v14  ;;  %v10945_v37 = vmul.u32.u64.low %v10891_v55, %v3486_v61  ;;  %v10946_v32 = vmul.u32.u64.high %v10891_v55, %v3486_v61, %v10945_v37 }
 0x395   :  { %12181 = vst [vmem:[#allocation9_spill] sm:$0xff] %v10941_v19  ;;  %v3551_v7 = vshrl.u32 %v3550_v28, 23  ;;  %v7265_v24 = vadd.s32 4294967294, %v3407_v53  ;;  %v3482_v60 = vsel %vm3476_vm1, %v3479_v38, %v3481_v44  ;;  %v3490_v42 = vsel %vm3476_vm1, %v3487_v10, %v3489_v15 }
 0x396   :  { %v11960_v12 = vand.u32 2147483647, %v10884_v0  ;;  %vm11968_vm12 = vweird.f32 %v10411_v25  ;;  %vm3331_vm14 = vcmp.eq.s32.totalorder %v10888_v29, 0  ;;  %vm3334_vm13 = vcmp.eq.s32.totalorder %v10888_v29, 2 }
 0x397   :  { %v10953_v51 = vmul.u32.u64.low %v10891_v55, %v3490_v42  ;;  %v10954_v3 = vmul.u32.u64.high %v10891_v55, %v3490_v42, %v10953_v51  ;;  %v7271_v39 = vadd.s32 4294967169, %v3551_v7  ;;  %v3395_v59 = vadd.s32 %v10852_v26, %v10848_v45 }
 0x398   :  { %vm7266_vm5 = vcmp.lt.s32.totalorder %v7265_v24, 0  ;;  %v3432_v28 = vadd.s32 3, %v10941_v19  ;;  %v3498_v13 = vmul.u32 %v10891_v55, %v3482_v60  ;;  %v3501_v63 = vadd.s32 1, %v10946_v32 }
 0x399   :  { %v3410_v43 = vsel %vm7266_vm5, 0, %v7265_v24  ;;  %v3557_v11 = vadd.s32 1, %v7271_v39  ;;  %v10962_v47 = vpop.eup %7658  ;;  %v3554_v44 = vand.u32 8388607, %v11960_v12  ;;  %v11959_v61 = vand.u32 2147483647, %v10937_v48 }
 0x39a   :  { %12182 = vst [vmem:[#allocation10_spill] sm:$0xff] %v10962_v47  ;;  %v3411_v38 = vsub.s32 32, %v3410_v43  ;;  %v3415_v46 = vsub.s32 4294967266, %v3410_v43  ;;  %v10967_v10 = vpop.eup %7660  ;;  %v11957_v45 = vxor.u32 2147483648, %v10962_v47  ;;  %v3412_v26 = vshll.u32 %v10917_v20, %v3410_v43 }
 0x39b   :  { %12183 = vst [vmem:[#allocation95_spill] sm:$0xff] %v10967_v10  ;;  %vm3500_vm1 = vc.u32 %v10954_v3, %v10945_v37  ;;  %vm3558_vm5 = vcmp.gt.s32.totalorder %v3557_v11, 0  ;;  %v11958_v55 = vxor.u32 2147483648, %v10967_v10  ;;  %v3654_v20 = vand.u32 2139095040, %v10937_v48 }
 0x39c   :  { %v3413_v14 = vshrl.u32 %v3395_v59, %v3411_v38  ;;  %v3416_v33 = vadd.s32 127, %v3415_v46  ;;  %v3502_v53 = vsel %vm3500_vm1, %v3501_v63, %v10946_v32  ;;  %v3336_v15 = vsel %vm3334_vm13, %v11957_v45, %v10967_v10 }
 0x39d   :  { %v3503_v7 = vadd.s32 %v3502_v53, %v3498_v13  ;;  %v3559_v24 = vsel %vm3558_vm5, %v3557_v11, 0  ;;  %vm3330_vm15 = vcmp.lt.s32.totalorder %v10888_v29, 2  ;;  %v3333_v60 = vsel %vm3331_vm14, %v10962_v47, %v11958_v55 }
 0x39e   :  { %v3414_v42 = vor.u32 %v3413_v14, %v3412_v26  ;;  %v3417_v32 = vshll.u32 %v3416_v33, 23  ;;  %v3337_v51 = vsel %vm3330_vm15, %v3333_v60, %v3336_v15  ;;  %vm3445_vm1 = vcmp.lt.s32.totalorder %v10700_v40, 0 }
 0x39f   :  { %v3504_v39 = vadd.s32 536870912, %v3503_v7  ;;  %v3561_v59 = vand.u32 31, %v3559_v24  ;;  %v3338_v43 = vsel %vm11968_vm12, nan, %v3337_v51  ;;  %v10990_v63 = vand.u32 3, %v3432_v28 }
 0x3a0   :  { %v3418_v13 = vor.u32 4788187, %v3417_v32  ;;  %v3555_v11 = vor.u32 8388608, %v3554_v44  ;;  %v3655_v53 = vshrl.u32 %v3654_v20, 23  ;;  %v10994_v29 = vand.u32 8388607, %v11959_v61 }
 0x3a1   :  { %v3505_v38 = vshrl.u32 %v3504_v39, 30  ;;  %v3562_v46 = vsub.s32 32, %v3561_v59  ;;  %7078 = vst [vmem:[%s11709_s2 + $0xd8] sm:$0xff] %v3338_v43  ;;  %7142 = vst [vmem:[%s11709_s2 + $0x2d8] sm:$0xff] %v3338_v43  ;;  %v3421_v14 = vcvt.s32.f32 %v3414_v42  ;;  %v11002_v28 = vshrl.u32 %v3559_v24, 5 }
 0x3a2   :  { %v3419_v26 = vand.u32 2147483647, %v3418_v13  ;;  %v3564_v44 = vshll.u32 %v11985_v17, %v3561_v59  ;;  %v12184_v33 = vand.u32 2147483647, %v10700_v40  ;;  %v3567_v51 = vshll.u32 %v11986_v52, %v3561_v59 }
 0x3a3   :  { %v3506_v20 = vshll.u32 %v3505_v38, 30  ;;  %v3529_v60 = vsub.s32 4, %v3505_v38  ;;  %v3565_v32 = vshrl.u32 %v11986_v52, %v3562_v46  ;;  %v3568_v43 = vshrl.u32 %v11987_v56, %v3562_v46 }
 0x3a4   :  { %vm11007_vm15 = vcmp.le.f32.partialorder %v12184_v33, 0.7853982  ;;  %v3422_v39 = vmul.f32 %v3421_v14, %v3419_v26  ;;  %v3571_v24 = vshrl.u32 %v11988_v23, %v3562_v46  ;;  %v3574_v42 = vshrl.u32 %v11989_v27, %v3562_v46 }
 0x3a5   :  { %v11016_v13 = vsub.s32 %v3503_v7, %v3506_v20  ;;  %v3570_v33 = vshll.u32 %v11987_v56, %v3561_v59  ;;  %v3573_v45 = vshll.u32 %v11988_v23, %v3561_v59  ;;  %v3577_v55 = vshrl.u32 %v11990_v22, %v3562_v46 }
 0x3a6   :  { %v3423_v61 = vxor.u32 2147483648, %v3422_v39  ;;  %v3566_v12 = vor.u32 %v3565_v32, %v3564_v44  ;;  %v3569_v25 = vor.u32 %v3568_v43, %v3567_v51  ;;  %v11021_v47 = vshll.u32 %v3555_v11, 8 }
 0x3a7   :  { %v3509_v26 = vsub.s32 0, %v11016_v13  ;;  %v3572_v14 = vor.u32 %v3571_v24, %v3570_v33  ;;  %v3575_v10 = vor.u32 %v3574_v42, %v3573_v45  ;;  %v3576_v19 = vshll.u32 %v11989_v27, %v3561_v59 }
 0x3a8   :  { %v3424_v7 = vsel %vm3341_vm9, %v3423_v61, %v3422_v39  ;;  %v3530_v20 = vsel %vm3445_vm1, %v3529_v60, %v3505_v38  ;;  %vm3579_vm14 = vcmp.lt.s32.totalorder %v11002_v28, 1  ;;  %v7275_v62 = vadd.s32 4294967169, %v3655_v53 }
 0x3a9   :  { %v3427_v11 = vsel %vm10906_vm6, %v10603_v16, %v3424_v7  ;;  %v7268_v44 = vmin.u32 %v3509_v26, %v11016_v13  ;;  %v3578_v32 = vor.u32 %v3577_v55, %v3576_v19  ;;  %vm3582_vm13 = vcmp.lt.s32.totalorder %v11002_v28, 4 }
 0x3aa   :  { %7662 = vcosq.f32 %v3427_v11  ;;  %v3563_v45 = vshrl.u32 %v11985_v17, %v3562_v46  ;;  %v3587_v61 = vsel %vm3579_vm14, %v3566_v12, %v3569_v25  ;;  %v3588_v59 = vsel %vm3582_vm13, %v3575_v10, 920167782 }
 0x3ab   :  { %7664 = vsinq.f32 %v3427_v11  ;;  %v3511_v38 = vclz %v7268_v44  ;;  %vm3581_vm9 = vcmp.lt.s32.totalorder %v11002_v28, 3  ;;  %v3584_v35 = vsel %vm3582_vm13, %v3572_v14, 2102212464 }
 0x3ac   :  { %v11045_v19 = vsel %vm11007_vm15, 0, %v3530_v20  ;;  %vm3580_vm6 = vcmp.lt.s32.totalorder %v11002_v28, 2  ;;  %v3589_v55 = vsel %vm3581_vm9, %v3572_v14, %v3588_v59  ;;  %v3591_v46 = vsel %vm3579_vm14, %v3569_v25, %v3572_v14 }
 0x3ad   :  { %v7269_v53 = vadd.s32 4294967294, %v3511_v38  ;;  %v3583_v60 = vsel %vm3579_vm14, %v3563_v45, %v3566_v12  ;;  %v3590_v51 = vsel %vm3580_vm6, %v3587_v61, %v3589_v55  ;;  %v3592_v39 = vsel %vm3582_vm13, %v3578_v32, 1326507024 }
 0x3ae   :  { %v3585_v43 = vsel %vm3581_vm9, %v3569_v25, %v3584_v35  ;;  %v3593_v24 = vsel %vm3581_vm9, %v3575_v10, %v3592_v39  ;;  %v11057_v42 = vmul.u32.u64.low %v11021_v47, %v3590_v51  ;;  %v11058_v33 = vmul.u32.u64.high %v11021_v47, %v3590_v51, %v11057_v42 }
 0x3af   :  { %v3499_v26 = vadd.s32 %v10945_v37, %v10954_v3  ;;  %vm7270_vm5 = vcmp.lt.s32.totalorder %v7269_v53, 0  ;;  %v3594_v12 = vsel %vm3580_vm6, %v3591_v46, %v3593_v24  ;;  %v3661_v14 = vadd.s32 1, %v7275_v62 }
 0x3b0   :  { %vm3434_vm14 = vcmp.lt.s32.totalorder %v10990_v63, 2  ;;  %v3514_v7 = vsel %vm7270_vm5, 0, %v7269_v53  ;;  %v3536_v20 = vadd.s32 3, %v11045_v19  ;;  %vm11969_vm13 = vweird.f32 %v10603_v16 }
 0x3b1   :  { %v11068_v25 = vmul.u32.u64.low %v11021_v47, %v3594_v12  ;;  %v11069_v10 = vmul.u32.u64.high %v11021_v47, %v3594_v12, %v11068_v25  ;;  %v3515_v11 = vsub.s32 32, %v3514_v7  ;;  %v3519_v44 = vsub.s32 4294967266, %v3514_v7 }
 0x3b2   :  { %v3586_v37 = vsel %vm3580_vm6, %v3583_v60, %v3585_v43  ;;  %vm3662_vm9 = vcmp.gt.s32.totalorder %v3661_v14, 0  ;;  %vm3435_vm12 = vcmp.eq.s32.totalorder %v10990_v63, 0  ;;  %v3605_v62 = vadd.s32 1, %v11058_v33 }
 0x3b3   :  { %v3659_v3 = vor.u32 8388608, %v10994_v29  ;;  %v3663_v32 = vsel %vm3662_vm9, %v3661_v14, 0  ;;  %v3516_v45 = vshll.u32 %v11016_v13, %v3514_v7  ;;  %v3517_v61 = vshrl.u32 %v3499_v26, %v3515_v11 }
 0x3b4   :  { %v3520_v59 = vadd.s32 127, %v3519_v44  ;;  %v3665_v38 = vand.u32 31, %v3663_v32  ;;  %v11078_v35 = vpop.eup %7662  ;;  %vm3438_vm5 = vcmp.eq.s32.totalorder %v10990_v63, 2  ;;  %v11081_v55 = vand.u32 3, %v3536_v20 }
 0x3b5   :  { %v3602_v28 = vmul.u32 %v11021_v47, %v3586_v37  ;;  %vm3604_vm6 = vc.u32 %v11069_v10, %v11057_v42  ;;  %v11086_v46 = vpop.eup %7664  ;;  %v3439_v29 = vxor.u32 2147483648, %v11078_v35  ;;  %v3518_v53 = vor.u32 %v3517_v61, %v3516_v45 }
 0x3b6   :  { %v3521_v13 = vshll.u32 %v3520_v59, 23  ;;  %v3606_v60 = vsel %vm3604_vm6, %v3605_v62, %v11058_v33  ;;  %v3436_v51 = vxor.u32 2147483648, %v11086_v46  ;;  %vm3549_vm9 = vcmp.lt.s32.totalorder %v10884_v0, 0 }
 0x3b7   :  { %v3607_v39 = vadd.s32 %v3606_v60, %v3602_v28  ;;  %v3666_v43 = vsub.s32 32, %v3665_v38  ;;  %v11092_v24 = vshll.u32 %v3659_v3, 8  ;;  %v3440_v47 = vsel %vm3438_vm5, %v3439_v29, %v11086_v46 }
 0x3b8   :  { %v3522_v26 = vor.u32 4788187, %v3521_v13  ;;  %v11097_v12 = vshrl.u32 %v3663_v32, 5  ;;  %v11100_v14 = vand.u32 3, %v8253_v30  ;;  %v3437_v33 = vsel %vm3435_vm12, %v11078_v35, %v3436_v51 }
 0x3b9   :  { %v3608_v7 = vadd.s32 536870912, %v3607_v39  ;;  %v3668_v20 = vshll.u32 %v11985_v17, %v3665_v38  ;;  %v3669_v25 = vshrl.u32 %v11986_v52, %v3666_v43  ;;  %v3441_v11 = vsel %vm3434_vm14, %v3437_v33, %v3440_v47 }
 0x3ba   :  { %v3523_v44 = vand.u32 2147483647, %v3522_v26  ;;  %v3525_v37 = vcvt.s32.f32 %v3518_v53  ;;  %v3672_v62 = vshrl.u32 %v11987_v56, %v3666_v43  ;;  %v3442_v30 = vsel %vm11969_vm13, nan, %v3441_v11 }
 0x3bb   :  { %v3609_v3 = vshrl.u32 %v3608_v7, 30  ;;  %v3674_v32 = vshll.u32 %v11987_v56, %v3665_v38  ;;  %v3675_v45 = vshrl.u32 %v11988_v23, %v3666_v43  ;;  %v12187_v59 = vand.u32 2147483647, %v10884_v0  ;;  %7079 = vst [vmem:[%s11709_s2 + $0xe0] sm:$0xff] %v3442_v30  ;;  %7143 = vst [vmem:[%s11709_s2 + $0x2e0] sm:$0xff] %v3442_v30 }
 0x3bc   :  { %v3526_v61 = vmul.f32 %v3525_v37, %v3523_v44  ;;  %v3671_v63 = vshll.u32 %v11986_v52, %v3665_v38  ;;  %v3677_v53 = vshll.u32 %v11988_v23, %v3665_v38  ;;  %v3678_v13 = vshrl.u32 %v11989_v27, %v3666_v43 }
 0x3bd   :  { %vm11118_vm12 = vcmp.le.f32.partialorder %v12187_v59, 0.7853982  ;;  %v3610_v56 = vshll.u32 %v3609_v3, 30  ;;  %v3633_v60 = vsub.s32 4, %v3609_v3  ;;  %v3670_v47 = vor.u32 %v3669_v25, %v3668_v20 }
 0x3be   :  { %v3676_v26 = vor.u32 %v3675_v45, %v3674_v32  ;;  %v3527_v33 = vxor.u32 2147483648, %v3526_v61  ;;  %v3679_v7 = vor.u32 %v3678_v13, %v3677_v53  ;;  %v3680_v52 = vshll.u32 %v11989_v27, %v3665_v38 }
 0x3bf   :  { %v3681_v23 = vshrl.u32 %v11990_v22, %v3666_v43  ;;  %v11135_v11 = vadd.s32 %v11057_v42, %v11069_v10  ;;  %v11137_v44 = vsub.s32 %v3607_v39, %v3610_v56  ;;  %v3667_v37 = vshrl.u32 %v11985_v17, %v3666_v43 }
 0x3c0   :  { %v3673_v59 = vor.u32 %v3672_v62, %v3671_v63  ;;  %v3528_v30 = vsel %vm3445_vm1, %v3527_v33, %v3526_v61  ;;  %v3634_v20 = vsel %vm3549_vm9, %v3633_v60, %v3609_v3  ;;  %vm3683_vm14 = vcmp.lt.s32.totalorder %v11097_v12, 1 }
 0x3c1   :  { %v3682_v25 = vor.u32 %v3681_v23, %v3680_v52  ;;  %v3531_v27 = vsel %vm11007_vm15, %v10700_v40, %v3528_v30  ;;  %v3613_v22 = vsub.s32 0, %v11137_v44  ;;  %vm3685_vm5 = vcmp.lt.s32.totalorder %v11097_v12, 3 }
 0x3c2   :  { %vm3686_vm6 = vcmp.lt.s32.totalorder %v11097_v12, 4  ;;  %7666 = vcosq.f32 %v3531_v27  ;;  %v3687_v17 = vsel %vm3683_vm14, %v3667_v37, %v3670_v47  ;;  %v3691_v43 = vsel %vm3683_vm14, %v3670_v47, %v3673_v59 }
 0x3c3   :  { %v3688_v42 = vsel %vm3686_vm6, %v3676_v26, 2102212464  ;;  %v3692_v10 = vsel %vm3686_vm6, %v3679_v7, 920167782  ;;  %7668 = vsinq.f32 %v3531_v27  ;;  %v7272_v38 = vmin.u32 %v3613_v22, %v11137_v44  ;;  %v12192_v22 = vld [vmem:[#allocation20_spill] sm:$0xff] }
 0x3c4   :  { %v3689_v39 = vsel %vm3685_vm5, %v3673_v59, %v3688_v42  ;;  %v3693_v15 = vsel %vm3685_vm5, %v3676_v26, %v3692_v10  ;;  %v3695_v62 = vsel %vm3683_vm14, %v3673_v59, %v3676_v26  ;;  %v3696_v3 = vsel %vm3686_vm6, %v3682_v25, 1326507024 }
 0x3c5   :  { %vm3849_vm1 = vcmp.lt.s32.totalorder %v11100_v14, 2  ;;  %v3615_v32 = vclz %v7272_v38  ;;  %v11159_v45 = vsel %vm11118_vm12, 0, %v3634_v20  ;;  %vm3684_vm15 = vcmp.lt.s32.totalorder %v11097_v12, 2 }
 0x3c6   :  { %vm3850_vm13 = vcmp.eq.s32.totalorder %v11100_v14, 0  ;;  %vm3542_vm11 = vcmp.eq.s32.totalorder %v11081_v55, 2  ;;  %v3690_v61 = vsel %vm3684_vm15, %v3687_v17, %v3689_v39  ;;  %v3694_v63 = vsel %vm3684_vm15, %v3691_v43, %v3693_v15 }
 0x3c7   :  { %v3697_v53 = vsel %vm3685_vm5, %v3679_v7, %v3696_v3  ;;  %v12190_v13 = vxor.u32 2147483648, %v8348_v1  ;;  %vm3539_vm14 = vcmp.eq.s32.totalorder %v11081_v55, 0  ;;  %v7273_v60 = vadd.s32 4294967294, %v3615_v32 }
 0x3c8   :  { %v3698_v47 = vsel %vm3684_vm15, %v3695_v62, %v3697_v53  ;;  %v11171_v26 = vmul.u32.u64.low %v11092_v24, %v3694_v63  ;;  %v11172_v33 = vmul.u32.u64.high %v11092_v24, %v3694_v63, %v11171_v26  ;;  %vm3538_vm6 = vcmp.lt.s32.totalorder %v11081_v55, 2  ;;  %v12262_v53 = vld [vmem:[#allocation37_spill] sm:$0xff] }
 0x3c9   :  { %v3852_v56 = vsel %vm3850_vm13, %v8340_v34, %v12190_v13  ;;  %v11177_v52 = vmul.u32.u64.low %v11092_v24, %v3698_v47  ;;  %v11178_v23 = vmul.u32.u64.high %v11092_v24, %v3698_v47, %v11177_v52  ;;  %vm3853_vm5 = vcmp.eq.s32.totalorder %v11100_v14, 2  ;;  %v12194_v14 = vld [vmem:[#allocation19_spill] sm:$0xff] }
 0x3ca   :  { %v3951_v12 = vand.u32 3, %v8272_v6  ;;  %vm3535_vm13 = vweird.f32 %v10700_v40  ;;  %vm7274_vm8 = vcmp.lt.s32.totalorder %v7273_v60, 0  ;;  %v11184_v7 = vadd.s32 3, %v11159_v45 }
 0x3cb   :  { %v3706_v37 = vmul.u32 %v11092_v24, %v3690_v61  ;;  %v12191_v59 = vxor.u32 2147483648, %v8340_v34  ;;  %v3618_v20 = vsel %vm7274_vm8, 0, %v7273_v60  ;;  %v4054_v27 = vand.u32 3, %v8402_v58  ;;  %v12196_v58 = vld [vmem:[#allocation18_spill] sm:$0xff] }
 0x3cc   :  { %v4157_v6 = vand.u32 3, %v12192_v22  ;;  %v3619_v17 = vsub.s32 32, %v3618_v20  ;;  %v3623_v42 = vsub.s32 4294967266, %v3618_v20  ;;  %v3709_v10 = vadd.s32 1, %v11172_v33  ;;  %v11195_v38 = vpop.eup %7666 }
 0x3cd   :  { %v3855_v30 = vsel %vm3853_vm5, %v12191_v59, %v8348_v1  ;;  %vm3953_vm15 = vcmp.eq.s32.totalorder %v3951_v12, 0  ;;  %v3620_v24 = vshll.u32 %v11137_v44, %v3618_v20  ;;  %vm3708_vm5 = vc.u32 %v11178_v23, %v11171_v26  ;;  %v11205_v15 = vpop.eup %7668 }
 0x3ce   :  { %v3856_v25 = vsel %vm3849_vm1, %v3852_v56, %v3855_v30  ;;  %v12195_v39 = vxor.u32 2147483648, %v12194_v14  ;;  %v3543_v62 = vxor.u32 2147483648, %v11195_v38  ;;  %v3621_v3 = vshrl.u32 %v11135_v11, %v3619_v17 }
 0x3cf   :  { %v3857_v1 = vsel %vm519_vm0, nan, %v3856_v25  ;;  %v3624_v32 = vadd.s32 127, %v3623_v42  ;;  %vm3653_vm8 = vcmp.lt.s32.totalorder %v10937_v48, 0  ;;  %v3710_v44 = vsel %vm3708_vm5, %v3709_v10, %v11172_v33  ;;  %v12202_v42 = vld [vmem:[#allocation22_spill] sm:$0xff] }
 0x3d0   :  { %v3955_v43 = vsel %vm3953_vm15, %v12196_v58, %v12195_v39  ;;  %7083 = vst [vmem:[%s11709_s2 + $0x100] sm:$0xff] %v3857_v1  ;;  %v3540_v61 = vxor.u32 2147483648, %v11205_v15  ;;  %v12197_v63 = vand.u32 2147483647, %v10937_v48  ;;  %v3711_v13 = vadd.s32 %v3710_v44, %v3706_v37 }
 0x3d1   :  { %vm3952_vm1 = vcmp.lt.s32.totalorder %v3951_v12, 2  ;;  %vm3956_vm15 = vcmp.eq.s32.totalorder %v3951_v12, 2  ;;  %v3544_v11 = vsel %vm3542_vm11, %v3543_v62, %v11205_v15  ;;  %v3622_v56 = vor.u32 %v3621_v3, %v3620_v24  ;;  %v12204_v24 = vld [vmem:[#allocation21_spill] sm:$0xff] }
 0x3d2   :  { %vm11217_vm0 = vcmp.le.f32.partialorder %v12197_v63, 0.7853982  ;;  %v3625_v60 = vshll.u32 %v3624_v32, 23  ;;  %v12200_v47 = vxor.u32 2147483648, %v12196_v58  ;;  %v3541_v52 = vsel %vm3539_vm14, %v11195_v38, %v3540_v61 }
 0x3d3   :  { %v3712_v37 = vadd.s32 536870912, %v3711_v13  ;;  %vm4055_vm5 = vcmp.lt.s32.totalorder %v4054_v27, 2  ;;  %v3545_v59 = vsel %vm3538_vm6, %v3541_v52, %v3544_v11  ;;  %vm4056_vm11 = vcmp.eq.s32.totalorder %v4054_v27, 0  ;;  %v12219_v11 = vld [vmem:[#allocation28_spill] sm:$0xff] }
 0x3d4   :  { %v3958_v33 = vsel %vm3956_vm15, %v12200_v47, %v12194_v14  ;;  %v3626_v30 = vor.u32 4788187, %v3625_v60  ;;  %v3546_v22 = vsel %vm3535_vm13, nan, %v3545_v59  ;;  %v12203_v10 = vxor.u32 2147483648, %v12202_v42 }
 0x3d5   :  { %v3959_v12 = vsel %vm3952_vm1, %v3955_v43, %v3958_v33  ;;  %v3713_v17 = vshrl.u32 %v3712_v37, 30  ;;  %vm4059_vm14 = vcmp.eq.s32.totalorder %v4054_v27, 2  ;;  %v3629_v1 = vcvt.s32.f32 %v3622_v56  ;;  %7080 = vst [vmem:[%s11709_s2 + $0xe8] sm:$0xff] %v3546_v22  ;;  %7144 = vst [vmem:[%s11709_s2 + $0x2e8] sm:$0xff] %v3546_v22 }
 0x3d6   :  { %v3960_v25 = vsel %vm623_vm3, nan, %v3959_v12  ;;  %v4058_v34 = vsel %vm4056_vm11, %v12204_v24, %v12203_v10  ;;  %v3627_v55 = vand.u32 2147483647, %v3626_v30  ;;  %v12205_v14 = vxor.u32 2147483648, %v12204_v24  ;;  %v12224_v30 = vld [vmem:[#allocation31_spill] sm:$0xff] }
 0x3d7   :  { %7084 = vst [vmem:[%s11709_s2 + $0x108] sm:$0xff] %v3960_v25  ;;  %vm4159_vm3 = vcmp.eq.s32.totalorder %v4157_v6, 0  ;;  %v3714_v58 = vshll.u32 %v3713_v17, 30  ;;  %v3737_v43 = vsub.s32 4, %v3713_v17  ;;  %v12206_v32 = vxor.u32 2147483648, %v8618_v36  ;;  %v12210_v25 = vld [vmem:[#allocation26_spill] sm:$0xff] }
 0x3d8   :  { %v4061_v39 = vsel %vm4059_vm14, %v12205_v14, %v12202_v42  ;;  %v3630_v63 = vmul.f32 %v3629_v1, %v3627_v55  ;;  %vm4162_vm6 = vcmp.eq.s32.totalorder %v4157_v6, 2  ;;  %v4260_v60 = vand.u32 3, %v8600_v18 }
 0x3d9   :  { %v4062_v3 = vsel %vm4055_vm5, %v4058_v34, %v4061_v39  ;;  %v4161_v44 = vsel %vm4159_vm3, %v8614_v8, %v12206_v32  ;;  %v11262_v47 = vsub.s32 %v3711_v13, %v3714_v58  ;;  %v3738_v33 = vsel %vm3653_vm8, %v3737_v43, %v3713_v17  ;;  %v12212_v17 = vld [vmem:[#allocation25_spill] sm:$0xff]  ;;  %v12215_v58 = vld [vmem:[#allocation30_spill] sm:$0xff] }
 0x3da   :  { %v4063_v56 = vsel %vm727_vm4, nan, %v4062_v3  ;;  %vm4158_vm1 = vcmp.lt.s32.totalorder %v4157_v6, 2  ;;  %v12208_v27 = vxor.u32 2147483648, %v8614_v8  ;;  %v3631_v37 = vxor.u32 2147483648, %v3630_v63  ;;  %v12217_v3 = vld [vmem:[#allocation29_spill] sm:$0xff] }
 0x3db   :  { %7085 = vst [vmem:[%s11709_s2 + $0x110] sm:$0xff] %v4063_v56  ;;  %v11274_v12 = vsel %vm11217_vm0, 0, %v3738_v33  ;;  %v4363_v13 = vand.u32 3, %v8712_v4  ;;  %v11278_v59 = vand.u32 3, %v11184_v7  ;;  %v3717_v6 = vsub.s32 0, %v11262_v47  ;;  %v12236_v33 = vld [vmem:[#allocation39_spill] sm:$0xff] }
 0x3dc   :  { %v4164_v52 = vsel %vm4162_vm6, %v12208_v27, %v8618_v36  ;;  %vm4262_vm4 = vcmp.eq.s32.totalorder %v4260_v60, 0  ;;  %v3632_v36 = vsel %vm3549_vm9, %v3631_v37, %v3630_v63  ;;  %v3744_v20 = vadd.s32 3, %v11274_v12 }
 0x3dd   :  { %v4165_v18 = vsel %vm4158_vm1, %v4161_v44, %v4164_v52  ;;  %v12211_v22 = vxor.u32 2147483648, %v12210_v25  ;;  %vm4265_vm15 = vcmp.eq.s32.totalorder %v4260_v60, 2  ;;  %v3635_v4 = vsel %vm11118_vm12, %v10884_v0, %v3632_v36 }
 0x3de   :  { %v4166_v8 = vsel %vm831_vm7, nan, %v4165_v18  ;;  %v7276_v7 = vmin.u32 %v3717_v6, %v11262_v47  ;;  %vm4261_vm7 = vcmp.lt.s32.totalorder %v4260_v60, 2  ;;  %v12213_v10 = vxor.u32 2147483648, %v12212_v17  ;;  %v12221_v18 = vld [vmem:[#allocation42_spill] sm:$0xff]  ;;  %v12222_v6 = vld [vmem:[#allocation32_spill] sm:$0xff] }
 0x3df   :  { %v4264_v42 = vsel %vm4262_vm4, %v12212_v17, %v12211_v22  ;;  %7086 = vst [vmem:[%s11709_s2 + $0x118] sm:$0xff] %v4166_v8  ;;  %7670 = vcosq.f32 %v3635_v4  ;;  %v3707_v34 = vadd.s32 %v11171_v26, %v11178_v23  ;;  %vm4364_vm9 = vcmp.lt.s32.totalorder %v4363_v13, 2 }
 0x3e0   :  { %v4267_v24 = vsel %vm4265_vm15, %v12213_v10, %v12210_v25  ;;  %7672 = vsinq.f32 %v3635_v4  ;;  %v3719_v1 = vclz %v7276_v7  ;;  %vm4365_vm5 = vcmp.eq.s32.totalorder %v4363_v13, 0 }
 0x3e1   :  { %v4268_v55 = vsel %vm4261_vm7, %v4264_v42, %v4267_v24  ;;  %vm4368_vm11 = vcmp.eq.s32.totalorder %v4363_v13, 2  ;;  %v11301_v14 = vand.u32 3, %v3744_v20  ;;  %v12216_v43 = vxor.u32 2147483648, %v12215_v58  ;;  %v12226_v42 = vld [vmem:[#allocation17_spill] sm:$0xff]  ;;  %v12228_v24 = vld [vmem:[#allocation36_spill] sm:$0xff] }
 0x3e2   :  { %v4269_v39 = vsel %vm935_vm2, nan, %v4268_v55  ;;  %v12218_v44 = vxor.u32 2147483648, %v12217_v3  ;;  %v7277_v26 = vadd.s32 4294967294, %v3719_v1  ;;  %v4466_v56 = vand.u32 3, %v12219_v11  ;;  %v12230_v1 = vld [vmem:[#allocation35_spill] sm:$0xff]  ;;  %v12234_v11 = vld [vmem:[#allocation40_spill] sm:$0xff] }
 0x3e3   :  { %v4367_v32 = vsel %vm4365_vm5, %v12217_v3, %v12216_v43  ;;  %v4569_v60 = vand.u32 3, %v8961_v49  ;;  %7087 = vst [vmem:[%s11709_s2 + $0x120] sm:$0xff] %v4269_v39  ;;  %vm3646_vm2 = vcmp.eq.s32.totalorder %v11278_v59, 2  ;;  %v4672_v52 = vand.u32 3, %v9030_v21 }
 0x3e4   :  { %v4370_v63 = vsel %vm4368_vm11, %v12218_v44, %v12215_v58  ;;  %v4775_v37 = vand.u32 3, %v9148_v57  ;;  %v11322_v13 = vand.u32 3, %v12221_v18  ;;  %vm3643_vm12 = vcmp.eq.s32.totalorder %v11278_v59, 0 }
 0x3e5   :  { %v4371_v23 = vsel %vm4364_vm9, %v4367_v32, %v4370_v63  ;;  %vm7278_vm14 = vcmp.lt.s32.totalorder %v7277_v26, 0  ;;  %vm4467_vm3 = vcmp.lt.s32.totalorder %v4466_v56, 2  ;;  %vm4468_vm6 = vcmp.eq.s32.totalorder %v4466_v56, 0  ;;  %v12232_v63 = vld [vmem:[#allocation23_spill] sm:$0xff] }
 0x3e6   :  { %v4372_v27 = vsel %vm1039_vm10, nan, %v4371_v23  ;;  %vm4471_vm1 = vcmp.eq.s32.totalorder %v4466_v56, 2  ;;  %vm3642_vm4 = vcmp.lt.s32.totalorder %v11278_v59, 2  ;;  %v3722_v49 = vsel %vm7278_vm14, 0, %v7277_v26 }
 0x3e7   :  { %7088 = vst [vmem:[%s11709_s2 + $0x128] sm:$0xff] %v4372_v27  ;;  %v12223_v21 = vxor.u32 2147483648, %v12222_v6  ;;  %v12225_v8 = vxor.u32 2147483648, %v12224_v30  ;;  %vm4570_vm10 = vcmp.lt.s32.totalorder %v4569_v60, 2  ;;  %vm3639_vm15 = vweird.f32 %v10884_v0 }
 0x3e8   :  { %v3723_v20 = vsub.s32 32, %v3722_v49  ;;  %v3724_v25 = vshll.u32 %v11262_v47, %v3722_v49  ;;  %v3727_v22 = vsub.s32 4294967266, %v3722_v49  ;;  %vm12227_vm7 = vweird.f32 %v12226_v42 }
 0x3e9   :  { %v4470_v57 = vsel %vm4468_vm6, %v12224_v30, %v12223_v21  ;;  %v4473_v36 = vsel %vm4471_vm1, %v12225_v8, %v12222_v6  ;;  %vm4571_vm9 = vcmp.eq.s32.totalorder %v4569_v60, 0  ;;  %vm4574_vm5 = vcmp.eq.s32.totalorder %v4569_v60, 2  ;;  %v11348_v47 = vpop.eup %7670  ;;  %v12238_v8 = vld [vmem:[#allocation24_spill] sm:$0xff] }
 0x3ea   :  { %v4474_v17 = vsel %vm4467_vm3, %v4470_v57, %v4473_v36  ;;  %vm4673_vm11 = vcmp.lt.s32.totalorder %v4672_v52, 2  ;;  %v3725_v7 = vshrl.u32 %v3707_v34, %v3723_v20  ;;  %v3728_v10 = vadd.s32 127, %v3727_v22  ;;  %v11351_v34 = vpop.eup %7672  ;;  %v12240_v20 = vld [vmem:[#allocation43_spill] sm:$0xff]  ;;  %v12242_v22 = vld [vmem:[#allocation41_spill] sm:$0xff] }
 0x3eb   :  { %v4475_v4 = vsel %vm12227_vm7, nan, %v4474_v17  ;;  %v12229_v55 = vxor.u32 2147483648, %v12228_v24  ;;  %v12231_v39 = vxor.u32 2147483648, %v12230_v1  ;;  %vm4674_vm14 = vcmp.eq.s32.totalorder %v4672_v52, 0 }
 0x3ec   :  { %7089 = vst [vmem:[%s11709_s2 + $0x130] sm:$0xff] %v4475_v4  ;;  %vm4677_vm3 = vcmp.eq.s32.totalorder %v4672_v52, 2  ;;  %vm4776_vm6 = vcmp.lt.s32.totalorder %v4775_v37, 2  ;;  %v3647_v3 = vxor.u32 2147483648, %v11348_v47  ;;  %v3726_v32 = vor.u32 %v3725_v7, %v3724_v25 }
 0x3ed   :  { %v4573_v28 = vsel %vm4571_vm9, %v12230_v1, %v12229_v55  ;;  %v4576_v58 = vsel %vm4574_vm5, %v12231_v39, %v12228_v24  ;;  %v3729_v44 = vshll.u32 %v3728_v10, 23  ;;  %vm12233_vm1 = vweird.f32 %v12232_v63  ;;  %v12244_v55 = vld [vmem:[#allocation27_spill] sm:$0xff] }
 0x3ee   :  { %v4577_v43 = vsel %vm4570_vm10, %v4573_v28, %v4576_v58  ;;  %v3644_v23 = vxor.u32 2147483648, %v11351_v34  ;;  %v12235_v56 = vxor.u32 2147483648, %v12234_v11  ;;  %v12237_v60 = vxor.u32 2147483648, %v12236_v33  ;;  %v12246_v28 = vld [vmem:[#allocation48_spill] sm:$0xff]  ;;  %v12248_v58 = vld [vmem:[#allocation47_spill] sm:$0xff] }
 0x3ef   :  { %v4578_v26 = vsel %vm12233_vm1, nan, %v4577_v43  ;;  %vm4777_vm10 = vcmp.eq.s32.totalorder %v4775_v37, 0  ;;  %v3648_v49 = vsel %vm3646_vm2, %v3647_v3, %v11351_v34  ;;  %v3730_v6 = vor.u32 4788187, %v3729_v44 }
 0x3f0   :  { %v4676_v27 = vsel %vm4674_vm14, %v12236_v33, %v12235_v56  ;;  %v4679_v18 = vsel %vm4677_vm3, %v12237_v60, %v12234_v11  ;;  %7090 = vst [vmem:[%s11709_s2 + $0x138] sm:$0xff] %v4578_v26  ;;  %v3733_v21 = vcvt.s32.f32 %v3726_v32  ;;  %v3645_v57 = vsel %vm3643_vm12, %v11348_v47, %v3644_v23  ;;  %v12251_v33 = vld [vmem:[#allocation33_spill] sm:$0xff] }
 0x3f1   :  { %v4680_v30 = vsel %vm4673_vm11, %v4676_v27, %v4679_v18  ;;  %vm12239_vm7 = vweird.f32 %v12238_v8  ;;  %v12241_v25 = vxor.u32 2147483648, %v12240_v20  ;;  %vm4780_vm9 = vcmp.eq.s32.totalorder %v4775_v37, 2 }
 0x3f2   :  { %v4681_v36 = vsel %vm12239_vm7, nan, %v4680_v30  ;;  %v3649_v42 = vsel %vm3642_vm4, %v3645_v57, %v3648_v49  ;;  %v3731_v4 = vand.u32 2147483647, %v3730_v6  ;;  %v12243_v52 = vxor.u32 2147483648, %v12242_v22  ;;  %v12254_v49 = vld [vmem:[#allocation49_spill] sm:$0xff]  ;;  %v12256_v57 = vld [vmem:[#allocation51_spill] sm:$0xff] }
 0x3f3   :  { %v4779_v17 = vsel %vm4777_vm10, %v12242_v22, %v12241_v25  ;;  %vm4879_vm2 = vcmp.lt.s32.totalorder %v11322_v13, 2  ;;  %7091 = vst [vmem:[%s11709_s2 + $0x140] sm:$0xff] %v4681_v36  ;;  %v3650_v10 = vsel %vm3639_vm15, nan, %v3649_v42  ;;  %vm4880_vm12 = vcmp.eq.s32.totalorder %v11322_v13, 0  ;;  %v12258_v36 = vld [vmem:[#allocation50_spill] sm:$0xff] }
 0x3f4   :  { %v4782_v7 = vsel %vm4780_vm9, %v12243_v52, %v12240_v20  ;;  %vm4883_vm4 = vcmp.eq.s32.totalorder %v11322_v13, 2  ;;  %v3734_v59 = vmul.f32 %v3733_v21, %v3731_v4  ;;  %vm12245_vm5 = vweird.f32 %v12244_v55  ;;  %7081 = vst [vmem:[%s11709_s2 + $0xf0] sm:$0xff] %v3650_v10  ;;  %7145 = vst [vmem:[%s11709_s2 + $0x2f0] sm:$0xff] %v3650_v10  ;;  %v12250_v13 = vld [vmem:[#allocation46_spill] sm:$0xff]  ;;  %v12264_v52 = vld [vmem:[#allocation55_spill] sm:$0xff] }
 0x3f5   :  { %v4783_v24 = vsel %vm4776_vm6, %v4779_v17, %v4782_v7  ;;  %v12247_v39 = vxor.u32 2147483648, %v12246_v28  ;;  %v12249_v32 = vxor.u32 2147483648, %v12248_v58  ;;  %v4981_v63 = vand.u32 3, %v12250_v13  ;;  %v12259_v25 = vld [vmem:[#allocation34_spill] sm:$0xff] }
 0x3f6   :  { %v4784_v1 = vsel %vm12245_vm5, nan, %v4783_v24  ;;  %v5084_v26 = vand.u32 3, %v9413_v41  ;;  %v5187_v11 = vand.u32 3, %v9518_v2  ;;  %v3735_v56 = vxor.u32 2147483648, %v3734_v59  ;;  %v12266_v10 = vld [vmem:[#allocation54_spill] sm:$0xff] }
 0x3f7   :  { %v4882_v43 = vsel %vm4880_vm12, %v12248_v58, %v12247_v39  ;;  %v4885_v44 = vsel %vm4883_vm4, %v12249_v32, %v12246_v28  ;;  %7092 = vst [vmem:[%s11709_s2 + $0x148] sm:$0xff] %v4784_v1  ;;  %vm12252_vm11 = vweird.f32 %v12251_v33  ;;  %v5290_v60 = vand.u32 3, %v9640_v50  ;;  %v12268_v28 = vld [vmem:[#allocation38_spill] sm:$0xff]  ;;  %v12270_v58 = vld [vmem:[#allocation59_spill] sm:$0xff] }
 0x3f8   :  { %v4886_v37 = vsel %vm4879_vm2, %v4882_v43, %v4885_v44  ;;  %v5393_v18 = vand.u32 3, %v9728_v31  ;;  %vm4982_vm14 = vcmp.lt.s32.totalorder %v4981_v63, 2  ;;  %vm4983_vm3 = vcmp.eq.s32.totalorder %v4981_v63, 0  ;;  %v12272_v32 = vld [vmem:[#allocation58_spill] sm:$0xff] }
 0x3f9   :  { %v4887_v27 = vsel %vm12252_vm11, nan, %v4886_v37  ;;  %vm4986_vm6 = vcmp.eq.s32.totalorder %v4981_v63, 2  ;;  %vm5085_vm1 = vcmp.lt.s32.totalorder %v5084_v26, 2  ;;  %v3736_v41 = vsel %vm3653_vm8, %v3735_v56, %v3734_v59  ;;  %v12276_v33 = vld [vmem:[#allocation62_spill] sm:$0xff] }
 0x3fa   :  { %7093 = vst [vmem:[%s11709_s2 + $0x150] sm:$0xff] %v4887_v27  ;;  %v12253_v2 = vxor.u32 2147483648, %v9430_v5  ;;  %v12255_v50 = vxor.u32 2147483648, %v12254_v49  ;;  %vm5086_vm10 = vcmp.eq.s32.totalorder %v5084_v26, 0  ;;  %v3739_v31 = vsel %vm11217_vm0, %v10937_v48, %v3736_v41 }
 0x3fb   :  { %v12257_v8 = vxor.u32 2147483648, %v12256_v57  ;;  %vm5089_vm7 = vcmp.eq.s32.totalorder %v5084_v26, 2  ;;  %7674 = vcosq.f32 %v3739_v31  ;;  %vm12260_vm8 = vweird.f32 %v12259_v25 }
 0x3fc   :  { %v4985_v6 = vsel %vm4983_vm3, %v12254_v49, %v12253_v2  ;;  %v4988_v21 = vsel %vm4986_vm6, %v12255_v50, %v9430_v5  ;;  %v12261_v17 = vxor.u32 2147483648, %v12258_v36  ;;  %vm5188_vm9 = vcmp.lt.s32.totalorder %v5187_v11, 2  ;;  %v12280_v50 = vld [vmem:[#allocation66_spill] sm:$0xff] }
 0x3fd   :  { %v4989_v30 = vsel %vm4982_vm14, %v4985_v6, %v4988_v21  ;;  %v5088_v20 = vsel %vm5086_vm10, %v12258_v36, %v12257_v8  ;;  %7676 = vsinq.f32 %v3739_v31  ;;  %vm5189_vm2 = vcmp.eq.s32.totalorder %v5187_v11, 0  ;;  %v12283_v8 = vld [vmem:[#allocation65_spill] sm:$0xff]  ;;  %v12285_v36 = vld [vmem:[#allocation64_spill] sm:$0xff] }
 0x3fe   :  { %v4990_v22 = vsel %vm12260_vm8, nan, %v4989_v30  ;;  %v5091_v42 = vsel %vm5089_vm7, %v12261_v17, %v12256_v57  ;;  %vm5192_vm12 = vcmp.eq.s32.totalorder %v5187_v11, 2  ;;  %vm12263_vm0 = vweird.f32 %v12262_v53  ;;  %v12275_v11 = vld [vmem:[#allocation61_spill] sm:$0xff]  ;;  %v12287_v17 = vld [vmem:[#allocation52_spill] sm:$0xff] }
 0x3ff   :  { %v5092_v5 = vsel %vm5085_vm1, %v5088_v20, %v5091_v42  ;;  %7094 = vst [vmem:[%s11709_s2 + $0x158] sm:$0xff] %v4990_v22  ;;  %v12265_v7 = vxor.u32 2147483648, %v12264_v52  ;;  %v12267_v59 = vxor.u32 2147483648, %v12266_v10  ;;  %vm5291_vm4 = vcmp.lt.s32.totalorder %v5290_v60, 2  ;;  %v12281_v30 = vld [vmem:[#allocation45_spill] sm:$0xff] }
 0x400   :  { %v5093_v4 = vsel %vm12263_vm0, nan, %v5092_v5  ;;  %vm5292_vm5 = vcmp.eq.s32.totalorder %v5290_v60, 0  ;;  %vm5295_vm11 = vcmp.eq.s32.totalorder %v5290_v60, 2  ;;  %vm5394_vm14 = vcmp.lt.s32.totalorder %v5393_v18, 2  ;;  %v12277_v60 = vld [vmem:[#allocation44_spill] sm:$0xff] }
 0x401   :  { %v5191_v24 = vsel %vm5189_vm2, %v12266_v10, %v12265_v7  ;;  %v5194_v55 = vsel %vm5192_vm12, %v12267_v59, %v12264_v52  ;;  %7095 = vst [vmem:[%s11709_s2 + $0x160] sm:$0xff] %v5093_v4  ;;  %vm3750_vm3 = vcmp.eq.s32.totalorder %v11301_v14, 2  ;;  %vm12269_vm6 = vweird.f32 %v12268_v28  ;;  %v12289_v5 = vld [vmem:[#allocation68_spill] sm:$0xff]  ;;  %v12291_v4 = vld [vmem:[#allocation67_spill] sm:$0xff] }
 0x402   :  { %v5195_v1 = vsel %vm5188_vm9, %v5191_v24, %v5194_v55  ;;  %v12271_v43 = vxor.u32 2147483648, %v12270_v58  ;;  %v12273_v37 = vxor.u32 2147483648, %v12272_v32  ;;  %vm5395_vm1 = vcmp.eq.s32.totalorder %v5393_v18, 0 }
 0x403   :  { %v5196_v39 = vsel %vm12269_vm6, nan, %v5195_v1  ;;  %vm3747_vm10 = vcmp.eq.s32.totalorder %v11301_v14, 0  ;;  %v12274_v26 = vxor.u32 2147483648, %v9809_v9  ;;  %vm5398_vm7 = vcmp.eq.s32.totalorder %v5393_v18, 2  ;;  %v12293_v1 = vld [vmem:[#allocation71_spill] sm:$0xff] }
 0x404   :  { %v5294_v44 = vsel %vm5292_vm5, %v12272_v32, %v12271_v43  ;;  %v5297_v13 = vsel %vm5295_vm11, %v12273_v37, %v12270_v58  ;;  %v5496_v27 = vand.u32 3, %v12276_v33  ;;  %7096 = vst [vmem:[%s11709_s2 + $0x168] sm:$0xff] %v5196_v39  ;;  %vm3746_vm8 = vcmp.lt.s32.totalorder %v11301_v14, 2  ;;  %v12295_v39 = vld [vmem:[#allocation69_spill] sm:$0xff]  ;;  %v12300_v33 = vld [vmem:[#allocation75_spill] sm:$0xff] }
 0x405   :  { %v5298_v63 = vsel %vm5291_vm4, %v5294_v44, %v5297_v13  ;;  %v5397_v56 = vsel %vm5395_vm1, %v12275_v11, %v12274_v26  ;;  %vm12278_vm9 = vweird.f32 %v12277_v60  ;;  %v12279_v2 = vxor.u32 2147483648, %v12275_v11  ;;  %v11497_v22 = vpop.eup %7674  ;;  %v12296_v32 = vld [vmem:[#allocation53_spill] sm:$0xff]  ;;  %v12301_v60 = vld [vmem:[#allocation78_spill] sm:$0xff] }
 0x406   :  { %v5299_v41 = vsel %vm12278_vm9, nan, %v5298_v63  ;;  %v5599_v6 = vand.u32 3, %v9909_v54  ;;  %v5702_v21 = vand.u32 3, %v12280_v50  ;;  %vm3743_vm2 = vweird.f32 %v10937_v48  ;;  %v12299_v63 = vld [vmem:[#allocation70_spill] sm:$0xff] }
 0x407   :  { %v5400_v49 = vsel %vm5398_vm7, %v12279_v2, %v9809_v9  ;;  %vm5497_vm12 = vcmp.lt.s32.totalorder %v5496_v27, 2  ;;  %vm5498_vm0 = vcmp.eq.s32.totalorder %v5496_v27, 0  ;;  %vm5501_vm4 = vcmp.eq.s32.totalorder %v5496_v27, 2  ;;  %7097 = vst [vmem:[%s11709_s2 + $0x170] sm:$0xff] %v5299_v41  ;;  %v11507_v24 = vpop.eup %7676 }
 0x408   :  { %v5401_v31 = vsel %vm5394_vm14, %v5397_v56, %v5400_v49  ;;  %vm12282_vm5 = vweird.f32 %v12281_v30  ;;  %v12284_v9 = vxor.u32 2147483648, %v12283_v8  ;;  %v12286_v20 = vxor.u32 2147483648, %v12285_v36  ;;  %v12302_v49 = vld [vmem:[#allocation56_spill] sm:$0xff]  ;;  %v12306_v30 = vld [vmem:[#allocation73_spill] sm:$0xff] }
 0x409   :  { %v5402_v57 = vsel %vm12282_vm5, nan, %v5401_v31  ;;  %vm5600_vm11 = vcmp.lt.s32.totalorder %v5599_v6, 2  ;;  %vm5601_vm14 = vcmp.eq.s32.totalorder %v5599_v6, 0  ;;  %vm5604_vm6 = vcmp.eq.s32.totalorder %v5599_v6, 2 }
 0x40a   :  { %v5500_v54 = vsel %vm5498_vm0, %v12285_v36, %v12284_v9  ;;  %v5503_v25 = vsel %vm5501_vm4, %v12286_v20, %v12283_v8  ;;  %vm5703_vm1 = vcmp.lt.s32.totalorder %v5702_v21, 2  ;;  %7098 = vst [vmem:[%s11709_s2 + $0x178] sm:$0xff] %v5402_v57  ;;  %vm12288_vm7 = vweird.f32 %v12287_v17 }
 0x40b   :  { %v5504_v18 = vsel %vm5497_vm12, %v5500_v54, %v5503_v25  ;;  %v12290_v53 = vxor.u32 2147483648, %v12289_v5  ;;  %v12292_v7 = vxor.u32 2147483648, %v12291_v4  ;;  %vm5704_vm9 = vcmp.eq.s32.totalorder %v5702_v21, 0  ;;  %v12308_v54 = vld [vmem:[#allocation77_spill] sm:$0xff]  ;;  %v12310_v25 = vld [vmem:[#allocation76_spill] sm:$0xff] }
 0x40c   :  { %v5505_v42 = vsel %vm12288_vm7, nan, %v5504_v18  ;;  %v3751_v59 = vxor.u32 2147483648, %v11497_v22  ;;  %v12294_v28 = vxor.u32 2147483648, %v12293_v1  ;;  %vm5707_vm12 = vcmp.eq.s32.totalorder %v5702_v21, 2  ;;  %v12304_v21 = vld [vmem:[#allocation74_spill] sm:$0xff] }
 0x40d   :  { %v5603_v52 = vsel %vm5601_vm14, %v12291_v4, %v12290_v53  ;;  %v5606_v10 = vsel %vm5604_vm6, %v12292_v7, %v12289_v5  ;;  %7099 = vst [vmem:[%s11709_s2 + $0x180] sm:$0xff] %v5505_v42  ;;  %v3748_v43 = vxor.u32 2147483648, %v11507_v24  ;;  %vm12297_vm0 = vweird.f32 %v12296_v32  ;;  %v12312_v5 = vld [vmem:[#allocation57_spill] sm:$0xff]  ;;  %v12320_v32 = vld [vmem:[#allocation80_spill] sm:$0xff] }
 0x40e   :  { %v5607_v55 = vsel %vm5600_vm11, %v5603_v52, %v5606_v10  ;;  %v5706_v58 = vsel %vm5704_vm9, %v12295_v39, %v12294_v28  ;;  %v12298_v37 = vxor.u32 2147483648, %v12295_v39  ;;  %v5805_v26 = vand.u32 3, %v12299_v63  ;;  %v12314_v52 = vld [vmem:[#allocation60_spill] sm:$0xff]  ;;  %v12316_v10 = vld [vmem:[#allocation81_spill] sm:$0xff] }
 0x40f   :  { %v5608_v44 = vsel %vm12297_vm0, nan, %v5607_v55  ;;  %v3752_v11 = vsel %vm3750_vm3, %v3751_v59, %v11507_v24  ;;  %v5908_v27 = vand.u32 3, %v12300_v33  ;;  %v6011_v41 = vand.u32 3, %v12301_v60 }
 0x410   :  { %v5709_v13 = vsel %vm5707_vm12, %v12298_v37, %v12293_v1  ;;  %7100 = vst [vmem:[%s11709_s2 + $0x188] sm:$0xff] %v5608_v44  ;;  %v3749_v2 = vsel %vm3747_vm10, %v11497_v22, %v3748_v43  ;;  %vm12303_vm4 = vweird.f32 %v12302_v49  ;;  %vm5806_vm3 = vcmp.lt.s32.totalorder %v5805_v26, 2  ;;  %v12318_v1 = vld [vmem:[#allocation79_spill] sm:$0xff] }
 0x411   :  { %v5710_v56 = vsel %vm5703_vm1, %v5706_v58, %v5709_v13  ;;  %vm5807_vm5 = vcmp.eq.s32.totalorder %v5805_v26, 0  ;;  %v3753_v50 = vsel %vm3746_vm8, %v3749_v2, %v3752_v11  ;;  %v12305_v31 = vxor.u32 2147483648, %v12304_v21  ;;  %v12321_v13 = vld [vmem:[#allocation82_spill] sm:$0xff]  ;;  %v12328_v49 = vld [vmem:[#allocation83_spill] sm:$0xff] }
 0x412   :  { %v5711_v6 = vsel %vm12303_vm4, nan, %v5710_v56  ;;  %vm5810_vm11 = vcmp.eq.s32.totalorder %v5805_v26, 2  ;;  %vm5909_vm14 = vcmp.lt.s32.totalorder %v5908_v27, 2  ;;  %v3754_v8 = vsel %vm3743_vm2, nan, %v3753_v50  ;;  %v12322_v26 = vld [vmem:[#allocation85_spill] sm:$0xff]  ;;  %v12323_v56 = vld [vmem:[#allocation88_spill] sm:$0xff] }
 0x413   :  { %v5809_v57 = vsel %vm5807_vm5, %v12306_v30, %v12305_v31  ;;  %7101 = vst [vmem:[%s11709_s2 + $0x190] sm:$0xff] %v5711_v6  ;;  %v12307_v9 = vxor.u32 2147483648, %v12306_v30  ;;  %vm5910_vm10 = vcmp.eq.s32.totalorder %v5908_v27, 0  ;;  %vm5913_vm6 = vcmp.eq.s32.totalorder %v5908_v27, 2  ;;  %7082 = vst [vmem:[%s11709_s2 + $0xf8] sm:$0xff] %v3754_v8  ;;  %v12324_v27 = vld [vmem:[#allocation63_spill] sm:$0xff] }
 0x414   :  { %v12309_v20 = vxor.u32 2147483648, %v12308_v54  ;;  %v12311_v17 = vxor.u32 2147483648, %v12310_v25  ;;  %vm6012_vm8 = vcmp.lt.s32.totalorder %v6011_v41, 2  ;;  %7146 = vst [vmem:[%s11709_s2 + $0x2f8] sm:$0xff] %v3754_v8  ;;  %vm12313_vm1 = vweird.f32 %v12312_v5  ;;  %v12330_v30 = vld [vmem:[#allocation87_spill] sm:$0xff]  ;;  %v12332_v8 = vld [vmem:[#allocation86_spill] sm:$0xff] }
 0x415   :  { %v5812_v36 = vsel %vm5810_vm11, %v12307_v9, %v12304_v21  ;;  %vm6013_vm7 = vcmp.eq.s32.totalorder %v6011_v41, 0  ;;  %vm6016_vm9 = vcmp.eq.s32.totalorder %v6011_v41, 2  ;;  %vm12315_vm12 = vweird.f32 %v12314_v52  ;;  %v12326_v41 = vld [vmem:[#allocation84_spill] sm:$0xff]  ;;  %v12340_v52 = vld [vmem:[#allocation6_spill] sm:$0xff] }
 0x416   :  { %v5813_v14 = vsel %vm5806_vm3, %v5809_v57, %v5812_v36  ;;  %v5912_v18 = vsel %vm5910_vm10, %v12310_v25, %v12309_v20  ;;  %v5915_v42 = vsel %vm5913_vm6, %v12311_v17, %v12308_v54  ;;  %v12317_v55 = vxor.u32 2147483648, %v12316_v10  ;;  %v12333_v36 = vld [vmem:[#allocation72_spill] sm:$0xff] }
 0x417   :  { %v5814_v53 = vsel %vm12313_vm1, nan, %v5813_v14  ;;  %v5916_v4 = vsel %vm5909_vm14, %v5912_v18, %v5915_v42  ;;  %v12319_v39 = vxor.u32 2147483648, %v12318_v1  ;;  %v6114_v44 = vand.u32 3, %v12320_v32  ;;  %v12336_v18 = vld [vmem:[#allocation89_spill] sm:$0xff]  ;;  %v12338_v42 = vld [vmem:[#allocation7_spill] sm:$0xff] }
 0x418   :  { %v5917_v7 = vsel %vm12315_vm12, nan, %v5916_v4  ;;  %v6015_v28 = vsel %vm6013_vm7, %v12318_v1, %v12317_v55  ;;  %7102 = vst [vmem:[%s11709_s2 + $0x198] sm:$0xff] %v5814_v53  ;;  %v6217_v63 = vand.u32 3, %v12321_v13  ;;  %v6320_v11 = vand.u32 3, %v12322_v26  ;;  %v12342_v55 = vld [vmem:[#allocation2_spill] sm:$0xff] }
 0x419   :  { %v6018_v58 = vsel %vm6016_vm9, %v12319_v39, %v12316_v10  ;;  %v6423_v33 = vand.u32 3, %v12323_v56  ;;  %7103 = vst [vmem:[%s11709_s2 + $0x1a0] sm:$0xff] %v5917_v7  ;;  %vm12325_vm0 = vweird.f32 %v12324_v27  ;;  %vm6115_vm4 = vcmp.lt.s32.totalorder %v6114_v44, 2  ;;  %v12348_v13 = vld [vmem:[#allocation90_spill] sm:$0xff] }
 0x41a   :  { %v6019_v37 = vsel %vm6012_vm8, %v6015_v28, %v6018_v58  ;;  %vm6116_vm3 = vcmp.eq.s32.totalorder %v6114_v44, 0  ;;  %vm6119_vm5 = vcmp.eq.s32.totalorder %v6114_v44, 2  ;;  %v12327_v2 = vxor.u32 2147483648, %v12326_v41  ;;  %v12344_v28 = vld [vmem:[#allocation91_spill] sm:$0xff]  ;;  %v12346_v58 = vld [vmem:[#allocation8_spill] sm:$0xff] }
 0x41b   :  { %v6020_v60 = vsel %vm12325_vm0, nan, %v6019_v37  ;;  %v12329_v50 = vxor.u32 2147483648, %v12328_v49  ;;  %vm6218_vm11 = vcmp.lt.s32.totalorder %v6217_v63, 2  ;;  %vm6219_vm14 = vcmp.eq.s32.totalorder %v6217_v63, 0 }
 0x41c   :  { %v6118_v6 = vsel %vm6116_vm3, %v12328_v49, %v12327_v2  ;;  %7104 = vst [vmem:[%s11709_s2 + $0x1a8] sm:$0xff] %v6020_v60  ;;  %v12331_v57 = vxor.u32 2147483648, %v12330_v30  ;;  %vm6222_vm10 = vcmp.eq.s32.totalorder %v6217_v63, 2  ;;  %vm6321_vm6 = vcmp.lt.s32.totalorder %v6320_v11, 2  ;;  %v12353_v49 = vld [vmem:[#allocation94_spill] sm:$0xff] }
 0x41d   :  { %v6121_v21 = vsel %vm6119_vm5, %v12329_v50, %v12326_v41  ;;  %vm12334_vm8 = vweird.f32 %v12333_v36  ;;  %v12335_v54 = vxor.u32 2147483648, %v12332_v8  ;;  %vm6322_vm1 = vcmp.eq.s32.totalorder %v6320_v11, 0  ;;  %v12351_v41 = vld [vmem:[#allocation3_spill] sm:$0xff]  ;;  %v12355_v50 = vld [vmem:[#allocation93_spill] sm:$0xff] }
 0x41e   :  { %v6122_v31 = vsel %vm6115_vm4, %v6118_v6, %v6121_v21  ;;  %v6221_v9 = vsel %vm6219_vm14, %v12332_v8, %v12331_v57  ;;  %vm6325_vm7 = vcmp.eq.s32.totalorder %v6320_v11, 2  ;;  %v12337_v17 = vxor.u32 2147483648, %v12336_v18  ;;  %v12349_v11 = vld [vmem:[#allocation92_spill] sm:$0xff]  ;;  %v12357_v57 = vld [vmem:[#allocation95_spill] sm:$0xff] }
 0x41f   :  { %v6123_v14 = vsel %vm12334_vm8, nan, %v6122_v31  ;;  %v6224_v20 = vsel %vm6222_vm10, %v12335_v54, %v12330_v30  ;;  %v12339_v53 = vxor.u32 2147483648, %v12338_v42  ;;  %vm6424_vm9 = vcmp.lt.s32.totalorder %v6423_v33, 2 }
 0x420   :  { %v6225_v25 = vsel %vm6218_vm11, %v6221_v9, %v6224_v20  ;;  %v6324_v5 = vsel %vm6322_vm1, %v12338_v42, %v12337_v17  ;;  %7105 = vst [vmem:[%s11709_s2 + $0x1b0] sm:$0xff] %v6123_v14  ;;  %vm12341_vm12 = vweird.f32 %v12340_v52  ;;  %vm6425_vm0 = vcmp.eq.s32.totalorder %v6423_v33, 0  ;;  %v12359_v9 = vld [vmem:[#allocation10_spill] sm:$0xff]  ;;  %v12360_v14 = vld [vmem:[#allocation4_spill] sm:$0xff] }
 0x421   :  { %v6327_v4 = vsel %vm6325_vm7, %v12339_v53, %v12336_v18  ;;  %v6226_v7 = vsel %vm12341_vm12, nan, %v6225_v25  ;;  %vm6428_vm4 = vcmp.eq.s32.totalorder %v6423_v33, 2  ;;  %vm12343_vm3 = vweird.f32 %v12342_v55  ;;  %v12350_v33 = vld [vmem:[#allocation9_spill] sm:$0xff] }
 0x422   :  { %v6328_v10 = vsel %vm6321_vm6, %v6324_v5, %v6327_v4  ;;  %v12345_v39 = vxor.u32 2147483648, %v12344_v28  ;;  %v12347_v44 = vxor.u32 2147483648, %v12346_v58  ;;  %v6526_v63 = vand.u32 3, %v12348_v13  ;;  %7106 = vst [vmem:[%s11709_s2 + $0x1b8] sm:$0xff] %v6226_v7  ;;  %v12363_v5 = vld [vmem:[#allocation5_spill] sm:$0xff] }
 0x423   :  { %v6329_v1 = vsel %vm12343_vm3, nan, %v6328_v10  ;;  %v6629_v56 = vand.u32 3, %v12349_v11  ;;  %v6732_v27 = vand.u32 3, %v12350_v33  ;;  %v6835_v60 = vand.u32 3, %v11045_v19 }
 0x424   :  { %v6427_v32 = vsel %vm6425_vm0, %v12346_v58, %v12345_v39  ;;  %v6430_v37 = vsel %vm6428_vm4, %v12347_v44, %v12344_v28  ;;  %7107 = vst [vmem:[%s11709_s2 + $0x1c0] sm:$0xff] %v6329_v1  ;;  %vm12352_vm5 = vweird.f32 %v12351_v41  ;;  %vm6527_vm11 = vcmp.lt.s32.totalorder %v6526_v63, 2 }
 0x425   :  { %v6431_v26 = vsel %vm6424_vm9, %v6427_v32, %v6430_v37  ;;  %vm6528_vm14 = vcmp.eq.s32.totalorder %v6526_v63, 0  ;;  %vm6531_vm10 = vcmp.eq.s32.totalorder %v6526_v63, 2  ;;  %v12354_v6 = vxor.u32 2147483648, %v12353_v49 }
 0x426   :  { %v6432_v2 = vsel %vm12352_vm5, nan, %v6431_v26  ;;  %v12356_v31 = vxor.u32 2147483648, %v12355_v50  ;;  %vm6630_vm6 = vcmp.lt.s32.totalorder %v6629_v56, 2  ;;  %vm6631_vm8 = vcmp.eq.s32.totalorder %v6629_v56, 0 }
 0x427   :  { %v6530_v21 = vsel %vm6528_vm14, %v12355_v50, %v12354_v6  ;;  %7108 = vst [vmem:[%s11709_s2 + $0x1c8] sm:$0xff] %v6432_v2  ;;  %v12358_v8 = vxor.u32 2147483648, %v12357_v57  ;;  %vm6634_vm1 = vcmp.eq.s32.totalorder %v6629_v56, 2  ;;  %vm6733_vm7 = vcmp.lt.s32.totalorder %v6732_v27, 2 }
 0x428   :  { %v6533_v30 = vsel %vm6531_vm10, %v12356_v31, %v12353_v49  ;;  %vm12361_vm9 = vweird.f32 %v12360_v14  ;;  %v12362_v20 = vxor.u32 2147483648, %v12359_v9  ;;  %vm6734_vm12 = vcmp.eq.s32.totalorder %v6732_v27, 0 }
 0x429   :  { %v6534_v19 = vsel %vm6527_vm11, %v6530_v21, %v6533_v30  ;;  %v6633_v36 = vsel %vm6631_vm8, %v12359_v9, %v12358_v8  ;;  %vm6737_vm0 = vcmp.eq.s32.totalorder %v6732_v27, 2  ;;  %v6736_v17 = vsel %vm6734_vm12, %v11078_v35, %v3436_v51 }
 0x42a   :  { %v6535_v54 = vsel %vm12361_vm9, nan, %v6534_v19  ;;  %v6636_v25 = vsel %vm6634_vm1, %v12362_v20, %v12357_v57  ;;  %v6739_v42 = vsel %vm6737_vm0, %v3439_v29, %v11086_v46  ;;  %vm6836_vm4 = vcmp.lt.s32.totalorder %v6835_v60, 2 }
 0x42b   :  { %v6637_v18 = vsel %vm6630_vm6, %v6633_v36, %v6636_v25  ;;  %7109 = vst [vmem:[%s11709_s2 + $0x1d0] sm:$0xff] %v6535_v54  ;;  %vm12364_vm3 = vweird.f32 %v12363_v5  ;;  %v6740_v4 = vsel %vm6733_vm7, %v6736_v17, %v6739_v42  ;;  %vm6837_vm5 = vcmp.eq.s32.totalorder %v6835_v60, 0 }
 0x42c   :  { %v6638_v53 = vsel %vm12364_vm3, nan, %v6637_v18  ;;  %vm6840_vm11 = vcmp.eq.s32.totalorder %v6835_v60, 2  ;;  %vm12365_vm14 = vweird.f32 %v10603_v16  ;;  %v6839_v51 = vsel %vm6837_vm5, %v11195_v38, %v3540_v61 }
 0x42d   :  { %v6741_v52 = vsel %vm12365_vm14, nan, %v6740_v4  ;;  %v6842_v35 = vsel %vm6840_vm11, %v3543_v62, %v11205_v15  ;;  %v6938_v46 = vand.u32 3, %v11159_v45  ;;  %7110 = vst [vmem:[%s11709_s2 + $0x1d8] sm:$0xff] %v6638_v53  ;;  %v7041_v7 = vand.u32 3, %v11274_v12 }
 0x42e   :  { %v6843_v29 = vsel %vm6836_vm4, %v6839_v51, %v6842_v35  ;;  %7111 = vst [vmem:[%s11709_s2 + $0x1e0] sm:$0xff] %v6741_v52 }
 0x42f   :  { %v6844_v16 = vsel %vm3535_vm13, nan, %v6843_v29  ;;  %vm6940_vm10 = vcmp.eq.s32.totalorder %v6938_v46, 0  ;;  %vm6943_vm6 = vcmp.eq.s32.totalorder %v6938_v46, 2  ;;  %vm6939_vm8 = vcmp.lt.s32.totalorder %v6938_v46, 2 }
 0x430   :  { %v6942_v45 = vsel %vm6940_vm10, %v11348_v47, %v3644_v23  ;;  %v6945_v38 = vsel %vm6943_vm6, %v3647_v3, %v11351_v34  ;;  %vm7043_vm1 = vcmp.eq.s32.totalorder %v7041_v7, 0  ;;  %7112 = vst [vmem:[%s11709_s2 + $0x1e8] sm:$0xff] %v6844_v16  ;;  %vm7046_vm13 = vcmp.eq.s32.totalorder %v7041_v7, 2 }
 0x431   :  { %v6946_v15 = vsel %vm6939_vm8, %v6942_v45, %v6945_v38  ;;  %v7045_v40 = vsel %vm7043_vm1, %v11497_v22, %v3748_v43  ;;  %vm7042_vm7 = vcmp.lt.s32.totalorder %v7041_v7, 2  ;;  %v7048_v61 = vsel %vm7046_vm13, %v3751_v59, %v11507_v24 }
 0x432   :  { %v6947_v62 = vsel %vm3639_vm15, nan, %v6946_v15  ;;  %v7049_v12 = vsel %vm7042_vm7, %v7045_v40, %v7048_v61 }
 0x433   :  { %7113 = vst [vmem:[%s11709_s2 + $0x1f0] sm:$0xff] %v6947_v62  ;;  %v7050_v47 = vsel %vm3743_vm2, nan, %v7049_v12 }
 0x434   :  { %7114 = vst [vmem:[%s11709_s2 + $0x1f8] sm:$0xff] %v7050_v47 }

</bundles_post_ra>
